<compile_context>
chip_gen: v5e
topology: v5e:2x2
jax: 0.10.0
libtpu: 0.0.40
codegen_flags: <defaults>
</compile_context>

<pallas_src>
import functools

import jax
import jax.numpy as jnp
import numpy as np
from jax.experimental import pallas as pl
from jax.experimental.pallas import tpu as pltpu

# ---------------- constants (torchaudio kaldi fbank defaults used by ASTFeatureExtractor) ----
SR = 16000
FRAME_LEN = 400            # 25 ms
FRAME_SHIFT = 160          # 10 ms
NFFT = 512                 # padded_window_size (round to power of two)
NBINS = 256                # rfft bins kept (nyquist bin has zero mel weight -> dropped)
KW = 3 * FRAME_SHIFT       # 480 samples materialized per frame (>= FRAME_LEN)
PREEMPH = 0.97
EPS = 1.1920928955078125e-07   # torch.finfo(torch.float32).eps
MU = -7.8449515625
SIGMA = 0.8363084375
MAX_LENGTH = 100
MEL_BINS = 128


# ---------------- glue: deterministic "parameter" construction -------------------------------
def _mel_scale(freq):
    return 1127.0 * np.log(1.0 + freq / 700.0)


def make_mel_filterbank(num_bins=MEL_BINS, nfft=NFFT, sr=SR, low_freq=20.0, high_freq=0.0):
    """Kaldi-compatible triangular mel filterbank, shape (NBINS, num_bins) for spectrum @ fb."""
    num_fft_bins = nfft // 2
    nyquist = 0.5 * sr
    if high_freq <= 0.0:
        high_freq = nyquist + high_freq
    fft_bin_width = sr / nfft
    mel_low = _mel_scale(low_freq)
    mel_high = _mel_scale(high_freq)
    mel_delta = (mel_high - mel_low) / (num_bins + 1)

    b = np.arange(num_bins, dtype=np.float64)[:, None]
    left_mel = mel_low + b * mel_delta
    center_mel = mel_low + (b + 1.0) * mel_delta
    right_mel = mel_low + (b + 2.0) * mel_delta

    mel = _mel_scale(fft_bin_width * np.arange(num_fft_bins, dtype=np.float64))[None, :]
    up_slope = (mel - left_mel) / (center_mel - left_mel)
    down_slope = (right_mel - mel) / (right_mel - center_mel)
    fb = np.maximum(0.0, np.minimum(up_slope, down_slope))        # (num_bins, NBINS)
    return jnp.asarray(fb.T, dtype=jnp.float32)                   # (NBINS, num_bins)


def make_combined_frontend_matrix(kw=KW, nfft=NFFT, nbins=NBINS,
                                  frame_len=FRAME_LEN, preemph=PREEMPH):
    """Compose DC-removal, pre-emphasis, Hann window and the (cos|sin) DFT into one
    (KW, 2*NBINS) weight.  Rows >= frame_len are zero, so the 80 extra samples carried in each
    480-sample slab contribute nothing."""
    # DC removal: y = x - mean(x)
    D = np.eye(frame_len) - np.full((frame_len, frame_len), 1.0 / frame_len)
    # Pre-emphasis with replicate-pad of the first sample: z_j = y_j - 0.97 * y_{j-1}
    P = np.eye(frame_len)
    P[0, 0] -= preemph
    i = np.arange(frame_len - 1)
    P[i, i + 1] = -preemph
    # Symmetric Hann ("hanning") window
    n = np.arange(frame_len, dtype=np.float64)
    H = np.diag(0.5 - 0.5 * np.cos(2.0 * np.pi * n / (frame_len - 1)))
    # DFT of the zero-padded NFFT-sample frame; only the first frame_len rows are non-zero.
    j = np.arange(frame_len, dtype=np.float64)[:, None]
    k = np.arange(nbins, dtype=np.float64)[None, :]
    ang = 2.0 * np.pi * j * k / nfft
    C = np.concatenate([np.cos(ang), np.sin(ang)], axis=1)        # (400, 2*NBINS)

    W = D @ P @ H @ C                                             # (400, 2*NBINS)
    W_full = np.zeros((kw, 2 * nbins), dtype=np.float64)
    W_full[:frame_len] = W
    return jnp.asarray(W_full, dtype=jnp.float32)                 # (480, 512)


# ---------------- Pallas kernel ----------------------------------------------------------------
def fbank_kernel(frames_ref, w_ref, mel_ref, out_ref, *, tm, n_valid, max_length, mu, inv_scale):
    fr = frames_ref[...]                                          # (TM, KW) raw samples
    # single MXU pass: fused DC/preemph/window/DFT -> [re | im] on the lane axis
    spec = jnp.dot(fr, w_ref[...], preferred_element_type=jnp.float32)      # (TM, 2*NBINS)
    re = spec[:, :NBINS]                                          # lane-aligned slices (free)
    im = spec[:, NBINS:]
    power = re * re + im * im                                     # power spectrum
    mel = jnp.dot(power, mel_ref[...], preferred_element_type=jnp.float32)  # (TM, MEL)
    logmel = jnp.log(jnp.maximum(mel, EPS))

    if n_valid < max_length:                                      # static: zero-pad invalid frames
        m0 = pl.program_id(0) * tm
        rows = jax.lax.broadcasted_iota(jnp.int32, (tm, 1), 0) + m0
        frame_idx = rows % max_length                             # frame index within its clip
        logmel = jnp.where(frame_idx < n_valid, logmel, 0.0)
    out_ref[...] = (logmel - mu) * inv_scale                      # AST normalize (mul, not div)


# ---------------- wrapper ----------------------------------------------------------------------
def ast_preproc(waveform, sr, *, mu=MU, sigma=SIGMA, max_length=MAX_LENGTH, mel_bins=MEL_BINS):
    # TODO(synk): F.resample path (sr != 16000) not implemented; this synthetic test uses sr == 16000.
    assert sr == SR, "resampling path not implemented"
    if waveform.ndim > 2:
        waveform = waveform.reshape(-1, *waveform.shape[2:])
    if waveform.ndim == 1:
        waveform = waveform[None, :]
    waveform = waveform.astype(jnp.float32)
    B, T = waveform.shape
    assert T >= FRAME_LEN, "waveform shorter than one frame"

    # snip_edges=True frame count; cap at max_length (longer clips are truncated anyway)
    n_frames = 1 + (T - FRAME_LEN) // FRAME_SHIFT
    n_valid = min(n_frames, max_length)

    # --- frame assembly with cheap XLA ops (no gather, no index array) ---
    # Row r of the reshaped waveform holds samples [r*160, (r+1)*160); frame i is the first 400
    # samples of rows (i, i+1, i+2) concatenated.  Samples 400..479 hit zero rows of W_eff and
    # samples beyond T are zero-padded (they only touch frames >= n_valid, masked in-kernel).
    L = FRAME_SHIFT * (max_length + 2)                            # 16320 samples cover max_length frames
    if T >= L:
        w = waveform[:, :L]
    else:
        w = jnp.pad(waveform, ((0, 0), (0, L - T)))
    rows = w.reshape(B, max_length + 2, FRAME_SHIFT)
    frames = jnp.concatenate(
        [rows[:, 0:max_length], rows[:, 1:max_length + 1], rows[:, 2:max_length + 2]], axis=-1
    )                                                             # (B, max_length, KW)

    # --- flatten batch into the MXU M axis and pad to a tile multiple ---
    M_total = B * max_length
    frames = frames.reshape(M_total, KW)
    # TM=256 is the sweet spot on v6e/v7x; 128 keeps small batches on an even >=2-step grid
    # (both v7x TensorCores fed) and suits v5e's 128-row MXU.
    TM = 256 if M_total >= 512 else 128
    M_pad = -(-M_total // TM) * TM
    if M_pad != M_total:
        frames = jnp.pad(frames, ((0, M_pad - M_total), (0, 0)))

    w_comb = make_combined_frontend_matrix()                      # (KW, 2*NBINS)
    mel_fb = make_mel_filterbank(num_bins=mel_bins)               # (NBINS, mel_bins)

    kernel = functools.partial(
        fbank_kernel,
        tm=int(TM),
        n_valid=int(n_valid),
        max_length=int(max_length),
        mu=float(mu),
        inv_scale=float(1.0 / (2.0 * sigma)),
    )
    out = pl.pallas_call(
        kernel,
        out_shape=jax.ShapeDtypeStruct((M_pad, mel_bins), jnp.float32),
        grid=(M_pad // TM,),
        in_specs=[
            pl.BlockSpec((TM, KW), lambda i: (i, 0)),
            pl.BlockSpec((KW, 2 * NBINS), lambda i: (0, 0), pipeline_mode=pl.Buffered(1)),
            pl.BlockSpec((NBINS, mel_bins), lambda i: (0, 0), pipeline_mode=pl.Buffered(1)),
        ],
        out_specs=pl.BlockSpec((TM, mel_bins), lambda i: (i, 0)),
        compiler_params=pltpu.CompilerParams(dimension_semantics=("parallel",)),
    )(frames, w_comb, mel_fb)

    return out[:M_total].reshape(B, max_length, mel_bins)         # (B, max_length, mel_bins)


# ---------------- demo -------------------------------------------------------------------------
if __name__ == "__main__":
    key = jax.random.PRNGKey(0)
    B, T = 2, 8000                                                # 0.5 s @ 16 kHz -> 48 frames
    waveform = jax.random.normal(key, (B, T), dtype=jnp.float32) * 0.1

    run = jax.jit(ast_preproc, static_argnums=(1,))
    out = run(waveform, SR)
    out = jax.block_until_ready(out)

    assert out.shape == (B, MAX_LENGTH, MEL_BINS), out.shape
    assert bool(jnp.all(jnp.isfinite(out)))
    # rows past the real frame count (48) must equal the normalized zero-pad constant
    pad_const = (0.0 - MU) / (2.0 * SIGMA)
    assert bool(jnp.allclose(out[:, 60:, :], pad_const, atol=1e-5))
    print("KERNEL_OK")
</pallas_src>

<mosaic_0001>
module attributes {stable_mosaic.version = 11 : i64} {
  func.func @fbank_kernel(%arg0: i32, %arg1: memref<128x480xf32, #tpu.memory_space<vmem>>, %arg2: memref<480x512xf32, #tpu.memory_space<vmem>>, %arg3: memref<256x128xf32, #tpu.memory_space<vmem>>, %arg4: memref<128x128xf32, #tpu.memory_space<vmem>>) attributes {dimension_semantics = [#tpu.dimension_semantics<parallel>], iteration_bounds = array<i64: 2>, scalar_prefetch = 0 : i64, scratch_operands = 0 : i64, tpu.core_type = #tpu.core_type<tc>, window_params = [{transform_indices = @transform_0, window_bounds = array<i64: 128, 480>}, {pipeline_mode = #tpu.pipeline_mode<synchronous>, transform_indices = @transform_1, window_bounds = array<i64: 480, 512>}, {pipeline_mode = #tpu.pipeline_mode<synchronous>, transform_indices = @transform_2, window_bounds = array<i64: 256, 128>}, {transform_indices = @transform_3, window_bounds = array<i64: 128, 128>}]} {
    %c0 = arith.constant 0 : index
    %c0_0 = arith.constant 0 : index
    %0 = vector.load %arg1[%c0, %c0_0] : memref<128x480xf32, #tpu.memory_space<vmem>>, vector<128x480xf32>
    %c0_1 = arith.constant 0 : index
    %c0_2 = arith.constant 0 : index
    %1 = vector.load %arg2[%c0_1, %c0_2] : memref<480x512xf32, #tpu.memory_space<vmem>>, vector<480x512xf32>
    %cst = arith.constant dense<0.000000e+00> : vector<128x512xf32>
    %2 = tpu.matmul %0, %1, %cst {dimension_numbers = #tpu.dot_dimension_numbers<[1], [0], [0], [1], [0, 0, 1, 1], [], []>} : vector<128x480xf32>, vector<480x512xf32>, vector<128x512xf32> -> vector<128x512xf32>
    %3 = vector.extract_strided_slice %2 {offsets = [0, 0], sizes = [128, 256], strides = [1, 1]} : vector<128x512xf32> to vector<128x256xf32>
    %4 = vector.extract_strided_slice %2 {offsets = [0, 256], sizes = [128, 256], strides = [1, 1]} : vector<128x512xf32> to vector<128x256xf32>
    %5 = arith.mulf %3, %3 : vector<128x256xf32>
    %6 = arith.mulf %4, %4 : vector<128x256xf32>
    %7 = arith.addf %5, %6 : vector<128x256xf32>
    %c0_3 = arith.constant 0 : index
    %c0_4 = arith.constant 0 : index
    %8 = vector.load %arg3[%c0_3, %c0_4] : memref<256x128xf32, #tpu.memory_space<vmem>>, vector<256x128xf32>
    %cst_5 = arith.constant dense<0.000000e+00> : vector<128x128xf32>
    %9 = tpu.matmul %7, %8, %cst_5 {dimension_numbers = #tpu.dot_dimension_numbers<[1], [0], [0], [1], [0, 0, 1, 1], [], []>} : vector<128x256xf32>, vector<256x128xf32>, vector<128x128xf32> -> vector<128x128xf32>
    %cst_6 = arith.constant 1.1920929E-7 : f32
    %10 = vector.broadcast %cst_6 : f32 to vector<128x128xf32>
    %11 = arith.maximumf %9, %10 : vector<128x128xf32>
    %12 = math.log %11 : vector<128x128xf32>
    %c128_i32 = arith.constant 128 : i32
    %13 = arith.muli %arg0, %c128_i32 : i32
    %14 = tpu.iota {dimensions = array<i32: 0>} : vector<128x1xi32>
    %15 = vector.broadcast %13 : i32 to vector<128x1xi32>
    %16 = arith.addi %14, %15 : vector<128x1xi32>
    %c100_i32 = arith.constant 100 : i32
    %c0_i32 = arith.constant 0 : i32
    %17 = arith.cmpi eq, %c100_i32, %c0_i32 : i32
    %c1_i32 = arith.constant 1 : i32
    %18 = arith.select %17, %c1_i32, %c100_i32 : i32
    %19 = vector.broadcast %18 : i32 to vector<128x1xi32>
    %20 = arith.remsi %16, %19 : vector<128x1xi32>
    %c0_i32_7 = arith.constant 0 : i32
    %21 = vector.broadcast %c0_i32_7 : i32 to vector<128x1xi32>
    %22 = arith.cmpi ne, %20, %21 : vector<128x1xi32>
    %c0_i32_8 = arith.constant 0 : i32
    %23 = vector.broadcast %c0_i32_8 : i32 to vector<128x1xi32>
    %24 = arith.cmpi slt, %20, %23 : vector<128x1xi32>
    %c0_i32_9 = arith.constant 0 : i32
    %25 = arith.cmpi slt, %18, %c0_i32_9 : i32
    %26 = vector.broadcast %25 : i1 to vector<128x1xi1>
    %27 = vector.broadcast %26 : vector<128x1xi1> to vector<128x1xi1>
    %28 = arith.xori %24, %27 : vector<128x1xi1>
    %29 = arith.andi %28, %22 : vector<128x1xi1>
    %30 = vector.broadcast %18 : i32 to vector<128x1xi32>
    %31 = arith.addi %20, %30 : vector<128x1xi32>
    %32 = arith.select %29, %31, %20 : vector<128x1xi1>, vector<128x1xi32>
    %c48_i32 = arith.constant 48 : i32
    %33 = vector.broadcast %c48_i32 : i32 to vector<128x1xi32>
    %34 = arith.cmpi slt, %32, %33 : vector<128x1xi32>
    %cst_10 = arith.constant 0.000000e+00 : f32
    %35 = vector.shape_cast %34 : vector<128x1xi1> to vector<128x1xi1>
    %36 = vector.broadcast %35 : vector<128x1xi1> to vector<128x128xi1>
    %37 = vector.broadcast %cst_10 : f32 to vector<128x128xf32>
    %38 = arith.select %36, %12, %37 : vector<128x128xi1>, vector<128x128xf32>
    %cst_11 = arith.constant -7.84495163 : f32
    %39 = vector.broadcast %cst_11 : f32 to vector<128x128xf32>
    %40 = arith.subf %38, %39 : vector<128x128xf32>
    %cst_12 = arith.constant 0.597865522 : f32
    %41 = vector.broadcast %cst_12 : f32 to vector<128x128xf32>
    %42 = arith.mulf %40, %41 : vector<128x128xf32>
    %c0_13 = arith.constant 0 : index
    %c0_14 = arith.constant 0 : index
    %43 = vector.load %arg4[%c0_13, %c0_14] : memref<128x128xf32, #tpu.memory_space<vmem>>, vector<128x128xf32>
    tpu.vector_store %arg4[%c0_13, %c0_14], %42 {strides = array<i32>} : memref<128x128xf32, #tpu.memory_space<vmem>>, vector<128x128xf32>,
    return
  }
  func.func @transform_0(%arg0: i32) -> (i32, i32) {
    %c0_i32 = arith.constant 0 : i32
    %c0_i32_0 = arith.constant 0 : i32
    return %arg0, %c0_i32 : i32, i32
  }
  func.func @transform_1(%arg0: i32) -> (i32, i32) {
    %c0_i32 = arith.constant 0 : i32
    %c0_i32_0 = arith.constant 0 : i32
    %c0_i32_1 = arith.constant 0 : i32
    return %c0_i32, %c0_i32_0 : i32, i32
  }
  func.func @transform_2(%arg0: i32) -> (i32, i32) {
    %c0_i32 = arith.constant 0 : i32
    %c0_i32_0 = arith.constant 0 : i32
    %c0_i32_1 = arith.constant 0 : i32
    return %c0_i32, %c0_i32_0 : i32, i32
  }
  func.func @transform_3(%arg0: i32) -> (i32, i32) {
    %c0_i32 = arith.constant 0 : i32
    %c0_i32_0 = arith.constant 0 : i32
    return %arg0, %c0_i32 : i32, i32
  }
}

</mosaic_0001>

<bundles_post_ra>
// kernel: ast_preproc.1
= control target key start
LH: loop header
LB: loop body
LE: loop exit
PB: predicated region body
PF: predicated region fallthrough
CT: control target
= control target key end

     0   :  { %s2879_s12 = smov 0   ;;  %s5477_s0 = inlined_call_operand.vmem [shape: f32[256,480], index: 0, kind: input, shape index: {}]   ;;  %s5478_s1 = inlined_call_operand.vmem [shape: f32[480,512], index: 1, kind: input, shape index: {}]   ;;  %s5479_s2 = inlined_call_operand.vmem [shape: f32[256,128], index: 2, kind: input, shape index: {}]   ;;  %s5480_s3 = inlined_call_operand.vmem [shape: f32[256,128], index: 3, kind: output, shape index: {}]  }
   0x1 LB: > { %s2623_s13 = sadd.s32 4294967295, %s2856_s12   ;;  %p2627_p0 = scmp.ge.s32.totalorder %s2856_s12, 1  ;;  %s2856_s12 = sphi %s2879_s12, %s13_s12  }
   0x2   : > { %p139_p1 = scmp.lt.s32.totalorder %s2856_s12, 3 }
   0x4   : > { %p140_p2 = pnand %p2627_p0, %p139_p1 }
   0x6   : > { %143 = sbr.rel (%p140_p2) target bundleno = 903 (0x387), region = 32 }
   0xb   : > { %v301_v0 = vld [vmem:[%s5478_s1 + $0x1e0] sm:$0xff]  ;;  %s2628_s21 = sshll.u32 %s2623_s13, 4  ;;  %vm481_vm0 = vcmask 785408   ;;  %v302_v52 = vld [vmem:[%s5478_s1 + $0x1e8] sm:$0xff]  ;;  %s2697_s29 = sshll.u32 %s2623_s13, 7 }
   0xc   : > { %v429_v1 = vld [vmem:[%s5478_s1 + $0x5e0] sm:$0xff]  ;;  %2717 = vmatpush.msra.mxu1 %v301_v0  ;;  %530 = vmatpush.msra.mxu0 %v301_v0  ;;  %p165_p3 = scmp.lt.s32.totalorder %s2628_s21, 31  ;;  %v298_v57 = vld [vmem:[%s5478_s1 + $0x1c8] sm:$0xff] }
   0xd   : > { %v297_v2 = vld [vmem:[%s5478_s1 + $0x1c0] sm:$0xff]  ;;  %660 = vmatpush.msra.mxu2 %v429_v1  ;;  %v294_v58 = vld [vmem:[%s5478_s1 + $0x1a8] sm:$0xff] }
   0xe   : > { %v425_v3 = vld [vmem:[%s5478_s1 + $0x5c0] sm:$0xff]  ;;  %2718 = vmatpush.msra.mxu1 %v297_v2  ;;  %531 = vmatpush.msra.mxu0 %v297_v2  ;;  %s5743_s21 = smov (!%p165_p3, %s2628_s21), 31  ;;  %v290_v61 = vld [vmem:[%s5478_s1 + $0x188] sm:$0xff] }
   0xf   : > { %v293_v4 = vld [vmem:[%s5478_s1 + $0x1a0] sm:$0xff]  ;;  %661 = vmatpush.msra.mxu2 %v425_v3  ;;  %s2716_s30 = sshll.u32 %s5743_s21, 5  ;;  %v286_v63 = vld [vmem:[%s5478_s1 + $0x168] sm:$0xff]  ;;  %s2632_s13 = sshll.u32 %s5743_s21, 3 }
  0x10   : > { %v421_v5 = vld [vmem:[%s5478_s1 + $0x5a0] sm:$0xff]  ;;  %2719 = vmatpush.msra.mxu1 %v293_v4  ;;  %532 = vmatpush.msra.mxu0 %v293_v4  ;;  %s3039_s18 = scalar_lea.vmem %s5477_s0, %s2716_s30  ;;  %v282_v4 = vld [vmem:[%s5478_s1 + $0x148] sm:$0xff]  ;;  %s5109_s21 = scalar_lea.vmem %s5480_s3, %s2632_s13 }
  0x11   : > { %v2908_v6 = vld [vmem:[%s5478_s1 + $0x760] sm:$0xff]  ;;  %662 = vmatpush.msra.mxu2 %v421_v5  ;;  %v3054_v40 = vld [vmem:[%s3039_s18 + $0xf8] sm:$0xff]  ;;  %v3075_v46 = vld [vmem:[%s3039_s18 + $0x10] sm:$0xff] }
  0x12   : > { %v2913_v7 = vld [vmem:[%s5478_s1 + $0x740] sm:$0xff]  ;;  %2733 = vmatpush.msra.mxu3 %v2908_v6  ;;  %v3087_v49 = vld [vmem:[%s3039_s18 + $0x118] sm:$0xff]  ;;  %v3105_v54 = vld [vmem:[%s3039_s18 + $0x30] sm:$0xff] }
  0x13   : > { %v289_v8 = vld [vmem:[%s5478_s1 + $0x180] sm:$0xff]  ;;  %v3124_v59 = vld [vmem:[%s3039_s18 + $0x138] sm:$0xff]  ;;  %v3146_v1 = vld [vmem:[%s3039_s18 + $0x50] sm:$0xff] }
  0x14   : > { %v417_v9 = vld [vmem:[%s5478_s1 + $0x580] sm:$0xff]  ;;  %2734 = vmatpush.msra.mxu3 %v2913_v7  ;;  %2720 = vmatpush.msra.mxu1 %v289_v8  ;;  %v278_v5 = vld [vmem:[%s5478_s1 + $0x128] sm:$0xff] }
  0x15   : > { %v2925_v10 = vld [vmem:[%s5478_s1 + $0x720] sm:$0xff]  ;;  %663 = vmatpush.msra.mxu2 %v417_v9  ;;  %533 = vmatpush.msra.mxu0 %v289_v8  ;;  %v274_v8 = vld [vmem:[%s5478_s1 + $0x108] sm:$0xff] }
  0x16   : > { %v285_v11 = vld [vmem:[%s5478_s1 + $0x160] sm:$0xff]  ;;  %2735 = vmatpush.msra.mxu3 %v2925_v10 }
  0x17   : > { %v413_v12 = vld [vmem:[%s5478_s1 + $0x560] sm:$0xff]  ;;  %2721 = vmatpush.msra.mxu1 %v285_v11  ;;  %534 = vmatpush.msra.mxu0 %v285_v11 }
  0x18   : > { %v2937_v13 = vld [vmem:[%s5478_s1 + $0x700] sm:$0xff]  ;;  %664 = vmatpush.msra.mxu2 %v413_v12  ;;  %v3186_v12 = vld [vmem:[%s3039_s18 + $0x70] sm:$0xff] }
  0x19   : > { %v281_v14 = vld [vmem:[%s5478_s1 + $0x140] sm:$0xff]  ;;  %2736 = vmatpush.msra.mxu3 %v2937_v13 }
  0x1a   : > { %v409_v15 = vld [vmem:[%s5478_s1 + $0x540] sm:$0xff]  ;;  %2722 = vmatpush.msra.mxu1 %v281_v14  ;;  %535 = vmatpush.msra.mxu0 %v281_v14 }
  0x1b   : > { %v2951_v16 = vld [vmem:[%s5478_s1 + $0x6e0] sm:$0xff]  ;;  %665 = vmatpush.msra.mxu2 %v409_v15  ;;  %v266_v15 = vld [vmem:[%s5478_s1 + $0xc8] sm:$0xff] }
  0x1c   : > { %v277_v17 = vld [vmem:[%s5478_s1 + $0x120] sm:$0xff]  ;;  %2737 = vmatpush.msra.mxu3 %v2951_v16 }
  0x1d   : > { %v405_v18 = vld [vmem:[%s5478_s1 + $0x520] sm:$0xff]  ;;  %2723 = vmatpush.msra.mxu1 %v277_v17  ;;  %536 = vmatpush.msra.mxu0 %v277_v17  ;;  %v3204_v17 = vld [vmem:[%s3039_s18 + $0x178] sm:$0xff] }
  0x1e   : > { %v2963_v19 = vld [vmem:[%s5478_s1 + $0x6c0] sm:$0xff]  ;;  %666 = vmatpush.msra.mxu2 %v405_v18 }
  0x1f   : > { %v273_v20 = vld [vmem:[%s5478_s1 + $0x100] sm:$0xff]  ;;  %2738 = vmatpush.msra.mxu3 %v2963_v19 }
  0x20   : > { %v401_v21 = vld [vmem:[%s5478_s1 + $0x500] sm:$0xff]  ;;  %2724 = vmatpush.msra.mxu1 %v273_v20  ;;  %537 = vmatpush.msra.mxu0 %v273_v20 }
  0x21   : > { %v2975_v22 = vld [vmem:[%s5478_s1 + $0x6a0] sm:$0xff]  ;;  %667 = vmatpush.msra.mxu2 %v401_v21  ;;  %v254_v21 = vld [vmem:[%s5478_s1 + $0x68] sm:$0xff] }
  0x22   : > { %v269_v23 = vld [vmem:[%s5478_s1 + $0xe0] sm:$0xff]  ;;  %2739 = vmatpush.msra.mxu3 %v2975_v22 }
  0x23   : > { %v397_v24 = vld [vmem:[%s5478_s1 + $0x4e0] sm:$0xff]  ;;  %2725 = vmatpush.msra.mxu1 %v269_v23  ;;  %538 = vmatpush.msra.mxu0 %v269_v23 }
  0x24   : > { %v2987_v25 = vld [vmem:[%s5478_s1 + $0x680] sm:$0xff]  ;;  %668 = vmatpush.msra.mxu2 %v397_v24  ;;  %v3229_v24 = vld [vmem:[%s3039_s18 + $0x90] sm:$0xff] }
  0x25   : > { %v265_v26 = vld [vmem:[%s5478_s1 + $0xc0] sm:$0xff]  ;;  %2740 = vmatpush.msra.mxu3 %v2987_v25 }
  0x26   : > { %v393_v27 = vld [vmem:[%s5478_s1 + $0x4c0] sm:$0xff]  ;;  %2726 = vmatpush.msra.mxu1 %v265_v26  ;;  %539 = vmatpush.msra.mxu0 %v265_v26  ;;  %v250_v26 = vld [vmem:[%s5478_s1 + $0x48] sm:$0xff] }
  0x27   : > { %v3002_v28 = vld [vmem:[%s5478_s1 + $0x660] sm:$0xff]  ;;  %669 = vmatpush.msra.mxu2 %v393_v27  ;;  %v246_v27 = vld [vmem:[%s5478_s1 + $0x28] sm:$0xff] }
  0x28   : > { %v261_v29 = vld [vmem:[%s5478_s1 + $0xa0] sm:$0xff]  ;;  %2741 = vmatpush.msra.mxu3 %v3002_v28 }
  0x29   : > { %v389_v30 = vld [vmem:[%s5478_s1 + $0x4a0] sm:$0xff]  ;;  %2727 = vmatpush.msra.mxu1 %v261_v29  ;;  %540 = vmatpush.msra.mxu0 %v261_v29  ;;  %v242_v29 = vld [vmem:[%s5478_s1 + $0x8] sm:$0xff] }
  0x2a   : > { %v3014_v31 = vld [vmem:[%s5478_s1 + $0x640] sm:$0xff]  ;;  %670 = vmatpush.msra.mxu2 %v389_v30 }
  0x2b   : > { %v257_v32 = vld [vmem:[%s5478_s1 + $0x80] sm:$0xff]  ;;  %2742 = vmatpush.msra.mxu3 %v3014_v31 }
  0x2c   : > { %v385_v33 = vld [vmem:[%s5478_s1 + $0x480] sm:$0xff]  ;;  %2728 = vmatpush.msra.mxu1 %v257_v32  ;;  %541 = vmatpush.msra.mxu0 %v257_v32  ;;  %v3258_v32 = vld [vmem:[%s3039_s18 + $0xb0] sm:$0xff] }
  0x2d   : > { %v3027_v34 = vld [vmem:[%s5478_s1 + $0x620] sm:$0xff]  ;;  %671 = vmatpush.msra.mxu2 %v385_v33  ;;  %v426_v33 = vld [vmem:[%s5478_s1 + $0x5c8] sm:$0xff] }
  0x2e   : > { %v253_v35 = vld [vmem:[%s5478_s1 + $0x60] sm:$0xff]  ;;  %2743 = vmatpush.msra.mxu3 %v3027_v34 }
  0x2f   : > { %v381_v36 = vld [vmem:[%s5478_s1 + $0x460] sm:$0xff]  ;;  %2729 = vmatpush.msra.mxu1 %v253_v35  ;;  %542 = vmatpush.msra.mxu0 %v253_v35 }
  0x30   : > { %v3044_v37 = vld [vmem:[%s5478_s1 + $0x600] sm:$0xff]  ;;  %672 = vmatpush.msra.mxu2 %v381_v36 }
  0x31   : > { %v249_v38 = vld [vmem:[%s5478_s1 + $0x40] sm:$0xff]  ;;  %2744 = vmatpush.msra.mxu3 %v3044_v37 }
  0x32   : > { %v377_v39 = vld [vmem:[%s5478_s1 + $0x440] sm:$0xff]  ;;  %2730 = vmatpush.msra.mxu1 %v249_v38  ;;  %2640 = vmatmul.msk.f32.vlgmr.msra.gmra.mxu3 %vm481_vm0, %v3054_v40 }
  0x33   : > { %v245_v41 = vld [vmem:[%s5478_s1 + $0x20] sm:$0xff]  ;;  %673 = vmatpush.msra.mxu2 %v377_v39  ;;  %543 = vmatpush.msra.mxu0 %v249_v38  ;;  %v422_v38 = vld [vmem:[%s5478_s1 + $0x5a8] sm:$0xff]  ;;  %v3287_v39 = vld [vmem:[%s3039_s18 + $0x1d8] sm:$0xff] }
  0x34   : > { %v373_v42 = vld [vmem:[%s5478_s1 + $0x420] sm:$0xff]  ;;  %2731 = vmatpush.msra.mxu1 %v245_v41  ;;  %790 = vmatpush.msrb.mxu3 %v302_v52  ;;  %5492 = vst [vmem:[#allocation2_spill] sm:$0xff] %v3287_v39  ;;  %v414_v52 = vld [vmem:[%s5478_s1 + $0x568] sm:$0xff] }
  0x35   : > { %v241_v43 = vld [vmem:[%s5478_s1] sm:$0xff]  ;;  %674 = vmatpush.msra.mxu2 %v373_v42  ;;  %544 = vmatpush.msra.mxu0 %v245_v41 }
  0x36   : > { %v369_v44 = vld [vmem:[%s5478_s1 + $0x400] sm:$0xff]  ;;  %2732 = vmatpush.msra.mxu1 %v241_v43  ;;  %791 = vmatpush.msrb.mxu3 %v298_v57  ;;  %v3334_v57 = vld [vmem:[%s3039_s18 + $0x130] sm:$0xff] }
  0x37   : > { %v3072_v45 = vld [vmem:[%s3039_s18 + $0x100] sm:$0xff]  ;;  %675 = vmatpush.msra.mxu2 %v369_v44  ;;  %545 = vmatpush.msra.mxu0 %v241_v43  ;;  %v3298_v43 = vld [vmem:[%s3039_s18 + $0xf0] sm:$0xff]  ;;  %v418_v44 = vld [vmem:[%s5478_s1 + $0x588] sm:$0xff] }
  0x38   : > { %v365_v47 = vld [vmem:[%s5478_s1 + $0x3e0] sm:$0xff]  ;;  %570 = vmatmul.f32.vlgmr.msra.gmra.mxu1 %v3072_v45  ;;  %676 = vmatmul.f32.vlgmr.msra.gmra.mxu2 %v3075_v46 }
  0x39   : > { %v361_v48 = vld [vmem:[%s5478_s1 + $0x3c0] sm:$0xff]  ;;  %595 = vmatpush.msrb.mxu1 %v365_v47  ;;  %729 = vmatpush.msrb.mxu2 %v2908_v6  ;;  %v3164_v6 = vld [vmem:[%s3039_s18 + $0x158] sm:$0xff] }
  0x3a   : > { %v357_v50 = vld [vmem:[%s5478_s1 + $0x3a0] sm:$0xff]  ;;  %2641 = vmatmul.msk.f32.gmra.mxu3 %vm481_vm0, %v3087_v49  ;;  %v3307_v47 = vld [vmem:[%s3039_s18 + $0x1f8] sm:$0xff] }
  0x3b   : > { %596 = vmatpush.msrb.mxu1 %v361_v48  ;;  %730 = vmatpush.msrb.mxu2 %v2913_v7  ;;  %v353_v51 = vld [vmem:[%s5478_s1 + $0x380] sm:$0xff]  ;;  %5493 = vst [vmem:[#allocation3_spill] sm:$0xff] %v3307_v47 }
  0x3c   : > { %v3102_v53 = vld [vmem:[%s3039_s18 + $0x120] sm:$0xff]  ;;  %792 = vmatpush.msrb.mxu3 %v294_v58  ;;  %v410_v58 = vld [vmem:[%s5478_s1 + $0x548] sm:$0xff] }
  0x3d   : > { %597 = vmatpush.msrb.mxu1 %v357_v50  ;;  %731 = vmatpush.msrb.mxu2 %v2925_v10  ;;  %v349_v55 = vld [vmem:[%s5478_s1 + $0x360] sm:$0xff]  ;;  %v270_v10 = vld [vmem:[%s5478_s1 + $0xe8] sm:$0xff] }
  0x3e   : > { %v345_v56 = vld [vmem:[%s5478_s1 + $0x340] sm:$0xff]  ;;  %793 = vmatpush.msrb.mxu3 %v290_v61  ;;  %v3315_v50 = vld [vmem:[%s3039_s18 + $0x8] sm:$0xff] }
  0x3f   : > { %598 = vmatpush.msrb.mxu1 %v353_v51  ;;  %732 = vmatpush.msrb.mxu2 %v2937_v13  ;;  %v341_v60 = vld [vmem:[%s5478_s1 + $0x320] sm:$0xff]  ;;  %v3318_v51 = vld [vmem:[%s3039_s18 + $0x110] sm:$0xff]  ;;  %v3347_v61 = vld [vmem:[%s3039_s18 + $0x48] sm:$0xff] }
  0x40   : > { %573 = vmatmul.f32.gmra.mxu1 %v3102_v53  ;;  %679 = vmatmul.f32.gmra.mxu2 %v3105_v54  ;;  %v337_v62 = vld [vmem:[%s5478_s1 + $0x300] sm:$0xff]  ;;  %5494 = vst [vmem:[#allocation4_spill] sm:$0xff] %v3347_v61 }
  0x41   : > { %599 = vmatpush.msrb.mxu1 %v349_v55  ;;  %733 = vmatpush.msrb.mxu2 %v2951_v16  ;;  %v3143_v0 = vld [vmem:[%s3039_s18 + $0x140] sm:$0xff]  ;;  %v262_v16 = vld [vmem:[%s5478_s1 + $0xa8] sm:$0xff] }
  0x42   : > { %2642 = vmatmul.msk.f32.gmra.mxu3 %vm481_vm0, %v3124_v59  ;;  %v333_v2 = vld [vmem:[%s5478_s1 + $0x2e0] sm:$0xff] }
  0x43   : > { %600 = vmatpush.msrb.mxu1 %v345_v56  ;;  %734 = vmatpush.msrb.mxu2 %v2963_v19  ;;  %v329_v3 = vld [vmem:[%s5478_s1 + $0x2c0] sm:$0xff]  ;;  %v258_v19 = vld [vmem:[%s5478_s1 + $0x88] sm:$0xff] }
  0x44   : > { %794 = vmatpush.msrb.mxu3 %v286_v63  ;;  %v325_v7 = vld [vmem:[%s5478_s1 + $0x2a0] sm:$0xff]  ;;  %v3331_v56 = vld [vmem:[%s3039_s18 + $0x28] sm:$0xff] }
  0x45   : > { %601 = vmatpush.msrb.mxu1 %v341_v60  ;;  %735 = vmatpush.msrb.mxu2 %v2975_v22  ;;  %v321_v9 = vld [vmem:[%s5478_s1 + $0x280] sm:$0xff]  ;;  %v406_v63 = vld [vmem:[%s5478_s1 + $0x528] sm:$0xff] }
  0x46   : > { %795 = vmatpush.msrb.mxu3 %v282_v4  ;;  %v3183_v11 = vld [vmem:[%s3039_s18 + $0x160] sm:$0xff]  ;;  %v3366_v4 = vld [vmem:[%s3039_s18 + $0x170] sm:$0xff] }
  0x47   : > { %602 = vmatpush.msrb.mxu1 %v337_v62  ;;  %736 = vmatpush.msrb.mxu2 %v2987_v25  ;;  %v317_v13 = vld [vmem:[%s5478_s1 + $0x260] sm:$0xff]  ;;  %v430_v25 = vld [vmem:[%s5478_s1 + $0x5e8] sm:$0xff]  ;;  %v3350_v62 = vld [vmem:[%s3039_s18 + $0x150] sm:$0xff] }
  0x48   : > { %576 = vmatmul.f32.gmra.mxu1 %v3143_v0  ;;  %682 = vmatmul.f32.gmra.mxu2 %v3146_v1  ;;  %v313_v14 = vld [vmem:[%s5478_s1 + $0x240] sm:$0xff] }
  0x49   : > { %603 = vmatpush.msrb.mxu1 %v333_v2  ;;  %796 = vmatpush.msrb.mxu3 %v278_v5  ;;  %v309_v18 = vld [vmem:[%s5478_s1 + $0x220] sm:$0xff]  ;;  %v402_v5 = vld [vmem:[%s5478_s1 + $0x508] sm:$0xff] }
  0x4a   : > { %2643 = vmatmul.msk.f32.gmra.mxu3 %vm481_vm0, %v3164_v6  ;;  %737 = vmatpush.msrb.mxu2 %v3002_v28  ;;  %v305_v20 = vld [vmem:[%s5478_s1 + $0x200] sm:$0xff]  ;;  %v3244_v28 = vld [vmem:[%s3039_s18 + $0x198] sm:$0xff] }
  0x4b   : > { %604 = vmatpush.msrb.mxu1 %v329_v3  ;;  %797 = vmatpush.msrb.mxu3 %v274_v8  ;;  %v3222_v22 = vld [vmem:[%s3039_s18] sm:$0xff]  ;;  %v3363_v3 = vld [vmem:[%s3039_s18 + $0x68] sm:$0xff]  ;;  %v3379_v8 = vld [vmem:[%s3039_s18 + $0x190] sm:$0xff] }
  0x4c   : > { %738 = vmatpush.msrb.mxu2 %v3014_v31  ;;  %v3226_v23 = vld [vmem:[%s3039_s18 + $0x180] sm:$0xff]  ;;  %546 = vmatmul.f32.vlgmr.msra.gmra.mxu0 %v3222_v22 }
  0x4d   : > { %605 = vmatpush.msrb.mxu1 %v325_v7  ;;  %798 = vmatpush.msrb.mxu3 %v270_v10  ;;  %v3252_v30 = vld [vmem:[%s3039_s18 + $0x20] sm:$0xff]  ;;  %v3376_v7 = vld [vmem:[%s3039_s18 + $0x88] sm:$0xff] }
  0x4e   : > { %739 = vmatpush.msrb.mxu2 %v3027_v34  ;;  %v3255_v31 = vld [vmem:[%s3039_s18 + $0x1a0] sm:$0xff]  ;;  %v3267_v34 = vld [vmem:[%s3039_s18 + $0x1b8] sm:$0xff]  ;;  %v398_v10 = vld [vmem:[%s5478_s1 + $0x4e8] sm:$0xff] }
  0x4f   : > { %606 = vmatpush.msrb.mxu1 %v321_v9  ;;  %799 = vmatpush.msrb.mxu3 %v266_v15  ;;  %v3272_v35 = vld [vmem:[%s3039_s18 + $0x40] sm:$0xff]  ;;  %v366_v9 = vld [vmem:[%s5478_s1 + $0x3e8] sm:$0xff] }
  0x50   : > { %579 = vmatmul.f32.gmra.mxu1 %v3183_v11  ;;  %685 = vmatmul.f32.gmra.mxu2 %v3186_v12  ;;  %v3275_v36 = vld [vmem:[%s3039_s18 + $0x1c0] sm:$0xff]  ;;  %v3397_v15 = vld [vmem:[%s3039_s18 + $0xa8] sm:$0xff] }
  0x51   : > { %607 = vmatpush.msrb.mxu1 %v317_v13  ;;  %800 = vmatpush.msrb.mxu3 %v262_v16  ;;  %v3292_v41 = vld [vmem:[%s3039_s18 + $0x60] sm:$0xff]  ;;  %v362_v13 = vld [vmem:[%s5478_s1 + $0x3c8] sm:$0xff]  ;;  %v3400_v16 = vld [vmem:[%s3039_s18 + $0x1b0] sm:$0xff] }
  0x52   : > { %2644 = vmatmul.msk.f32.gmra.mxu3 %vm481_vm0, %v3204_v17  ;;  %740 = vmatpush.msrb.mxu2 %v3044_v37  ;;  %v3278_v37 = vld [vmem:[%s3039_s18 + $0xd0] sm:$0xff]  ;;  %v3295_v42 = vld [vmem:[%s3039_s18 + $0x1e0] sm:$0xff]  ;;  %5495 = vst [vmem:[#allocation5_spill] sm:$0xff] %v3400_v16 }
  0x53   : > { %608 = vmatpush.msrb.mxu1 %v313_v14  ;;  %801 = vmatpush.msrb.mxu3 %v258_v19  ;;  %v3312_v48 = vld [vmem:[%s3039_s18 + $0x80] sm:$0xff]  ;;  %v478_v14 = vld [vmem:[%s5478_s1 + $0x768] sm:$0xff] }
  0x54   : > { %549 = vmatmul.f32.gmra.mxu0 %v3252_v30  ;;  %v3328_v55 = vld [vmem:[%s3039_s18 + $0xa0] sm:$0xff]  ;;  %989 = vmatpush.msra.mxu2 %v478_v14  ;;  %v394_v19 = vld [vmem:[%s5478_s1 + $0x4c8] sm:$0xff] }
  0x55   : > { %609 = vmatpush.msrb.mxu1 %v309_v18  ;;  %802 = vmatpush.msrb.mxu3 %v254_v21  ;;  %v3344_v60 = vld [vmem:[%s3039_s18 + $0xc0] sm:$0xff]  ;;  %v358_v18 = vld [vmem:[%s5478_s1 + $0x3a8] sm:$0xff] }
  0x56   : > { %v3360_v2 = vld [vmem:[%s3039_s18 + $0xe0] sm:$0xff]  ;;  %855 = vmatpush.msrb.mxu0 %v366_v9  ;;  %v354_v21 = vld [vmem:[%s5478_s1 + $0x388] sm:$0xff] }
  0x57   : > { %610 = vmatpush.msrb.mxu1 %v305_v20  ;;  %803 = vmatpush.msrb.mxu3 %v250_v26  ;;  %v474_v20 = vld [vmem:[%s5478_s1 + $0x748] sm:$0xff]  ;;  %v3421_v26 = vld [vmem:[%s3039_s18 + $0x1d0] sm:$0xff] }
  0x58   : > { %582 = vmatmul.f32.gmra.mxu1 %v3226_v23  ;;  %688 = vmatmul.f32.gmra.mxu2 %v3229_v24  ;;  %5496 = vst [vmem:[#allocation6_spill] sm:$0xff] %v3421_v26  ;;  %v386_v9 = vld [vmem:[%s5478_s1 + $0x488] sm:$0xff] }
  0x59   : > { %920 = vmatpush.msra.mxu1 %v430_v25  ;;  %804 = vmatpush.msrb.mxu3 %v246_v27  ;;  %v3418_v25 = vld [vmem:[%s3039_s18 + $0xc8] sm:$0xff] }
  0x5a   : > { %2645 = vmatmul.msk.f32.gmra.mxu3 %vm481_vm0, %v3244_v28  ;;  %856 = vmatpush.msrb.mxu0 %v362_v13  ;;  %v350_v27 = vld [vmem:[%s5478_s1 + $0x368] sm:$0xff] }
  0x5b   : > { %805 = vmatpush.msrb.mxu3 %v242_v29  ;;  %921 = vmatpush.msra.mxu1 %v426_v33  ;;  %v470_v29 = vld [vmem:[%s5478_s1 + $0x728] sm:$0xff] }
  0x5c   : > { %552 = vmatmul.f32.gmra.mxu0 %v3272_v35  ;;  %990 = vmatpush.msra.mxu2 %v474_v20  ;;  %v390_v33 = vld [vmem:[%s5478_s1 + $0x4a8] sm:$0xff] }
  0x5d   : > { %922 = vmatpush.msra.mxu1 %v422_v38  ;;  %857 = vmatpush.msrb.mxu0 %v358_v18  ;;  %v346_v38 = vld [vmem:[%s5478_s1 + $0x348] sm:$0xff] }
  0x5e   : > { %991 = vmatpush.msra.mxu2 %v470_v29  ;;  %v458_v13 = vld [vmem:[%s5478_s1 + $0x6c8] sm:$0xff] }
  0x5f   : > { %923 = vmatpush.msra.mxu1 %v418_v44  ;;  %858 = vmatpush.msrb.mxu0 %v354_v21  ;;  %v466_v44 = vld [vmem:[%s5478_s1 + $0x708] sm:$0xff] }
  0x60   : > { %585 = vmatmul.f32.gmra.mxu1 %v3255_v31  ;;  %691 = vmatmul.f32.gmra.mxu2 %v3258_v32  ;;  %v3468_v18 = vld [vmem:[%s3039_s18 + $0x108] sm:$0xff] }
  0x61   : > { %924 = vmatpush.msra.mxu1 %v414_v52  ;;  %859 = vmatpush.msrb.mxu0 %v350_v27  ;;  %v3442_v52 = vld [vmem:[%s3039_s18 + $0xe8] sm:$0xff] }
  0x62   : > { %2646 = vmatmul.msk.f32.gmra.mxu3 %vm481_vm0, %v3267_v34  ;;  %992 = vmatpush.msra.mxu2 %v466_v44  ;;  %v334_v20 = vld [vmem:[%s5478_s1 + $0x2e8] sm:$0xff] }
  0x63   : > { %925 = vmatpush.msra.mxu1 %v410_v58  ;;  %860 = vmatpush.msrb.mxu0 %v346_v38  ;;  %v3445_v58 = vld [vmem:[%s3039_s18 + $0x1f0] sm:$0xff]  ;;  %v382_v27 = vld [vmem:[%s5478_s1 + $0x468] sm:$0xff] }
  0x64   : > { %555 = vmatmul.f32.gmra.mxu0 %v3292_v41  ;;  %5497 = vst [vmem:[#allocation7_spill] sm:$0xff] %v3445_v58  ;;  %v454_v29 = vld [vmem:[%s5478_s1 + $0x6a8] sm:$0xff] }
  0x65   : > { %926 = vmatpush.msra.mxu1 %v406_v63  ;;  %v342_v63 = vld [vmem:[%s5478_s1 + $0x328] sm:$0xff] }
  0x66   : > { %861 = vmatpush.msrb.mxu0 %v342_v63  ;;  %v3494_v44 = vld [vmem:[%s3039_s18 + $0x128] sm:$0xff]  ;;  %v3497_v63 = vld [vmem:[%s3039_s18 + $0x38] sm:$0xff] }
  0x67   : > { %927 = vmatpush.msra.mxu1 %v402_v5  ;;  %v462_v5 = vld [vmem:[%s5478_s1 + $0x6e8] sm:$0xff] }
  0x68   : > { %588 = vmatmul.f32.gmra.mxu1 %v3275_v36  ;;  %694 = vmatmul.f32.gmra.mxu2 %v3278_v37 }
  0x69   : > { %928 = vmatpush.msra.mxu1 %v398_v10  ;;  %993 = vmatpush.msra.mxu2 %v462_v5  ;;  %v338_v10 = vld [vmem:[%s5478_s1 + $0x308] sm:$0xff] }
  0x6a   : > { %2647 = vmatmul.msk.f32.gmra.mxu3 %vm481_vm0, %v3287_v39  ;;  %862 = vmatpush.msrb.mxu0 %v338_v10  ;;  %v326_v10 = vld [vmem:[%s5478_s1 + $0x2a8] sm:$0xff]  ;;  %v359_v39 = vld [vmem:[%s5478_s1 + $0x3b0] sm:$0xff] }
  0x6b   : > { %929 = vmatpush.msra.mxu1 %v394_v19  ;;  %994 = vmatpush.msra.mxu2 %v458_v13  ;;  %v3471_v19 = vld [vmem:[%s3039_s18 + $0x18] sm:$0xff]  ;;  %v303_v13 = vld [vmem:[%s5478_s1 + $0x1f0] sm:$0xff] }
  0x6c   : > { %558 = vmatmul.f32.gmra.mxu0 %v3312_v48  ;;  %1050 = vmatpush.msra.mxu3 %v303_v13  ;;  %v3534_v13 = vld [vmem:[%s3039_s18 + $0x148] sm:$0xff] }
  0x6d   : > { %930 = vmatpush.msra.mxu1 %v390_v33  ;;  %863 = vmatpush.msrb.mxu0 %v334_v20  ;;  %v330_v33 = vld [vmem:[%s5478_s1 + $0x2c8] sm:$0xff] }
  0x6e   : > { %995 = vmatpush.msra.mxu2 %v454_v29  ;;  %v378_v20 = vld [vmem:[%s5478_s1 + $0x448] sm:$0xff] }
  0x6f   : > { %931 = vmatpush.msra.mxu1 %v386_v9  ;;  %864 = vmatpush.msrb.mxu0 %v330_v33  ;;  %v450_v9 = vld [vmem:[%s5478_s1 + $0x688] sm:$0xff] }
  0x70   : > { %591 = vmatmul.f32.gmra.mxu1 %v3295_v42  ;;  %697 = vmatmul.f32.gmra.mxu2 %v3298_v43  ;;  %v322_v29 = vld [vmem:[%s5478_s1 + $0x288] sm:$0xff] }
  0x71   : > { %932 = vmatpush.msra.mxu1 %v382_v27  ;;  %996 = vmatpush.msra.mxu2 %v450_v9  ;;  %v299_v27 = vld [vmem:[%s5478_s1 + $0x1d0] sm:$0xff]  ;;  %v446_v33 = vld [vmem:[%s5478_s1 + $0x668] sm:$0xff] }
  0x72   : > { %2648 = vmatmul.msk.f32.gmra.mxu3 %vm481_vm0, %v3307_v47  ;;  %865 = vmatpush.msrb.mxu0 %v326_v10  ;;  %v295_v9 = vld [vmem:[%s5478_s1 + $0x1b0] sm:$0xff] }
  0x73   : > { %933 = vmatpush.msra.mxu1 %v378_v20  ;;  %1051 = vmatpush.msra.mxu3 %v299_v27  ;;  %v291_v20 = vld [vmem:[%s5478_s1 + $0x190] sm:$0xff] }
  0x74   : > { %561 = vmatmul.f32.gmra.mxu0 %v3328_v55  ;;  %997 = vmatpush.msra.mxu2 %v446_v33  ;;  %v442_v33 = vld [vmem:[%s5478_s1 + $0x648] sm:$0xff] }
  0x75   : > { %866 = vmatpush.msrb.mxu0 %v322_v29  ;;  %1052 = vmatpush.msra.mxu3 %v295_v9  ;;  %v318_v29 = vld [vmem:[%s5478_s1 + $0x268] sm:$0xff] }
  0x76   : > { %998 = vmatpush.msra.mxu2 %v442_v33  ;;  %v279_v33 = vld [vmem:[%s5478_s1 + $0x130] sm:$0xff] }
  0x77   : > { %1053 = vmatpush.msra.mxu3 %v291_v20  ;;  %867 = vmatpush.msrb.mxu0 %v318_v29  ;;  %v374_v20 = vld [vmem:[%s5478_s1 + $0x428] sm:$0xff] }
  0x78   : > { %611 = vmatmul.f32.vlgmr.msrb.gmra.mxu1 %v3315_v50  ;;  %700 = vmatmul.f32.gmra.mxu2 %v3318_v51  ;;  %v314_v29 = vld [vmem:[%s5478_s1 + $0x248] sm:$0xff] }
  0x79   : > { %934 = vmatpush.msra.mxu1 %v374_v20  ;;  %868 = vmatpush.msrb.mxu0 %v314_v29  ;;  %v3585_v29 = vld [vmem:[%s3039_s18 + $0x78] sm:$0xff] }
  0x7a   : > { %806 = vmatmul.f32.vlgmr.msrb.gmra.mxu3 %v3222_v22 }
  0x7c   : > { %564 = vmatmul.f32.gmra.mxu0 %v3344_v60 }
  0x80   : > { %614 = vmatmul.f32.gmra.mxu1 %v3331_v56  ;;  %703 = vmatmul.f32.gmra.mxu2 %v3334_v57 }
  0x82   : > { %809 = vmatmul.f32.gmra.mxu3 %v3252_v30 }
  0x84   : > { %567 = vmatmul.f32.gmra.mxu0 %v3360_v2 }
  0x88   : > { %617 = vmatmul.f32.gmra.mxu1 %v3347_v61  ;;  %706 = vmatmul.f32.gmra.mxu2 %v3350_v62 }
  0x8a   : > { %812 = vmatmul.f32.gmra.mxu3 %v3272_v35 }
  0x90   : > { %620 = vmatmul.f32.gmra.mxu1 %v3363_v3  ;;  %709 = vmatmul.f32.gmra.mxu2 %v3366_v4 }
  0x92   : > { %815 = vmatmul.f32.gmra.mxu3 %v3292_v41 }
  0x98   : > { %623 = vmatmul.f32.gmra.mxu1 %v3376_v7  ;;  %712 = vmatmul.f32.gmra.mxu2 %v3379_v8 }
  0x9a   : > { %818 = vmatmul.f32.gmra.mxu3 %v3312_v48 }
  0xa0   : > { %626 = vmatmul.f32.gmra.mxu1 %v3397_v15  ;;  %715 = vmatmul.f32.gmra.mxu2 %v3400_v16 }
  0xa2   : > { %821 = vmatmul.f32.gmra.mxu3 %v3328_v55 }
  0xa8   : > { %629 = vmatmul.f32.gmra.mxu1 %v3418_v25  ;;  %718 = vmatmul.f32.gmra.mxu2 %v3421_v26  ;;  %v3661_v26 = vld [vmem:[%s3039_s18 + $0x1a8] sm:$0xff] }
  0xaa   : > { %824 = vmatmul.f32.gmra.mxu3 %v3344_v60 }
  0xb0   : > { %632 = vmatmul.f32.gmra.mxu1 %v3442_v52  ;;  %721 = vmatmul.f32.gmra.mxu2 %v3445_v58  ;;  %v367_v58 = vld [vmem:[%s5478_s1 + $0x3f0] sm:$0xff] }
  0xb2   : > { %827 = vmatmul.f32.gmra.mxu3 %v3360_v2 }
  0xb5   : > { %v3465_v14 = vpop.f32.mrf.mxu1  ;;  %v3476_v21 = vpop.f32.mrf.mxu3 }
  0xb6   : > { %5498 = vst [vmem:[#allocation8_spill] sm:$0xff] %v3465_v14  ;;  %v310_v14 = vld [vmem:[%s5478_s1 + $0x228] sm:$0xff] }
  0xb7   : > { %5499 = vst [vmem:[#allocation9_spill] sm:$0xff] %v3476_v21  ;;  %869 = vmatpush.msrb.mxu0 %v310_v14  ;;  %v267_v14 = vld [vmem:[%s5478_s1 + $0xd0] sm:$0xff] }
  0xb8   : > { %635 = vmatmul.f32.gmra.mxu1 %v3468_v18  ;;  %2633 = vmatmul.msk.f32.vlgmr.msrb.gmra.mxu2 %vm481_vm0, %v3471_v19  ;;  %v479_v21 = vld [vmem:[%s5478_s1 + $0x770] sm:$0xff] }
  0xba   : > { %830 = vmatmul.f32.gmra.mxu3 %v3072_v45 }
  0xbb   : > { %v3490_v38 = vpop.f32.mrf.mxu2 }
  0xbd   : > { %v3499_v5 = vpop.f32.mrf.mxu1  ;;  %v3510_v45 = vpop.f32.mrf.mxu3 }
  0xbe   : > { %5500 = vst [vmem:[#allocation10_spill] sm:$0xff] %v3499_v5  ;;  %v3577_v5 = vld [vmem:[%s3039_s18 + $0x168] sm:$0xff] }
  0xbf   : > { %5501 = vst [vmem:[#allocation11_spill] sm:$0xff] %v3510_v45  ;;  %v3537_v45 = vld [vmem:[%s3039_s18 + $0x58] sm:$0xff] }
  0xc0   : > { %638 = vmatmul.f32.gmra.mxu1 %v3494_v44  ;;  %2634 = vmatmul.msk.f32.gmra.mxu2 %vm481_vm0, %v3497_v63 }
  0xc2   : > { %833 = vmatmul.f32.gmra.mxu3 %v3102_v53  ;;  %v287_v53 = vld [vmem:[%s5478_s1 + $0x170] sm:$0xff] }
  0xc3   : > { %v3530_v10 = vpop.f32.mrf.mxu2  ;;  %1054 = vmatpush.msra.mxu3 %v287_v53 }
  0xc5   : > { %v3542_v27 = vpop.f32.mrf.mxu1  ;;  %v3553_v9 = vpop.f32.mrf.mxu3 }
  0xc6   : > { %5502 = vst [vmem:[#allocation12_spill] sm:$0xff] %v3542_v27  ;;  %v283_v27 = vld [vmem:[%s5478_s1 + $0x150] sm:$0xff] }
  0xc7   : > { %5503 = vst [vmem:[#allocation13_spill] sm:$0xff] %v3553_v9  ;;  %1055 = vmatpush.msra.mxu3 %v283_v27  ;;  %v438_v9 = vld [vmem:[%s5478_s1 + $0x628] sm:$0xff]  ;;  %v275_v27 = vld [vmem:[%s5478_s1 + $0x110] sm:$0xff] }
  0xc8   : > { %641 = vmatmul.f32.gmra.mxu1 %v3534_v13  ;;  %2635 = vmatmul.msk.f32.gmra.mxu2 %vm481_vm0, %v3537_v45 }
  0xc9   : > { %1056 = vmatpush.msra.mxu3 %v279_v33  ;;  %999 = vmatpush.msra.mxu2 %v438_v9  ;;  %v370_v9 = vld [vmem:[%s5478_s1 + $0x408] sm:$0xff] }
  0xca   : > { %836 = vmatmul.f32.gmra.mxu3 %v3143_v0  ;;  %v271_v0 = vld [vmem:[%s5478_s1 + $0xf0] sm:$0xff]  ;;  %935 = vmatpush.msra.mxu1 %v370_v9 }
  0xcb   : > { %v3570_v53 = vpop.f32.mrf.mxu2  ;;  %1057 = vmatpush.msra.mxu3 %v275_v27  ;;  %v434_v27 = vld [vmem:[%s5478_s1 + $0x608] sm:$0xff]  ;;  %v259_v9 = vld [vmem:[%s5478_s1 + $0x90] sm:$0xff] }
  0xcc   : > { %1000 = vmatpush.msra.mxu2 %v434_v27 }
  0xcd   : > { %v3582_v20 = vpop.f32.mrf.mxu1  ;;  %v3593_v33 = vpop.f32.mrf.mxu3  ;;  %1058 = vmatpush.msra.mxu3 %v271_v0  ;;  %v306_v0 = vld [vmem:[%s5478_s1 + $0x208] sm:$0xff] }
  0xce   : > { %5504 = vst [vmem:[#allocation14_spill] sm:$0xff] %v3582_v20  ;;  %870 = vmatpush.msrb.mxu0 %v306_v0  ;;  %1249 = vmatpush.msrb.mxu2 %v479_v21  ;;  %v3629_v0 = vld [vmem:[%s3039_s18 + $0x98] sm:$0xff] }
  0xcf   : > { %5505 = vst [vmem:[#allocation15_spill] sm:$0xff] %v3593_v33  ;;  %1059 = vmatpush.msra.mxu3 %v267_v14  ;;  %v263_v33 = vld [vmem:[%s5478_s1 + $0xb0] sm:$0xff]  ;;  %871 = vmatmul.f32.vlgmr.msrb.gmra.mxu0 %v3315_v50  ;;  %v3626_v14 = vld [vmem:[%s3039_s18 + $0x188] sm:$0xff] }
  0xd0   : > { %644 = vmatmul.f32.gmra.mxu1 %v3577_v5  ;;  %2636 = vmatmul.msk.f32.gmra.mxu2 %vm481_vm0, %v3585_v29 }
  0xd1   : > { %1060 = vmatpush.msra.mxu3 %v263_v33  ;;  %1115 = vmatpush.msra.mxu0 %v367_v58  ;;  %v431_v33 = vld [vmem:[%s5478_s1 + $0x5f0] sm:$0xff] }
  0xd2   : > { %839 = vmatmul.f32.gmra.mxu3 %v3183_v11  ;;  %v255_v11 = vld [vmem:[%s5478_s1 + $0x70] sm:$0xff]  ;;  %1180 = vmatpush.msrb.mxu1 %v431_v33 }
  0xd3   : > { %v3613_v20 = vpop.f32.mrf.mxu2  ;;  %1061 = vmatpush.msra.mxu3 %v259_v9  ;;  %v247_v9 = vld [vmem:[%s5478_s1 + $0x30] sm:$0xff] }
  0xd5   : > { %v3623_v27 = vpop.f32.mrf.mxu1  ;;  %v3637_v21 = vpop.f32.mrf.mxu3  ;;  %1062 = vmatpush.msra.mxu3 %v255_v11  ;;  %v3664_v11 = vld [vmem:[%s3039_s18 + $0xb8] sm:$0xff] }
  0xd6   : > { %5506 = vst [vmem:[#allocation16_spill] sm:$0xff] %v3623_v27  ;;  %v251_v27 = vld [vmem:[%s5478_s1 + $0x50] sm:$0xff] }
  0xd7   : > { %5507 = vst [vmem:[#allocation17_spill] sm:$0xff] %v3637_v21  ;;  %1063 = vmatpush.msra.mxu3 %v251_v27  ;;  %874 = vmatmul.f32.gmra.mxu0 %v3331_v56  ;;  %v243_v21 = vld [vmem:[%s5478_s1 + $0x10] sm:$0xff] }
  0xd8   : > { %647 = vmatmul.f32.gmra.mxu1 %v3626_v14  ;;  %2637 = vmatmul.msk.f32.gmra.mxu2 %vm481_vm0, %v3629_v0  ;;  %v363_v27 = vld [vmem:[%s5478_s1 + $0x3d0] sm:$0xff] }
  0xd9   : > { %1064 = vmatpush.msra.mxu3 %v247_v9  ;;  %1116 = vmatpush.msra.mxu0 %v363_v27  ;;  %v427_v9 = vld [vmem:[%s5478_s1 + $0x5d0] sm:$0xff]  ;;  %v3690_v27 = vld [vmem:[%s3039_s18 + $0xd8] sm:$0xff] }
  0xda   : > { %842 = vmatmul.f32.gmra.mxu3 %v3226_v23  ;;  %v475_v23 = vld [vmem:[%s5478_s1 + $0x750] sm:$0xff]  ;;  %1181 = vmatpush.msrb.mxu1 %v427_v9 }
  0xdb   : > { %v3651_v58 = vpop.f32.mrf.mxu2  ;;  %1065 = vmatpush.msra.mxu3 %v243_v21  ;;  %1250 = vmatpush.msrb.mxu2 %v475_v23  ;;  %v3687_v21 = vld [vmem:[%s3039_s18 + $0x1c8] sm:$0xff]  ;;  %v471_v23 = vld [vmem:[%s5478_s1 + $0x730] sm:$0xff] }
  0xdc   : > { %1117 = vmatpush.msra.mxu0 %v359_v39 }
  0xdd   : > { %v3658_v47 = vpop.f32.mrf.mxu1  ;;  %v3672_v33 = vpop.f32.mrf.mxu3  ;;  %1251 = vmatpush.msrb.mxu2 %v471_v23  ;;  %v467_v23 = vld [vmem:[%s5478_s1 + $0x710] sm:$0xff] }
  0xde   : > { %5508 = vst [vmem:[#allocation18_spill] sm:$0xff] %v3658_v47 }
  0xdf   : > { %5509 = vst [vmem:[#allocation19_spill] sm:$0xff] %v3672_v33  ;;  %877 = vmatmul.f32.gmra.mxu0 %v3347_v61  ;;  %1252 = vmatpush.msrb.mxu2 %v467_v23 }
  0xe0   : > { %650 = vmatmul.f32.gmra.mxu1 %v3661_v26  ;;  %2638 = vmatmul.msk.f32.gmra.mxu2 %vm481_vm0, %v3664_v11 }
  0xe2   : > { %845 = vmatmul.f32.gmra.mxu3 %v3255_v31  ;;  %v423_v31 = vld [vmem:[%s5478_s1 + $0x5b0] sm:$0xff] }
  0xe3   : > { %v3680_v47 = vpop.f32.mrf.mxu2  ;;  %1182 = vmatpush.msrb.mxu1 %v423_v31 }
  0xe5   : > { %v3684_v33 = vpop.f32.mrf.mxu1  ;;  %v3695_v16 = vpop.f32.mrf.mxu3 }
  0xe6   : > { %5510 = vst [vmem:[#allocation20_spill] sm:$0xff] %v3684_v33  ;;  %v355_v33 = vld [vmem:[%s5478_s1 + $0x390] sm:$0xff] }
  0xe7   : > { %5511 = vst [vmem:[#allocation21_spill] sm:$0xff] %v3695_v16  ;;  %880 = vmatmul.f32.gmra.mxu0 %v3363_v3  ;;  %v3713_v16 = vld [vmem:[%s3039_s18 + $0x1e8] sm:$0xff] }
  0xe8   : > { %653 = vmatmul.f32.gmra.mxu1 %v3687_v21  ;;  %2639 = vmatmul.msk.f32.gmra.mxu2 %vm481_vm0, %v3690_v27 }
  0xe9   : > { %1118 = vmatpush.msra.mxu0 %v355_v33 }
  0xea   : > { %848 = vmatmul.f32.gmra.mxu3 %v3275_v36  ;;  %v419_v36 = vld [vmem:[%s5478_s1 + $0x590] sm:$0xff] }
  0xeb   : > { %v3706_v9 = vpop.f32.mrf.mxu2  ;;  %1183 = vmatpush.msrb.mxu1 %v419_v36  ;;  %v415_v36 = vld [vmem:[%s5478_s1 + $0x570] sm:$0xff] }
  0xed   : > { %v3710_v39 = vpop.f32.mrf.mxu1  ;;  %v3718_v61 = vpop.f32.mrf.mxu3  ;;  %1184 = vmatpush.msrb.mxu1 %v415_v36 }
  0xee   : > { %5512 = vst [vmem:[#allocation22_spill] sm:$0xff] %v3710_v39  ;;  %v3766_v36 = vpop.f32.mrf.mxu0 }
  0xef   : > { %5513 = vst [vmem:[#allocation23_spill] sm:$0xff] %v3718_v61  ;;  %883 = vmatmul.f32.gmra.mxu0 %v3376_v7  ;;  %v351_v61 = vld [vmem:[%s5478_s1 + $0x370] sm:$0xff] }
  0xf0   : > { %656 = vmatmul.f32.gmra.mxu1 %v3713_v16  ;;  %2649 = vmatmul.msk.f32.vlgmr.msra.gmra.mxu2 %vm481_vm0, %v3471_v19 }
  0xf1   : > { %1119 = vmatpush.msra.mxu0 %v351_v61  ;;  %v463_v61 = vld [vmem:[%s5478_s1 + $0x6f0] sm:$0xff] }
  0xf2   : > { %851 = vmatmul.f32.gmra.mxu3 %v3295_v42  ;;  %1253 = vmatpush.msrb.mxu2 %v463_v61 }
  0xf3   : > { %v3726_v31 = vpop.f32.mrf.mxu2 }
  0xf5   : > { %v3733_v33 = vpop.f32.mrf.mxu1  ;;  %v3738_v39 = vpop.f32.mrf.mxu3 }
  0xf6   : > { %5514 = vst [vmem:[#allocation24_spill] sm:$0xff] %v3738_v39 }
  0xf7   : > { %886 = vmatmul.f32.gmra.mxu0 %v3397_v15 }
  0xf8   : > { %936 = vmatmul.f32.vlgmr.msra.gmra.mxu1 %v3075_v46  ;;  %2650 = vmatmul.msk.f32.gmra.mxu2 %vm481_vm0, %v3497_v63  ;;  %v347_v46 = vld [vmem:[%s5478_s1 + $0x350] sm:$0xff] }
  0xf9   : > { %1120 = vmatpush.msra.mxu0 %v347_v46 }
  0xfa   : > { %1066 = vmatmul.f32.vlgmr.msra.gmra.mxu3 %v3222_v22  ;;  %v411_v22 = vld [vmem:[%s5478_s1 + $0x550] sm:$0xff] }
  0xfb   : > { %v3746_v42 = vpop.f32.mrf.mxu2  ;;  %1185 = vmatpush.msrb.mxu1 %v411_v22  ;;  %v407_v22 = vld [vmem:[%s5478_s1 + $0x530] sm:$0xff] }
  0xfc   : > { %5515 = vst [vmem:[#allocation25_spill] sm:$0xff] %v3746_v42 }
  0xfd   : > { %v3750_v23 = vpop.f32.mrf.mxu1  ;;  %v3758_v39 = vpop.f32.mrf.mxu3  ;;  %1186 = vmatpush.msrb.mxu1 %v407_v22  ;;  %v339_v22 = vld [vmem:[%s5478_s1 + $0x310] sm:$0xff] }
  0xfe   : > { %5516 = vst [vmem:[#allocation26_spill] sm:$0xff] %v3758_v39 }
  0xff   : > { %889 = vmatmul.f32.gmra.mxu0 %v3418_v25 }
 0x100   : > { %939 = vmatmul.f32.gmra.mxu1 %v3105_v54  ;;  %2651 = vmatmul.msk.f32.gmra.mxu2 %vm481_vm0, %v3537_v45  ;;  %v343_v54 = vld [vmem:[%s5478_s1 + $0x330] sm:$0xff] }
 0x101   : > { %1121 = vmatpush.msra.mxu0 %v343_v54  ;;  %v3791_v54 = vpop.f32.mrf.mxu0 }
 0x102   : > { %1069 = vmatmul.f32.gmra.mxu3 %v3252_v30  ;;  %v459_v30 = vld [vmem:[%s5478_s1 + $0x6d0] sm:$0xff] }
 0x103   : > { %v3768_v42 = vpop.f32.mrf.mxu2  ;;  %1254 = vmatpush.msrb.mxu2 %v459_v30  ;;  %v403_v30 = vld [vmem:[%s5478_s1 + $0x510] sm:$0xff]  ;;  %1122 = vmatpush.msra.mxu0 %v339_v22 }
 0x104   : > { %5517 = vst [vmem:[#allocation27_spill] sm:$0xff] %v3768_v42  ;;  %1187 = vmatpush.msrb.mxu1 %v403_v30  ;;  %v335_v22 = vld [vmem:[%s5478_s1 + $0x2f0] sm:$0xff] }
 0x105   : > { %v3772_v46 = vpop.f32.mrf.mxu1  ;;  %v3777_v61 = vpop.f32.mrf.mxu3  ;;  %1123 = vmatpush.msra.mxu0 %v335_v22  ;;  %v331_v22 = vld [vmem:[%s5478_s1 + $0x2d0] sm:$0xff] }
 0x106   : > { %5518 = vst [vmem:[#allocation28_spill] sm:$0xff] %v3777_v61 }
 0x107   : > { %892 = vmatmul.f32.gmra.mxu0 %v3442_v52 }
 0x108   : > { %942 = vmatmul.f32.gmra.mxu1 %v3146_v1  ;;  %2652 = vmatmul.msk.f32.gmra.mxu2 %vm481_vm0, %v3585_v29 }
 0x109   : > { %1124 = vmatpush.msra.mxu0 %v331_v22  ;;  %v327_v22 = vld [vmem:[%s5478_s1 + $0x2b0] sm:$0xff] }
 0x10a   : > { %1072 = vmatmul.f32.gmra.mxu3 %v3272_v35  ;;  %v455_v35 = vld [vmem:[%s5478_s1 + $0x6b0] sm:$0xff] }
 0x10b   : > { %v3788_v39 = vpop.f32.mrf.mxu2  ;;  %1255 = vmatpush.msrb.mxu2 %v455_v35  ;;  %1125 = vmatpush.msra.mxu0 %v327_v22  ;;  %v323_v22 = vld [vmem:[%s5478_s1 + $0x290] sm:$0xff] }
 0x10c   : > { %5519 = vst [vmem:[#allocation29_spill] sm:$0xff] %v3788_v39 }
 0x10d   : > { %v3794_v1 = vpop.f32.mrf.mxu1  ;;  %v3796_v61 = vpop.f32.mrf.mxu3  ;;  %1126 = vmatpush.msra.mxu0 %v323_v22 }
 0x10e   : > { %5520 = vst [vmem:[#allocation30_spill] sm:$0xff] %v3796_v61  ;;  %v3816_v61 = vpop.f32.mrf.mxu0 }
 0x10f   : > { %895 = vmatmul.f32.gmra.mxu0 %v3468_v18 }
 0x110   : > { %945 = vmatmul.f32.gmra.mxu1 %v3186_v12  ;;  %2653 = vmatmul.msk.f32.gmra.mxu2 %vm481_vm0, %v3629_v0 }
 0x112   : > { %1075 = vmatmul.f32.gmra.mxu3 %v3292_v41  ;;  %v399_v41 = vld [vmem:[%s5478_s1 + $0x4f0] sm:$0xff] }
 0x113   : > { %v3807_v39 = vpop.f32.mrf.mxu2  ;;  %1188 = vmatpush.msrb.mxu1 %v399_v41  ;;  %v395_v41 = vld [vmem:[%s5478_s1 + $0x4d0] sm:$0xff] }
 0x115   : > { %v3813_v12 = vpop.f32.mrf.mxu1  ;;  %v3818_v42 = vpop.f32.mrf.mxu3  ;;  %1189 = vmatpush.msrb.mxu1 %v395_v41 }
 0x116   : > { %5521 = vst [vmem:[#allocation31_spill] sm:$0xff] %v3818_v42  ;;  %v3837_v42 = vpop.f32.mrf.mxu0 }
 0x117   : > { %898 = vmatmul.f32.gmra.mxu0 %v3494_v44 }
 0x118   : > { %948 = vmatmul.f32.gmra.mxu1 %v3229_v24  ;;  %2654 = vmatmul.msk.f32.gmra.mxu2 %vm481_vm0, %v3664_v11 }
 0x11a   : > { %1078 = vmatmul.f32.gmra.mxu3 %v3312_v48  ;;  %v451_v48 = vld [vmem:[%s5478_s1 + $0x690] sm:$0xff] }
 0x11b   : > { %v3829_v30 = vpop.f32.mrf.mxu2  ;;  %1256 = vmatpush.msrb.mxu2 %v451_v48  ;;  %v391_v48 = vld [vmem:[%s5478_s1 + $0x4b0] sm:$0xff] }
 0x11c   : > { %5522 = vst [vmem:[#allocation32_spill] sm:$0xff] %v3829_v30  ;;  %1190 = vmatpush.msrb.mxu1 %v391_v48  ;;  %v387_v48 = vld [vmem:[%s5478_s1 + $0x490] sm:$0xff] }
 0x11d   : > { %v3832_v35 = vpop.f32.mrf.mxu1  ;;  %v3835_v24 = vpop.f32.mrf.mxu3 }
 0x11e   : > { %5523 = vst [vmem:[#allocation33_spill] sm:$0xff] %v3835_v24  ;;  %v3871_v41 = vpop.f32.mrf.mxu0  ;;  %1191 = vmatpush.msrb.mxu1 %v387_v48 }
 0x11f   : > { %901 = vmatmul.f32.gmra.mxu0 %v3534_v13 }
 0x120   : > { %951 = vmatmul.f32.gmra.mxu1 %v3258_v32  ;;  %2655 = vmatmul.msk.f32.gmra.mxu2 %vm481_vm0, %v3690_v27 }
 0x122   : > { %1081 = vmatmul.f32.gmra.mxu3 %v3328_v55  ;;  %v447_v55 = vld [vmem:[%s5478_s1 + $0x670] sm:$0xff] }
 0x123   : > { %v3851_v24 = vpop.f32.mrf.mxu2  ;;  %1257 = vmatpush.msrb.mxu2 %v447_v55 }
 0x124   : > { %5524 = vst [vmem:[#allocation34_spill] sm:$0xff] %v3851_v24  ;;  %v2834_v24 = vld [vmem:[%s3039_s18 + $0xa8] sm:$0xff] }
 0x125   : > { %v3854_v32 = vpop.f32.mrf.mxu1  ;;  %v3857_v30 = vpop.f32.mrf.mxu3 }
 0x126   : > { %5525 = vst [vmem:[#allocation35_spill] sm:$0xff] %v3857_v30  ;;  %v3892_v55 = vpop.f32.mrf.mxu0 }
 0x127   : > { %904 = vmatmul.f32.gmra.mxu0 %v3577_v5 }
 0x128   : > { %954 = vmatmul.f32.gmra.mxu1 %v3278_v37  ;;  %2656 = vmatmul.msk.f32.gmra.mxu2 %vm481_vm0, %v3054_v40 }
 0x12a   : > { %1084 = vmatmul.f32.gmra.mxu3 %v3344_v60 }
 0x12b   : > { %v3873_v37 = vpop.f32.mrf.mxu2 }
 0x12c   : > { %5526 = vst [vmem:[#allocation36_spill] sm:$0xff] %v3873_v37 }
 0x12d   : > { %v3876_v40 = vpop.f32.mrf.mxu1  ;;  %v3879_v30 = vpop.f32.mrf.mxu3 }
 0x12e   : > { %5527 = vst [vmem:[#allocation37_spill] sm:$0xff] %v3879_v30  ;;  %v443_v30 = vld [vmem:[%s5478_s1 + $0x650] sm:$0xff] }
 0x12f   : > { %907 = vmatmul.f32.gmra.mxu0 %v3626_v14  ;;  %1258 = vmatpush.msrb.mxu2 %v443_v30  ;;  %v3918_v30 = vld [vmem:[%s3039_s18 + $0x100] sm:$0xff] }
 0x130   : > { %957 = vmatmul.f32.gmra.mxu1 %v3298_v43  ;;  %2657 = vmatmul.msk.f32.gmra.mxu2 %vm481_vm0, %v3087_v49  ;;  %v613_v49 = vadd.f32 %v3733_v33, %v3766_v36  ;;  %v383_v33 = vld [vmem:[%s5478_s1 + $0x470] sm:$0xff] }
 0x131   : > { %1192 = vmatpush.msrb.mxu1 %v383_v33  ;;  %v296_v33 = vld [vmem:[%s5478_s1 + $0x1b8] sm:$0xff] }
 0x132   : > { %1087 = vmatmul.f32.gmra.mxu3 %v3360_v2  ;;  %v319_v2 = vld [vmem:[%s5478_s1 + $0x270] sm:$0xff]  ;;  %v678_v36 = vadd.f32 %v3490_v38, %v613_v49  ;;  %v304_v38 = vld [vmem:[%s5478_s1 + $0x1f8] sm:$0xff] }
 0x133   : > { %v3890_v60 = vpop.f32.mrf.mxu2  ;;  %1127 = vmatpush.msra.mxu0 %v319_v2  ;;  %1310 = vmatpush.msrb.mxu3 %v304_v38  ;;  %v315_v2 = vld [vmem:[%s5478_s1 + $0x250] sm:$0xff]  ;;  %v3955_v38 = vld [vmem:[%s3039_s18 + $0x120] sm:$0xff] }
 0x134   : > { %5528 = vst [vmem:[#allocation38_spill] sm:$0xff] %v3890_v60  ;;  %v3926_v60 = vpop.f32.mrf.mxu0 }
 0x135   : > { %v3895_v43 = vpop.f32.mrf.mxu1  ;;  %v3903_v22 = vpop.f32.mrf.mxu3  ;;  %1128 = vmatpush.msra.mxu0 %v315_v2  ;;  %v292_v2 = vld [vmem:[%s5478_s1 + $0x198] sm:$0xff] }
 0x136   : > { %5529 = vst [vmem:[#allocation39_spill] sm:$0xff] %v3903_v22 }
 0x137   : > { %910 = vmatmul.f32.gmra.mxu0 %v3661_v26 }
 0x138   : > { %960 = vmatmul.f32.gmra.mxu1 %v3318_v51  ;;  %2658 = vmatmul.msk.f32.gmra.mxu2 %vm481_vm0, %v3124_v59  ;;  %v616_v51 = vadd.f32 %v3750_v23, %v3791_v54  ;;  %v439_v23 = vld [vmem:[%s5478_s1 + $0x630] sm:$0xff] }
 0x139   : > { %v379_v54 = vld [vmem:[%s5478_s1 + $0x450] sm:$0xff]  ;;  %1259 = vmatpush.msrb.mxu2 %v439_v23 }
 0x13a   : > { %1090 = vmatmul.f32.gmra.mxu3 %v3918_v30  ;;  %1193 = vmatpush.msrb.mxu1 %v379_v54 }
 0x13b   : > { %v742_v48 = vpop.f32.mrf.mxu2 }
 0x13c   : > { %v3915_v22 = vadd.f32 %v742_v48, %v678_v36  ;;  %v3969_v54 = vpop.f32.mrf.mxu0 }
 0x13d   : > { %v3921_v59 = vpop.f32.mrf.mxu1  ;;  %v3932_v49 = vpop.f32.mrf.mxu3 }
 0x13e   : > { %5530 = vst [vmem:[#allocation40_spill] sm:$0xff] %v3932_v49  ;;  %v4211_v49 = vld [vmem:[%s3039_s18 + $0x50] sm:$0xff] }
 0x13f   : > { %913 = vmatmul.f32.gmra.mxu0 %v3687_v21 }
 0x140   : > { %963 = vmatmul.f32.gmra.mxu1 %v3334_v57  ;;  %2659 = vmatmul.msk.f32.gmra.mxu2 %vm481_vm0, %v3164_v6  ;;  %v300_v57 = vld [vmem:[%s5478_s1 + $0x1d8] sm:$0xff]  ;;  %v681_v6 = vadd.f32 %v3530_v10, %v616_v51  ;;  %v619_v10 = vadd.f32 %v3772_v46, %v3816_v61  ;;  %v375_v46 = vld [vmem:[%s5478_s1 + $0x430] sm:$0xff] }
 0x141   : > { %1311 = vmatpush.msrb.mxu3 %v300_v57  ;;  %v288_v51 = vld [vmem:[%s5478_s1 + $0x178] sm:$0xff]  ;;  %v311_v57 = vld [vmem:[%s5478_s1 + $0x230] sm:$0xff]  ;;  %1194 = vmatpush.msrb.mxu1 %v375_v46 }
 0x142   : > { %1093 = vmatmul.f32.gmra.mxu3 %v3955_v38  ;;  %v284_v61 = vld [vmem:[%s5478_s1 + $0x158] sm:$0xff]  ;;  %1129 = vmatpush.msra.mxu0 %v311_v57  ;;  %v3995_v57 = vld [vmem:[%s3039_s18 + $0x140] sm:$0xff]  ;;  %v307_v46 = vld [vmem:[%s5478_s1 + $0x210] sm:$0xff] }
 0x143   : > { %v745_v36 = vpop.f32.mrf.mxu2  ;;  %1312 = vmatpush.msrb.mxu3 %v296_v33  ;;  %v280_v33 = vld [vmem:[%s5478_s1 + $0x138] sm:$0xff] }
 0x144   : > { %v3952_v48 = vadd.f32 %v745_v36, %v681_v6  ;;  %1130 = vmatpush.msra.mxu0 %v307_v46  ;;  %v368_v46 = vld [vmem:[%s5478_s1 + $0x3f8] sm:$0xff] }
 0x145   : > { %v3961_v23 = vpop.f32.mrf.mxu1  ;;  %1313 = vmatpush.msrb.mxu3 %v292_v2  ;;  %v3986_v6 = vpop.f32.mrf.mxu3 }
 0x146   : > { %5531 = vst [vmem:[#allocation41_spill] sm:$0xff] %v3986_v6  ;;  %1375 = vmatpush.msrb.mxu0 %v368_v46  ;;  %v5536_v46 = vld [vmem:[#allocation5_spill] sm:$0xff] }
 0x147   : > { %1314 = vmatpush.msrb.mxu3 %v288_v51  ;;  %v276_v51 = vld [vmem:[%s5478_s1 + $0x118] sm:$0xff]  ;;  %916 = vmatmul.f32.gmra.mxu0 %v3713_v16 }
 0x148   : > { %966 = vmatmul.f32.gmra.mxu1 %v3350_v62  ;;  %2660 = vmatmul.msk.f32.gmra.mxu2 %vm481_vm0, %v3204_v17  ;;  %v435_v62 = vld [vmem:[%s5478_s1 + $0x610] sm:$0xff]  ;;  %v684_v17 = vadd.f32 %v3570_v53, %v619_v10  ;;  %v622_v53 = vadd.f32 %v3794_v1, %v3837_v42  ;;  %v272_v10 = vld [vmem:[%s5478_s1 + $0xf8] sm:$0xff] }
 0x149   : > { %1260 = vmatpush.msrb.mxu2 %v435_v62  ;;  %1315 = vmatpush.msrb.mxu3 %v284_v61  ;;  %v371_v61 = vld [vmem:[%s5478_s1 + $0x410] sm:$0xff]  ;;  %v268_v42 = vld [vmem:[%s5478_s1 + $0xd8] sm:$0xff] }
 0x14a   : > { %1096 = vmatmul.f32.gmra.mxu3 %v3995_v57  ;;  %1195 = vmatpush.msrb.mxu1 %v371_v61  ;;  %v264_v62 = vld [vmem:[%s5478_s1 + $0xb8] sm:$0xff] }
 0x14b   : > { %v748_v36 = vpop.f32.mrf.mxu2  ;;  %1316 = vmatpush.msrb.mxu3 %v280_v33  ;;  %v256_v61 = vld [vmem:[%s5478_s1 + $0x78] sm:$0xff] }
 0x14c   : > { %v3992_v2 = vadd.f32 %v748_v36, %v684_v17  ;;  %v4021_v1 = vpop.f32.mrf.mxu0 }
 0x14d   : > { %v4001_v6 = vpop.f32.mrf.mxu1  ;;  %1317 = vmatpush.msrb.mxu3 %v276_v51  ;;  %5532 = vst [vmem:[#allocation42_spill] sm:$0xff] %v4021_v1  ;;  %v4030_v33 = vpop.f32.mrf.mxu3  ;;  %v4035_v51 = vld [vmem:[%s3039_s18 + $0x160] sm:$0xff]  ;;  %v2829_v1 = vld [vmem:[%s3039_s18 + $0x68] sm:$0xff] }
 0x14e   : > { %5533 = vst [vmem:[#allocation43_spill] sm:$0xff] %v4030_v33  ;;  %v344_v33 = vld [vmem:[%s5478_s1 + $0x338] sm:$0xff] }
 0x14f   : > { %1318 = vmatpush.msrb.mxu3 %v272_v10  ;;  %1131 = vmatmul.f32.vlgmr.msra.gmra.mxu0 %v3315_v50  ;;  %v625_v10 = vadd.f32 %v3813_v12, %v3871_v41  ;;  %v252_v50 = vld [vmem:[%s5478_s1 + $0x58] sm:$0xff] }
 0x150   : > { %969 = vmatmul.f32.gmra.mxu1 %v3366_v4  ;;  %2661 = vmatmul.msk.f32.gmra.mxu2 %vm481_vm0, %v3244_v28  ;;  %v480_v28 = vld [vmem:[%s5478_s1 + $0x778] sm:$0xff]  ;;  %v687_v4 = vadd.f32 %v3613_v20, %v622_v53 }
 0x151   : > { %1509 = vmatpush.msra.mxu2 %v480_v28  ;;  %1319 = vmatpush.msrb.mxu3 %v268_v42  ;;  %v260_v20 = vld [vmem:[%s5478_s1 + $0x98] sm:$0xff]  ;;  %v690_v12 = vadd.f32 %v3651_v58, %v625_v10 }
 0x152   : > { %1099 = vmatmul.f32.gmra.mxu3 %v4035_v51  ;;  %v432_v41 = vld [vmem:[%s5478_s1 + $0x5f8] sm:$0xff] }
 0x153   : > { %v751_v17 = vpop.f32.mrf.mxu2  ;;  %1320 = vmatpush.msrb.mxu3 %v264_v62  ;;  %1440 = vmatpush.msra.mxu1 %v432_v41  ;;  %v244_v58 = vld [vmem:[%s5478_s1 + $0x18] sm:$0xff] }
 0x154   : > { %v4032_v36 = vadd.f32 %v751_v17, %v687_v4  ;;  %v4062_v42 = vpop.f32.mrf.mxu0  ;;  %v4070_v4 = vld [vmem:[%s3039_s18 + $0x180] sm:$0xff]  ;;  %v628_v17 = vadd.f32 %v3832_v35, %v3892_v55  ;;  %v364_v10 = vld [vmem:[%s5478_s1 + $0x3d8] sm:$0xff] }
 0x155   : > { %v4041_v53 = vpop.f32.mrf.mxu1  ;;  %1321 = vmatpush.msrb.mxu3 %v260_v20  ;;  %5534 = vst [vmem:[#allocation44_spill] sm:$0xff] %v4062_v42  ;;  %v4081_v20 = vpop.f32.mrf.mxu3  ;;  %1376 = vmatpush.msrb.mxu0 %v364_v10  ;;  %v428_v35 = vld [vmem:[%s5478_s1 + $0x5d8] sm:$0xff] }
 0x156   : > { %5535 = vst [vmem:[#allocation45_spill] sm:$0xff] %v4081_v20  ;;  %1441 = vmatpush.msra.mxu1 %v428_v35  ;;  %v1669_v42 = vld [vmem:[%s5479_s2 + $0x18] sm:$0xff] }
 0x157   : > { %1322 = vmatpush.msrb.mxu3 %v256_v61  ;;  %1134 = vmatmul.f32.gmra.mxu0 %v3331_v56  ;;  %v5537_v61 = vld [vmem:[#allocation2_spill] sm:$0xff]  ;;  %v476_v56 = vld [vmem:[%s5478_s1 + $0x758] sm:$0xff] }
 0x158   : > { %972 = vmatmul.f32.gmra.mxu1 %v3379_v8  ;;  %2662 = vmatmul.msk.f32.gmra.mxu2 %vm481_vm0, %v3267_v34  ;;  %v248_v8 = vld [vmem:[%s5478_s1 + $0x38] sm:$0xff] }
 0x159   : > { %1323 = vmatpush.msrb.mxu3 %v252_v50  ;;  %v693_v50 = vadd.f32 %v3680_v47, %v628_v17  ;;  %1510 = vmatpush.msra.mxu2 %v476_v56  ;;  %v360_v17 = vld [vmem:[%s5478_s1 + $0x3b8] sm:$0xff] }
 0x15a   : > { %1102 = vmatmul.f32.gmra.mxu3 %v4070_v4  ;;  %1377 = vmatpush.msrb.mxu0 %v360_v17  ;;  %v424_v56 = vld [vmem:[%s5478_s1 + $0x5b8] sm:$0xff]  ;;  %v5546_v17 = vld [vmem:[#allocation7_spill] sm:$0xff] }
 0x15b   : > { %v754_v28 = vpop.f32.mrf.mxu2  ;;  %1324 = vmatpush.msrb.mxu3 %v248_v8  ;;  %v4101_v8 = vld [vmem:[%s3039_s18 + $0x1a0] sm:$0xff]  ;;  %1442 = vmatpush.msra.mxu1 %v424_v56 }
 0x15c   : > { %v4067_v34 = vadd.f32 %v754_v28, %v690_v12  ;;  %v4096_v55 = vpop.f32.mrf.mxu0  ;;  %v5540_v28 = vld [vmem:[#allocation4_spill] sm:$0xff] }
 0x15d   : > { %v4076_v62 = vpop.f32.mrf.mxu1  ;;  %1325 = vmatpush.msrb.mxu3 %v244_v58  ;;  %5538 = vst [vmem:[#allocation5_spill] sm:$0xff] %v4096_v55  ;;  %v631_v58 = vadd.f32 %v3854_v32, %v3926_v60  ;;  %v4112_v10 = vpop.f32.mrf.mxu3  ;;  %v472_v32 = vld [vmem:[%s5478_s1 + $0x738] sm:$0xff]  ;;  %v1674_v55 = vld [vmem:[%s5479_s2 + $0x40] sm:$0xff] }
 0x15e   : > { %5541 = vst [vmem:[#allocation4_spill] sm:$0xff] %v4112_v10  ;;  %1511 = vmatpush.msra.mxu2 %v472_v32  ;;  %v4154_v32 = vld [vmem:[%s3039_s18 + $0x1e0] sm:$0xff]  ;;  %v4186_v10 = vld [vmem:[%s3039_s18 + $0x30] sm:$0xff] }
 0x15f   : > { %1137 = vmatmul.f32.gmra.mxu0 %v5540_v28  ;;  %v4129_v28 = vld [vmem:[%s3039_s18 + $0x1c0] sm:$0xff] }
 0x160   : > { %975 = vmatmul.f32.gmra.mxu1 %v5536_v46  ;;  %2663 = vmatmul.msk.f32.gmra.mxu2 %vm481_vm0, %v5537_v61  ;;  %v5542_v46 = vld [vmem:[#allocation6_spill] sm:$0xff]  ;;  %v5543_v61 = vld [vmem:[#allocation3_spill] sm:$0xff] }
 0x162   : > { %1105 = vmatmul.f32.gmra.mxu3 %v4101_v8 }
 0x163   : > { %v757_v12 = vpop.f32.mrf.mxu2 }
 0x164   : > { %v4098_v41 = vadd.f32 %v757_v12, %v693_v50  ;;  %v696_v50 = vadd.f32 %v3706_v9, %v631_v58  ;;  %v4124_v60 = vpop.f32.mrf.mxu0  ;;  %v356_v58 = vld [vmem:[%s5478_s1 + $0x398] sm:$0xff] }
 0x165   : > { %v4104_v47 = vpop.f32.mrf.mxu1  ;;  %5544 = vst [vmem:[#allocation6_spill] sm:$0xff] %v4124_v60  ;;  %1378 = vmatpush.msrb.mxu0 %v356_v58  ;;  %v4164_v58 = vld [vmem:[%s3039_s18 + $0x10] sm:$0xff] }
 0x166   : > { %5539 = vst [vmem:[#allocation2_spill] sm:$0xff] %v4104_v47  ;;  %v4362_v60 = vld [vmem:[%s3039_s18 + $0x110] sm:$0xff] }
 0x167   : > { %1140 = vmatmul.f32.gmra.mxu0 %v3363_v3  ;;  %v468_v3 = vld [vmem:[%s5478_s1 + $0x718] sm:$0xff] }
 0x168   : > { %978 = vmatmul.f32.gmra.mxu1 %v5542_v46  ;;  %2664 = vmatmul.msk.f32.gmra.mxu2 %vm481_vm0, %v5543_v61  ;;  %v4141_v46 = vpop.f32.mrf.mxu3  ;;  %v420_v61 = vld [vmem:[%s5478_s1 + $0x598] sm:$0xff] }
 0x169   : > { %5547 = vst [vmem:[#allocation7_spill] sm:$0xff] %v4141_v46  ;;  %1443 = vmatpush.msra.mxu1 %v420_v61  ;;  %1512 = vmatpush.msra.mxu2 %v468_v3 }
 0x16a   : > { %1108 = vmatmul.f32.gmra.mxu3 %v4129_v28 }
 0x16b   : > { %v760_v35 = vpop.f32.mrf.mxu2 }
 0x16c   : > { %v4126_v12 = vadd.f32 %v760_v35, %v696_v50  ;;  %v4146_v50 = vpop.f32.mrf.mxu0  ;;  %v352_v35 = vld [vmem:[%s5478_s1 + $0x378] sm:$0xff] }
 0x16d   : > { %v4132_v9 = vpop.f32.mrf.mxu1  ;;  %5548 = vst [vmem:[#allocation46_spill] sm:$0xff] %v4146_v50  ;;  %1379 = vmatpush.msrb.mxu0 %v352_v35  ;;  %v2795_v35 = vld [vmem:[%s3039_s18] sm:$0xff]  ;;  %v4306_v50 = vld [vmem:[%s3039_s18 + $0xd0] sm:$0xff] }
 0x16e   : > { %5545 = vst [vmem:[#allocation3_spill] sm:$0xff] %v4132_v9  ;;  %v4571_v9 = vld [vmem:[%s3039_s18 + $0x1f0] sm:$0xff] }
 0x16f   : > { %1143 = vmatmul.f32.gmra.mxu0 %v3376_v7  ;;  %5598 = vst [vmem:[#allocation96_spill] sm:$0xff] %v4571_v9 }
 0x170   : > { %981 = vmatmul.f32.gmra.mxu1 %v5546_v17  ;;  %2665 = vmatmul.msk.f32.vlgmr.msrb.gmra.mxu2 %vm481_vm0, %v3471_v19  ;;  %v416_v17 = vld [vmem:[%s5478_s1 + $0x578] sm:$0xff]  ;;  %v4176_v3 = vpop.f32.mrf.mxu3 }
 0x171   : > { %1444 = vmatpush.msra.mxu1 %v416_v17  ;;  %5553 = vst [vmem:[#allocation51_spill] sm:$0xff] %v4176_v3  ;;  %v464_v17 = vld [vmem:[%s5478_s1 + $0x6f8] sm:$0xff] }
 0x172   : > { %1111 = vmatmul.f32.gmra.mxu3 %v4154_v32  ;;  %1513 = vmatpush.msra.mxu2 %v464_v17  ;;  %v408_v17 = vld [vmem:[%s5478_s1 + $0x538] sm:$0xff] }
 0x173   : > { %v4151_v56 = vpop.f32.mrf.mxu2 }
 0x174   : > { %5549 = vst [vmem:[#allocation47_spill] sm:$0xff] %v4151_v56  ;;  %v4172_v61 = vpop.f32.mrf.mxu0  ;;  %v1697_v56 = vld [vmem:[%s5479_s2 + $0xf8] sm:$0xff] }
 0x175   : > { %v4157_v19 = vpop.f32.mrf.mxu1  ;;  %5551 = vst [vmem:[#allocation49_spill] sm:$0xff] %v4172_v61 }
 0x176   : > { %5550 = vst [vmem:[#allocation48_spill] sm:$0xff] %v4157_v19  ;;  %v4549_v19 = vld [vmem:[%s3039_s18 + $0x1d0] sm:$0xff] }
 0x177   : > { %1146 = vmatmul.f32.gmra.mxu0 %v3397_v15  ;;  %v412_v15 = vld [vmem:[%s5478_s1 + $0x558] sm:$0xff]  ;;  %5594 = vst [vmem:[#allocation92_spill] sm:$0xff] %v4549_v19 }
 0x178   : > { %1196 = vmatmul.f32.vlgmr.msrb.gmra.mxu1 %v4164_v58  ;;  %2666 = vmatmul.msk.f32.gmra.mxu2 %vm481_vm0, %v3497_v63  ;;  %v348_v63 = vld [vmem:[%s5478_s1 + $0x358] sm:$0xff] }
 0x179   : > { %1380 = vmatpush.msrb.mxu0 %v348_v63  ;;  %1445 = vmatpush.msra.mxu1 %v412_v15  ;;  %v2797_v63 = vld [vmem:[%s3039_s18 + $0x20] sm:$0xff] }
 0x17a   : > { %1326 = vmatmul.f32.vlgmr.msrb.gmra.mxu3 %v2795_v35 }
 0x17b   : > { %v4174_v7 = vpop.f32.mrf.mxu2  ;;  %1381 = vmatpush.msrb.mxu0 %v344_v33  ;;  %1446 = vmatpush.msra.mxu1 %v408_v17  ;;  %v2799_v33 = vld [vmem:[%s3039_s18 + $0x40] sm:$0xff]  ;;  %v404_v17 = vld [vmem:[%s5478_s1 + $0x518] sm:$0xff] }
 0x17c   : > { %5552 = vst [vmem:[#allocation50_spill] sm:$0xff] %v4174_v7  ;;  %v4197_v35 = vpop.f32.mrf.mxu0  ;;  %v2820_v7 = vld [vmem:[%s3039_s18 + $0x8] sm:$0xff] }
 0x17d   : > { %v4179_v46 = vpop.f32.mrf.mxu1  ;;  %5555 = vst [vmem:[#allocation53_spill] sm:$0xff] %v4197_v35  ;;  %1447 = vmatpush.msra.mxu1 %v404_v17 }
 0x17e   : > { %5554 = vst [vmem:[#allocation52_spill] sm:$0xff] %v4179_v46 }
 0x17f   : > { %1149 = vmatmul.f32.gmra.mxu0 %v3418_v25  ;;  %v460_v25 = vld [vmem:[%s5478_s1 + $0x6d8] sm:$0xff] }
 0x180   : > { %1199 = vmatmul.f32.gmra.mxu1 %v4186_v10  ;;  %2667 = vmatmul.msk.f32.gmra.mxu2 %vm481_vm0, %v3537_v45  ;;  %v4205_v45 = vpop.f32.mrf.mxu3 }
 0x181   : > { %5558 = vst [vmem:[#allocation56_spill] sm:$0xff] %v4205_v45  ;;  %1514 = vmatpush.msra.mxu2 %v460_v25  ;;  %v456_v25 = vld [vmem:[%s5478_s1 + $0x6b8] sm:$0xff] }
 0x182   : > { %1329 = vmatmul.f32.gmra.mxu3 %v2797_v63 }
 0x183   : > { %v4199_v3 = vpop.f32.mrf.mxu2  ;;  %1515 = vmatpush.msra.mxu2 %v456_v25  ;;  %v400_v25 = vld [vmem:[%s5478_s1 + $0x4f8] sm:$0xff] }
 0x184   : > { %5556 = vst [vmem:[#allocation54_spill] sm:$0xff] %v4199_v3  ;;  %v4222_v15 = vpop.f32.mrf.mxu0  ;;  %1448 = vmatpush.msra.mxu1 %v400_v25 }
 0x185   : > { %v4202_v20 = vpop.f32.mrf.mxu1  ;;  %5559 = vst [vmem:[#allocation57_spill] sm:$0xff] %v4222_v15  ;;  %v4236_v15 = vld [vmem:[%s3039_s18 + $0x70] sm:$0xff] }
 0x186   : > { %5557 = vst [vmem:[#allocation55_spill] sm:$0xff] %v4202_v20 }
 0x187   : > { %1152 = vmatmul.f32.gmra.mxu0 %v3442_v52 }
 0x188   : > { %1202 = vmatmul.f32.gmra.mxu1 %v4211_v49  ;;  %2668 = vmatmul.msk.f32.gmra.mxu2 %vm481_vm0, %v3585_v29  ;;  %v340_v29 = vld [vmem:[%s5478_s1 + $0x318] sm:$0xff]  ;;  %v4233_v35 = vpop.f32.mrf.mxu3 }
 0x189   : > { %1382 = vmatpush.msrb.mxu0 %v340_v29  ;;  %v2801_v29 = vld [vmem:[%s3039_s18 + $0x60] sm:$0xff] }
 0x18a   : > { %1332 = vmatmul.f32.gmra.mxu3 %v2799_v33 }
 0x18b   : > { %v4224_v63 = vpop.f32.mrf.mxu2 }
 0x18c   : > { %5560 = vst [vmem:[#allocation58_spill] sm:$0xff] %v4224_v63  ;;  %v4244_v52 = vpop.f32.mrf.mxu0  ;;  %v324_v63 = vld [vmem:[%s5478_s1 + $0x298] sm:$0xff] }
 0x18d   : > { %v4227_v45 = vpop.f32.mrf.mxu1  ;;  %5562 = vst [vmem:[#allocation60_spill] sm:$0xff] %v4244_v52  ;;  %v4259_v52 = vld [vmem:[%s3039_s18 + $0x90] sm:$0xff] }
 0x18e   : > { %5561 = vst [vmem:[#allocation59_spill] sm:$0xff] %v4227_v45  ;;  %v4334_v45 = vld [vmem:[%s3039_s18 + $0xf0] sm:$0xff] }
 0x18f   : > { %1155 = vmatmul.f32.gmra.mxu0 %v3468_v18 }
 0x190   : > { %1205 = vmatmul.f32.gmra.mxu1 %v4236_v15  ;;  %2669 = vmatmul.msk.f32.gmra.mxu2 %vm481_vm0, %v3629_v0  ;;  %v336_v0 = vld [vmem:[%s5478_s1 + $0x2f8] sm:$0xff]  ;;  %v4264_v17 = vpop.f32.mrf.mxu3 }
 0x191   : > { %1383 = vmatpush.msrb.mxu0 %v336_v0 }
 0x192   : > { %1335 = vmatmul.f32.gmra.mxu3 %v2801_v29 }
 0x193   : > { %v4249_v33 = vpop.f32.mrf.mxu2 }
 0x194   : > { %5563 = vst [vmem:[#allocation61_spill] sm:$0xff] %v4249_v33  ;;  %v4269_v18 = vpop.f32.mrf.mxu0  ;;  %v2803_v33 = vld [vmem:[%s3039_s18 + $0x80] sm:$0xff] }
 0x195   : > { %v4252_v61 = vpop.f32.mrf.mxu1  ;;  %5565 = vst [vmem:[#allocation63_spill] sm:$0xff] %v4269_v18 }
 0x196   : > { %5564 = vst [vmem:[#allocation62_spill] sm:$0xff] %v4252_v61  ;;  %v4281_v61 = vld [vmem:[%s3039_s18 + $0xb0] sm:$0xff] }
 0x197   : > { %1158 = vmatmul.f32.gmra.mxu0 %v3494_v44  ;;  %v396_v44 = vld [vmem:[%s5478_s1 + $0x4d8] sm:$0xff] }
 0x198   : > { %1208 = vmatmul.f32.gmra.mxu1 %v4259_v52  ;;  %2670 = vmatmul.msk.f32.gmra.mxu2 %vm481_vm0, %v3664_v11  ;;  %v332_v11 = vld [vmem:[%s5478_s1 + $0x2d8] sm:$0xff]  ;;  %v4296_v18 = vpop.f32.mrf.mxu3 }
 0x199   : > { %1384 = vmatpush.msrb.mxu0 %v332_v11  ;;  %1449 = vmatpush.msra.mxu1 %v396_v44 }
 0x19a   : > { %1338 = vmatmul.f32.gmra.mxu3 %v2803_v33  ;;  %v452_v33 = vld [vmem:[%s5478_s1 + $0x698] sm:$0xff] }
 0x19b   : > { %v4271_v29 = vpop.f32.mrf.mxu2  ;;  %1516 = vmatpush.msra.mxu2 %v452_v33  ;;  %v4310_v33 = vld [vmem:[%s3039_s18 + $0xf8] sm:$0xff] }
 0x19c   : > { %5566 = vst [vmem:[#allocation64_spill] sm:$0xff] %v4271_v29  ;;  %v4292_v25 = vpop.f32.mrf.mxu0  ;;  %v2805_v29 = vld [vmem:[%s3039_s18 + $0xa0] sm:$0xff] }
 0x19d   : > { %v4274_v0 = vpop.f32.mrf.mxu1  ;;  %5568 = vst [vmem:[#allocation66_spill] sm:$0xff] %v4292_v25  ;;  %v2808_v25 = vld [vmem:[%s3039_s18 + $0xc0] sm:$0xff] }
 0x19e   : > { %5567 = vst [vmem:[#allocation65_spill] sm:$0xff] %v4274_v0  ;;  %v328_v0 = vld [vmem:[%s5478_s1 + $0x2b8] sm:$0xff] }
 0x19f   : > { %1161 = vmatmul.f32.gmra.mxu0 %v3534_v13  ;;  %v392_v13 = vld [vmem:[%s5478_s1 + $0x4b8] sm:$0xff] }
 0x1a0   : > { %1211 = vmatmul.f32.gmra.mxu1 %v4281_v61  ;;  %2671 = vmatmul.msk.f32.gmra.mxu2 %vm481_vm0, %v3690_v27 }
 0x1a1   : > { %1385 = vmatpush.msrb.mxu0 %v328_v0  ;;  %1450 = vmatpush.msra.mxu1 %v392_v13  ;;  %v4338_v13 = vld [vmem:[%s3039_s18 + $0x118] sm:$0xff] }
 0x1a2   : > { %1341 = vmatmul.f32.gmra.mxu3 %v2805_v29  ;;  %v448_v29 = vld [vmem:[%s5478_s1 + $0x678] sm:$0xff] }
 0x1a3   : > { %v4294_v11 = vpop.f32.mrf.mxu2  ;;  %1517 = vmatpush.msra.mxu2 %v448_v29  ;;  %1386 = vmatpush.msrb.mxu0 %v324_v63  ;;  %v444_v63 = vld [vmem:[%s5478_s1 + $0x658] sm:$0xff] }
 0x1a4   : > { %5569 = vst [vmem:[#allocation67_spill] sm:$0xff] %v4294_v11  ;;  %v4320_v0 = vpop.f32.mrf.mxu0 }
 0x1a5   : > { %v4299_v27 = vpop.f32.mrf.mxu1  ;;  %5571 = vst [vmem:[#allocation69_spill] sm:$0xff] %v4320_v0  ;;  %1518 = vmatpush.msra.mxu2 %v444_v63  ;;  %v2811_v0 = vld [vmem:[%s3039_s18 + $0xe0] sm:$0xff] }
 0x1a6   : > { %5570 = vst [vmem:[#allocation68_spill] sm:$0xff] %v4299_v27  ;;  %v4328_v27 = vpop.f32.mrf.mxu3 }
 0x1a7   : > { %1164 = vmatmul.f32.gmra.mxu0 %v3577_v5  ;;  %v388_v5 = vld [vmem:[%s5478_s1 + $0x498] sm:$0xff] }
 0x1a8   : > { %1214 = vmatmul.f32.gmra.mxu1 %v4306_v50  ;;  %2672 = vmatmul.msk.f32.gmra.mxu2 %vm481_vm0, %v4310_v33 }
 0x1a9   : > { %1451 = vmatpush.msra.mxu1 %v388_v5  ;;  %v4366_v5 = vld [vmem:[%s3039_s18 + $0x138] sm:$0xff] }
 0x1aa   : > { %1344 = vmatmul.f32.gmra.mxu3 %v2808_v25 }
 0x1ab   : > { %v4322_v44 = vpop.f32.mrf.mxu2 }
 0x1ac   : > { %5572 = vst [vmem:[#allocation70_spill] sm:$0xff] %v4322_v44  ;;  %v4345_v25 = vpop.f32.mrf.mxu0 }
 0x1ad   : > { %v4325_v11 = vpop.f32.mrf.mxu1  ;;  %5574 = vst [vmem:[#allocation72_spill] sm:$0xff] %v4345_v25 }
 0x1ae   : > { %5573 = vst [vmem:[#allocation71_spill] sm:$0xff] %v4325_v11  ;;  %v320_v11 = vld [vmem:[%s5478_s1 + $0x278] sm:$0xff]  ;;  %v4359_v25 = vpop.f32.mrf.mxu3 }
 0x1af   : > { %1167 = vmatmul.f32.gmra.mxu0 %v3626_v14  ;;  %v384_v14 = vld [vmem:[%s5478_s1 + $0x478] sm:$0xff] }
 0x1b0   : > { %1217 = vmatmul.f32.gmra.mxu1 %v4334_v45  ;;  %2673 = vmatmul.msk.f32.gmra.mxu2 %vm481_vm0, %v4338_v13 }
 0x1b1   : > { %1387 = vmatpush.msrb.mxu0 %v320_v11  ;;  %1452 = vmatpush.msra.mxu1 %v384_v14  ;;  %v4392_v14 = vld [vmem:[%s3039_s18 + $0x158] sm:$0xff] }
 0x1b2   : > { %1347 = vmatmul.f32.gmra.mxu3 %v2811_v0 }
 0x1b3   : > { %v4350_v29 = vpop.f32.mrf.mxu2 }
 0x1b4   : > { %5575 = vst [vmem:[#allocation73_spill] sm:$0xff] %v4350_v29  ;;  %v4373_v0 = vpop.f32.mrf.mxu0  ;;  %v316_v29 = vld [vmem:[%s5478_s1 + $0x258] sm:$0xff] }
 0x1b5   : > { %v4353_v44 = vpop.f32.mrf.mxu1  ;;  %5577 = vst [vmem:[#allocation75_spill] sm:$0xff] %v4373_v0  ;;  %1388 = vmatpush.msrb.mxu0 %v316_v29  ;;  %v4388_v0 = vld [vmem:[%s3039_s18 + $0x130] sm:$0xff]  ;;  %v380_v29 = vld [vmem:[%s5478_s1 + $0x458] sm:$0xff] }
 0x1b6   : > { %5576 = vst [vmem:[#allocation74_spill] sm:$0xff] %v4353_v44  ;;  %v1681_v44 = vld [vmem:[%s5479_s2 + $0x78] sm:$0xff]  ;;  %1453 = vmatpush.msra.mxu1 %v380_v29 }
 0x1b7   : > { %1170 = vmatmul.f32.gmra.mxu0 %v3661_v26  ;;  %1698 = vmatpush.msra.mxu3 %v1681_v44  ;;  %v1680_v26 = vld [vmem:[%s5479_s2 + $0x70] sm:$0xff]  ;;  %v440_v44 = vld [vmem:[%s5478_s1 + $0x638] sm:$0xff] }
 0x1b8   : > { %1220 = vmatmul.f32.gmra.mxu1 %v4362_v60  ;;  %2674 = vmatmul.msk.f32.gmra.mxu2 %vm481_vm0, %v4366_v5  ;;  %v4432_v29 = vld [vmem:[%s3039_s18 + $0x178] sm:$0xff] }
 0x1b9   : > { %1699 = vmatpush.msra.mxu3 %v1680_v26  ;;  %1519 = vmatpush.msra.mxu2 %v440_v44  ;;  %v1678_v26 = vld [vmem:[%s5479_s2 + $0x60] sm:$0xff]  ;;  %v1677_v44 = vld [vmem:[%s5479_s2 + $0x58] sm:$0xff] }
 0x1ba   : > { %1350 = vmatmul.f32.gmra.mxu3 %v3918_v30  ;;  %v4399_v30 = vpop.f32.mrf.mxu3 }
 0x1bb   : > { %v4375_v11 = vpop.f32.mrf.mxu2 }
 0x1bc   : > { %5578 = vst [vmem:[#allocation76_spill] sm:$0xff] %v4375_v11  ;;  %v4407_v11 = vpop.f32.mrf.mxu0 }
 0x1bd   : > { %v4378_v63 = vpop.f32.mrf.mxu1  ;;  %5580 = vst [vmem:[#allocation78_spill] sm:$0xff] %v4407_v11  ;;  %v312_v11 = vld [vmem:[%s5478_s1 + $0x238] sm:$0xff] }
 0x1be   : > { %5579 = vst [vmem:[#allocation77_spill] sm:$0xff] %v4378_v63  ;;  %v1679_v63 = vld [vmem:[%s5479_s2 + $0x68] sm:$0xff]  ;;  %1389 = vmatpush.msrb.mxu0 %v312_v11  ;;  %v436_v11 = vld [vmem:[%s5478_s1 + $0x618] sm:$0xff] }
 0x1bf   : > { %1700 = vmatpush.msra.mxu3 %v1679_v63  ;;  %1173 = vmatmul.f32.gmra.mxu0 %v3687_v21  ;;  %v1676_v21 = vld [vmem:[%s5479_s2 + $0x50] sm:$0xff]  ;;  %v376_v63 = vld [vmem:[%s5478_s1 + $0x438] sm:$0xff] }
 0x1c0   : > { %1223 = vmatmul.f32.gmra.mxu1 %v4388_v0  ;;  %2675 = vmatmul.msk.f32.gmra.mxu2 %vm481_vm0, %v4392_v14 }
 0x1c1   : > { %1701 = vmatpush.msra.mxu3 %v1678_v26  ;;  %1454 = vmatpush.msra.mxu1 %v376_v63  ;;  %v4472_v63 = vld [vmem:[%s3039_s18 + $0x198] sm:$0xff] }
 0x1c2   : > { %1353 = vmatmul.f32.gmra.mxu3 %v3955_v38  ;;  %v4428_v38 = vld [vmem:[%s3039_s18 + $0x150] sm:$0xff]  ;;  %1520 = vmatpush.msra.mxu2 %v436_v11 }
 0x1c3   : > { %v4412_v3 = vpop.f32.mrf.mxu2  ;;  %1702 = vmatpush.msra.mxu3 %v1677_v44  ;;  %v4452_v44 = vpop.f32.mrf.mxu3 }
 0x1c4   : > { %5581 = vst [vmem:[#allocation79_spill] sm:$0xff] %v4412_v3  ;;  %v4445_v26 = vpop.f32.mrf.mxu0  ;;  %v1675_v3 = vld [vmem:[%s5479_s2 + $0x48] sm:$0xff] }
 0x1c5   : > { %v4418_v20 = vpop.f32.mrf.mxu1  ;;  %5583 = vst [vmem:[#allocation81_spill] sm:$0xff] %v4445_v26  ;;  %1703 = vmatpush.msra.mxu3 %v1676_v21  ;;  %v1673_v21 = vld [vmem:[%s5479_s2 + $0x38] sm:$0xff] }
 0x1c6   : > { %5582 = vst [vmem:[#allocation80_spill] sm:$0xff] %v4418_v20 }
 0x1c7   : > { %1704 = vmatpush.msra.mxu3 %v1675_v3  ;;  %1176 = vmatmul.f32.gmra.mxu0 %v3713_v16  ;;  %v1672_v16 = vld [vmem:[%s5479_s2 + $0x30] sm:$0xff]  ;;  %v1671_v3 = vld [vmem:[%s5479_s2 + $0x28] sm:$0xff] }
 0x1c8   : > { %1226 = vmatmul.f32.gmra.mxu1 %v4428_v38  ;;  %2676 = vmatmul.msk.f32.gmra.mxu2 %vm481_vm0, %v4432_v29 }
 0x1c9   : > { %1705 = vmatpush.msra.mxu3 %v1674_v55 }
 0x1ca   : > { %1356 = vmatmul.f32.gmra.mxu3 %v3995_v57  ;;  %v4468_v57 = vld [vmem:[%s3039_s18 + $0x170] sm:$0xff] }
 0x1cb   : > { %v4450_v20 = vpop.f32.mrf.mxu2  ;;  %1706 = vmatpush.msra.mxu3 %v1673_v21  ;;  %v1670_v21 = vld [vmem:[%s5479_s2 + $0x20] sm:$0xff]  ;;  %v4496_v46 = vpop.f32.mrf.mxu3 }
 0x1cc   : > { %5584 = vst [vmem:[#allocation82_spill] sm:$0xff] %v4450_v20  ;;  %v308_v20 = vld [vmem:[%s5478_s1 + $0x218] sm:$0xff]  ;;  %v4482_v55 = vpop.f32.mrf.mxu0 }
 0x1cd   : > { %v4458_v26 = vpop.f32.mrf.mxu1  ;;  %1390 = vmatpush.msrb.mxu0 %v308_v20  ;;  %v372_v20 = vld [vmem:[%s5478_s1 + $0x418] sm:$0xff]  ;;  %1707 = vmatpush.msra.mxu3 %v1672_v16  ;;  %v4502_v16 = vld [vmem:[%s3039_s18 + $0x190] sm:$0xff] }
 0x1ce   : > { %5585 = vst [vmem:[#allocation83_spill] sm:$0xff] %v4458_v26  ;;  %1455 = vmatpush.msra.mxu1 %v372_v20  ;;  %v1667_v20 = vld [vmem:[%s5479_s2 + $0x8] sm:$0xff] }
 0x1cf   : > { %1708 = vmatpush.msra.mxu3 %v1671_v3  ;;  %1391 = vmatmul.f32.vlgmr.msrb.gmra.mxu0 %v2820_v7  ;;  %v1668_v7 = vld [vmem:[%s5479_s2 + $0x10] sm:$0xff] }
 0x1d0   : > { %1229 = vmatmul.f32.gmra.mxu1 %v4468_v57  ;;  %2677 = vmatmul.msk.f32.gmra.mxu2 %vm481_vm0, %v4472_v63 }
 0x1d1   : > { %1709 = vmatpush.msra.mxu3 %v1670_v21  ;;  %1763 = vmatpush.msra.mxu0 %v1697_v56  ;;  %v2826_v56 = vld [vmem:[%s3039_s18 + $0x48] sm:$0xff] }
 0x1d2   : > { %1359 = vmatmul.f32.gmra.mxu3 %v4035_v51  ;;  %v4506_v51 = vld [vmem:[%s3039_s18 + $0x1b8] sm:$0xff] }
 0x1d3   : > { %v4487_v11 = vpop.f32.mrf.mxu2  ;;  %1710 = vmatpush.msra.mxu3 %v1669_v42  ;;  %v2823_v42 = vld [vmem:[%s3039_s18 + $0x28] sm:$0xff] }
 0x1d4   : > { %5586 = vst [vmem:[#allocation84_spill] sm:$0xff] %v4487_v11  ;;  %v1135_v21 = vpop.f32.mrf.mxu0  ;;  %v1666_v11 = vld [vmem:[%s5479_s2] sm:$0xff] }
 0x1d5   : > { %v4493_v26 = vpop.f32.mrf.mxu1  ;;  %1711 = vmatpush.msra.mxu3 %v1668_v7  ;;  %v4528_v7 = vpop.f32.mrf.mxu3 }
 0x1d6   : > { %5587 = vst [vmem:[#allocation85_spill] sm:$0xff] %v4493_v26 }
 0x1d7   : > { %1712 = vmatpush.msra.mxu3 %v1667_v20  ;;  %1394 = vmatmul.f32.gmra.mxu0 %v2823_v42 }
 0x1d8   : > { %1232 = vmatmul.f32.gmra.mxu1 %v4502_v16  ;;  %2678 = vmatmul.msk.f32.gmra.mxu2 %vm481_vm0, %v4506_v51 }
 0x1d9   : > { %1713 = vmatpush.msra.mxu3 %v1666_v11 }
 0x1da   : > { %1362 = vmatmul.f32.gmra.mxu3 %v4070_v4  ;;  %v4531_v4 = vld [vmem:[%s3039_s18 + $0x1b0] sm:$0xff] }
 0x1db   : > { %v4516_v3 = vpop.f32.mrf.mxu2  ;;  %5590 = vst [vmem:[#allocation88_spill] sm:$0xff] %v4531_v4 }
 0x1dc   : > { %5588 = vst [vmem:[#allocation86_spill] sm:$0xff] %v4516_v3  ;;  %v4535_v3 = vld [vmem:[%s3039_s18 + $0x1d8] sm:$0xff]  ;;  %v1138_v42 = vpop.f32.mrf.mxu0 }
 0x1dd   : > { %v4522_v26 = vpop.f32.mrf.mxu1  ;;  %5591 = vst [vmem:[#allocation89_spill] sm:$0xff] %v4535_v3 }
 0x1de   : > { %5589 = vst [vmem:[#allocation87_spill] sm:$0xff] %v4522_v26  ;;  %v1696_v26 = vld [vmem:[%s5479_s2 + $0xf0] sm:$0xff] }
 0x1df   : > { %1397 = vmatmul.f32.gmra.mxu0 %v2826_v56 }
 0x1e0   : > { %1235 = vmatmul.f32.gmra.mxu1 %v4531_v4  ;;  %2679 = vmatmul.msk.f32.gmra.mxu2 %vm481_vm0, %v4535_v3  ;;  %v1136_v4 = vadd.f32 %v1135_v21, %v4264_v17  ;;  %v2835_v17 = vld [vmem:[%s3039_s18 + $0x58] sm:$0xff]  ;;  %v1572_v21 = vmul.f32 %v3952_v48, %v3952_v48 }
 0x1e1   : > { %1764 = vmatpush.msra.mxu0 %v1696_v26 }
 0x1e2   : > { %1365 = vmatmul.f32.gmra.mxu3 %v4101_v8  ;;  %v4557_v8 = vpop.f32.mrf.mxu3 }
 0x1e3   : > { %v4539_v20 = vpop.f32.mrf.mxu2 }
 0x1e4   : > { %5592 = vst [vmem:[#allocation90_spill] sm:$0xff] %v4539_v20  ;;  %v4553_v20 = vld [vmem:[%s3039_s18 + $0x1f8] sm:$0xff]  ;;  %v4561_v56 = vpop.f32.mrf.mxu0 }
 0x1e5   : > { %v4542_v11 = vpop.f32.mrf.mxu1  ;;  %5595 = vst [vmem:[#allocation93_spill] sm:$0xff] %v4553_v20 }
 0x1e6   : > { %5593 = vst [vmem:[#allocation91_spill] sm:$0xff] %v4542_v11 }
 0x1e7   : > { %1400 = vmatmul.f32.gmra.mxu0 %v2829_v1 }
 0x1e8   : > { %1238 = vmatmul.f32.gmra.mxu1 %v4549_v19  ;;  %2680 = vmatmul.msk.f32.gmra.mxu2 %vm481_vm0, %v4553_v20  ;;  %v1695_v19 = vld [vmem:[%s5479_s2 + $0xe8] sm:$0xff] }
 0x1e9   : > { %1765 = vmatpush.msra.mxu0 %v1695_v19  ;;  %v2832_v19 = vld [vmem:[%s3039_s18 + $0x88] sm:$0xff] }
 0x1ea   : > { %1368 = vmatmul.f32.gmra.mxu3 %v4129_v28  ;;  %v1133_v28 = vadd.f32 %v4482_v55, %v4233_v35  ;;  %v4580_v1 = vpop.f32.mrf.mxu3  ;;  %v2833_v35 = vld [vmem:[%s3039_s18 + $0x38] sm:$0xff]  ;;  %v1570_v55 = vmul.f32 %v3915_v22, %v3915_v22 }
 0x1eb   : > { %v4559_v11 = vpop.f32.mrf.mxu2  ;;  %v1693_v22 = vld [vmem:[%s5479_s2 + $0xd8] sm:$0xff] }
 0x1ec   : > { %5596 = vst [vmem:[#allocation94_spill] sm:$0xff] %v4559_v11  ;;  %v2831_v11 = vld [vmem:[%s3039_s18 + $0x18] sm:$0xff] }
 0x1ed   : > { %v4564_v26 = vpop.f32.mrf.mxu1 }
 0x1ee   : > { %5597 = vst [vmem:[#allocation95_spill] sm:$0xff] %v4564_v26  ;;  %v4578_v26 = vpop.f32.mrf.mxu0 }
 0x1ef   : > { %1403 = vmatmul.f32.gmra.mxu0 %v2832_v19 }
 0x1f0   : > { %1241 = vmatmul.f32.gmra.mxu1 %v4571_v9  ;;  %2681 = vmatmul.msk.f32.vlgmr.msra.gmra.mxu2 %vm481_vm0, %v2831_v11  ;;  %v1694_v9 = vld [vmem:[%s5479_s2 + $0xe0] sm:$0xff] }
 0x1f1   : > { %1766 = vmatpush.msra.mxu0 %v1694_v9 }
 0x1f2   : > { %1371 = vmatmul.f32.gmra.mxu3 %v4154_v32  ;;  %v4596_v9 = vpop.f32.mrf.mxu3 }
 0x1f3   : > { %v1262_v20 = vpop.f32.mrf.mxu2  ;;  %1767 = vmatpush.msra.mxu0 %v1693_v22 }
 0x1f5   : > { %v1197_v37 = vpop.f32.mrf.mxu1 }
 0x1f6   : > { %v1198_v3 = vadd.f32 %v1197_v37, %v1133_v28  ;;  %v4593_v37 = vpop.f32.mrf.mxu0 }
 0x1f7   : > { %1406 = vmatmul.f32.gmra.mxu0 %v2834_v24 }
 0x1f8   : > { %v1263_v11 = vadd.f32 %v1262_v20, %v1198_v3  ;;  %1456 = vmatmul.f32.vlgmr.msra.gmra.mxu1 %v4164_v58  ;;  %2682 = vmatmul.msk.f32.gmra.mxu2 %vm481_vm0, %v2833_v35  ;;  %v1139_v20 = vadd.f32 %v1138_v42, %v4296_v18  ;;  %v2837_v18 = vld [vmem:[%s3039_s18 + $0x78] sm:$0xff]  ;;  %v1574_v42 = vmul.f32 %v3992_v2, %v3992_v2 }
 0x1fa   : > { %v1602_v32 = vmul.f32 %v1263_v11, %v1263_v11  ;;  %v4613_v48 = vpop.f32.mrf.mxu3 }
 0x1fb   : > { %v1265_v19 = vpop.f32.mrf.mxu2 }
 0x1fc   : > { %v1634_v28 = vadd.f32 %v1602_v32, %v1570_v55  ;;  %v2836_v55 = vld [vmem:[%s3039_s18 + $0xc8] sm:$0xff] }
 0x1fd   : > { %v1200_v47 = vpop.f32.mrf.mxu1 }
 0x1fe   : > { %v1201_v58 = vadd.f32 %v1200_v47, %v1136_v4  ;;  %1714 = vmatmul.f32.vlgmr.msra.gmra.mxu3 %v1634_v28  ;;  %v4607_v4 = vpop.f32.mrf.mxu0 }
 0x1ff   : > { %1409 = vmatmul.f32.gmra.mxu0 %v2836_v55 }
 0x200   : > { %v1266_v3 = vadd.f32 %v1265_v19, %v1201_v58  ;;  %1459 = vmatmul.f32.gmra.mxu1 %v4186_v10  ;;  %2683 = vmatmul.msk.f32.gmra.mxu2 %vm481_vm0, %v2835_v17  ;;  %v1692_v10 = vld [vmem:[%s5479_s2 + $0xd0] sm:$0xff]  ;;  %v1142_v58 = vadd.f32 %v4561_v56, %v4328_v27  ;;  %v1576_v27 = vmul.f32 %v4032_v36, %v4032_v36  ;;  %v1690_v36 = vld [vmem:[%s5479_s2 + $0xc0] sm:$0xff] }
 0x201   : > { %1768 = vmatpush.msra.mxu0 %v1692_v10 }
 0x202   : > { %v1604_v24 = vmul.f32 %v1266_v3, %v1266_v3  ;;  %v4633_v56 = vpop.f32.mrf.mxu3 }
 0x203   : > { %v1268_v47 = vpop.f32.mrf.mxu2 }
 0x204   : > { %v1636_v11 = vadd.f32 %v1604_v24, %v1572_v21  ;;  %v2838_v24 = vld [vmem:[%s3039_s18 + $0xe8] sm:$0xff] }
 0x205   : > { %v1203_v35 = vpop.f32.mrf.mxu1 }
 0x206   : > { %v1204_v32 = vadd.f32 %v1203_v35, %v1139_v20  ;;  %1717 = vmatmul.f32.gmra.mxu3 %v1636_v11  ;;  %v4622_v3 = vpop.f32.mrf.mxu0  ;;  %v1145_v35 = vadd.f32 %v4578_v26, %v4359_v25  ;;  %v1578_v25 = vmul.f32 %v4067_v34, %v4067_v34  ;;  %v1689_v34 = vld [vmem:[%s5479_s2 + $0xb8] sm:$0xff] }
 0x207   : > { %1412 = vmatmul.f32.gmra.mxu0 %v2838_v24 }
 0x208   : > { %v1269_v19 = vadd.f32 %v1268_v47, %v1204_v32  ;;  %1462 = vmatmul.f32.gmra.mxu1 %v4211_v49  ;;  %2684 = vmatmul.msk.f32.gmra.mxu2 %vm481_vm0, %v2837_v18  ;;  %v1691_v49 = vld [vmem:[%s5479_s2 + $0xc8] sm:$0xff]  ;;  %v2839_v47 = vld [vmem:[%s3039_s18 + $0x98] sm:$0xff] }
 0x209   : > { %1769 = vmatpush.msra.mxu0 %v1691_v49  ;;  %v2840_v18 = vld [vmem:[%s3039_s18 + $0x108] sm:$0xff] }
 0x20a   : > { %v1606_v28 = vmul.f32 %v1269_v19, %v1269_v19  ;;  %v2842_v49 = vld [vmem:[%s3039_s18 + $0x128] sm:$0xff] }
 0x20b   : > { %v1271_v22 = vpop.f32.mrf.mxu2  ;;  %1770 = vmatpush.msra.mxu0 %v1690_v36  ;;  %v1154_v36 = vadd.f32 %v4622_v3, %v4496_v46 }
 0x20c   : > { %v1638_v17 = vadd.f32 %v1606_v28, %v1574_v42  ;;  %v2841_v28 = vld [vmem:[%s3039_s18 + $0xb8] sm:$0xff] }
 0x20d   : > { %v1206_v21 = vpop.f32.mrf.mxu1  ;;  %1771 = vmatpush.msra.mxu0 %v1689_v34 }
 0x20e   : > { %v1207_v20 = vadd.f32 %v1206_v21, %v1142_v58  ;;  %1720 = vmatmul.f32.gmra.mxu3 %v1638_v17  ;;  %v4637_v32 = vpop.f32.mrf.mxu0  ;;  %v1148_v58 = vadd.f32 %v4593_v37, %v4399_v30  ;;  %v4652_v21 = vpop.f32.mrf.mxu3  ;;  %v2843_v30 = vld [vmem:[%s3039_s18 + $0xd8] sm:$0xff]  ;;  %v1580_v37 = vmul.f32 %v4098_v41, %v4098_v41  ;;  %v1688_v41 = vld [vmem:[%s5479_s2 + $0xb0] sm:$0xff] }
 0x20f   : > { %1415 = vmatmul.f32.gmra.mxu0 %v2840_v18 }
 0x210   : > { %v1272_v2 = vadd.f32 %v1271_v22, %v1207_v20  ;;  %1465 = vmatmul.f32.gmra.mxu1 %v4236_v15  ;;  %2685 = vmatmul.msk.f32.gmra.mxu2 %vm481_vm0, %v2839_v47 }
 0x211   : > { %1772 = vmatpush.msra.mxu0 %v1688_v41 }
 0x212   : > { %v1608_v11 = vmul.f32 %v1272_v2, %v1272_v2 }
 0x213   : > { %v1274_v55 = vpop.f32.mrf.mxu2 }
 0x214   : > { %v1640_v10 = vadd.f32 %v1608_v11, %v1576_v27  ;;  %v1151_v27 = vadd.f32 %v4607_v4, %v4452_v44 }
 0x215   : > { %v1209_v19 = vpop.f32.mrf.mxu1 }
 0x216   : > { %v1210_v15 = vadd.f32 %v1209_v19, %v1145_v35  ;;  %1723 = vmatmul.f32.gmra.mxu3 %v1640_v10  ;;  %v4650_v17 = vpop.f32.mrf.mxu0  ;;  %v2844_v19 = vld [vmem:[%s3039_s18 + $0x148] sm:$0xff]  ;;  %v4670_v18 = vpop.f32.mrf.mxu3 }
 0x217   : > { %1418 = vmatmul.f32.gmra.mxu0 %v2842_v49 }
 0x218   : > { %v1275_v42 = vadd.f32 %v1274_v55, %v1210_v15  ;;  %1468 = vmatmul.f32.gmra.mxu1 %v4259_v52  ;;  %2686 = vmatmul.msk.f32.gmra.mxu2 %vm481_vm0, %v2841_v28 }
 0x21a   : > { %v1610_v26 = vmul.f32 %v1275_v42, %v1275_v42 }
 0x21b   : > { %v1277_v22 = vpop.f32.mrf.mxu2 }
 0x21c   : > { %v1642_v24 = vadd.f32 %v1610_v26, %v1578_v25 }
 0x21d   : > { %v1212_v20 = vpop.f32.mrf.mxu1 }
 0x21e   : > { %v1213_v52 = vadd.f32 %v1212_v20, %v1148_v58  ;;  %1726 = vmatmul.f32.gmra.mxu3 %v1642_v24  ;;  %v4665_v35 = vpop.f32.mrf.mxu0  ;;  %v2845_v58 = vld [vmem:[%s3039_s18 + $0x168] sm:$0xff]  ;;  %v5600_v24 = vld [vmem:[#allocation8_spill] sm:$0xff]  ;;  %v4692_v46 = vpop.f32.mrf.mxu3  ;;  %v5601_v20 = vld [vmem:[#allocation25_spill] sm:$0xff] }
 0x21f   : > { %1421 = vmatmul.f32.gmra.mxu0 %v2844_v19  ;;  %v5604_v19 = vld [vmem:[#allocation27_spill] sm:$0xff] }
 0x220   : > { %v1278_v2 = vadd.f32 %v1277_v22, %v1213_v52  ;;  %1471 = vmatmul.f32.gmra.mxu1 %v4281_v61  ;;  %2687 = vmatmul.msk.f32.gmra.mxu2 %vm481_vm0, %v2843_v30  ;;  %v634_v61 = vadd.f32 %v3876_v40, %v3969_v54  ;;  %v1582_v40 = vmul.f32 %v4126_v12, %v4126_v12  ;;  %v1687_v12 = vld [vmem:[%s5479_s2 + $0xa8] sm:$0xff] }
 0x221   : > { %1773 = vmatpush.msra.mxu0 %v1687_v12 }
 0x222   : > { %v1612_v47 = vmul.f32 %v1278_v2, %v1278_v2  ;;  %v699_v4 = vadd.f32 %v3726_v31, %v634_v61 }
 0x223   : > { %v1280_v11 = vpop.f32.mrf.mxu2 }
 0x224   : > { %v1644_v55 = vadd.f32 %v1612_v47, %v1580_v37 }
 0x225   : > { %v1215_v10 = vpop.f32.mrf.mxu1 }
 0x226   : > { %v1216_v15 = vadd.f32 %v1215_v10, %v1151_v27  ;;  %1729 = vmatmul.f32.gmra.mxu3 %v1644_v55  ;;  %v4683_v28 = vpop.f32.mrf.mxu0  ;;  %v2846_v27 = vld [vmem:[%s3039_s18 + $0x188] sm:$0xff] }
 0x227   : > { %1424 = vmatmul.f32.gmra.mxu0 %v2845_v58 }
 0x228   : > { %v1281_v44 = vadd.f32 %v1280_v11, %v1216_v15  ;;  %1474 = vmatmul.f32.gmra.mxu1 %v4306_v50  ;;  %2688 = vmatmul.msk.f32.gmra.mxu2 %vm481_vm0, %v4310_v33  ;;  %v5599_v50 = vld [vmem:[#allocation9_spill] sm:$0xff]  ;;  %v637_v33 = vadd.f32 %v3895_v43, %v5600_v24  ;;  %v1157_v43 = vadd.f32 %v4637_v32, %v4528_v7  ;;  %v5602_v11 = vld [vmem:[#allocation10_spill] sm:$0xff]  ;;  %v4713_v15 = vpop.f32.mrf.mxu3 }
 0x229   : > { %v764_v22 = vadd.f32 %v5599_v50, %v699_v4  ;;  %v1686_v7 = vld [vmem:[%s5479_s2 + $0xa0] sm:$0xff]  ;;  %v1685_v50 = vld [vmem:[%s5479_s2 + $0x98] sm:$0xff] }
 0x22a   : > { %v1614_v54 = vmul.f32 %v1281_v44, %v1281_v44  ;;  %v702_v49 = vadd.f32 %v5601_v20, %v637_v33  ;;  %1774 = vmatpush.msra.mxu0 %v1686_v7  ;;  %v1160_v44 = vadd.f32 %v4650_v17, %v4557_v8  ;;  %v5607_v17 = vld [vmem:[#allocation29_spill] sm:$0xff]  ;;  %v1163_v33 = vadd.f32 %v4665_v35, %v4580_v1  ;;  %v1684_v1 = vld [vmem:[%s5479_s2 + $0x90] sm:$0xff] }
 0x22b   : > { %v1283_v42 = vpop.f32.mrf.mxu2  ;;  %v1584_v34 = vmul.f32 %v764_v22, %v764_v22  ;;  %v5610_v7 = vld [vmem:[#allocation16_spill] sm:$0xff] }
 0x22c   : > { %v1646_v25 = vadd.f32 %v1614_v54, %v1582_v40  ;;  %1775 = vmatpush.msra.mxu0 %v1685_v50 }
 0x22d   : > { %v1218_v26 = vpop.f32.mrf.mxu1 }
 0x22e   : > { %v1219_v31 = vadd.f32 %v1218_v26, %v1154_v36  ;;  %1732 = vmatmul.f32.gmra.mxu3 %v1646_v25  ;;  %v4700_v30 = vpop.f32.mrf.mxu0  ;;  %v5606_v26 = vld [vmem:[#allocation13_spill] sm:$0xff]  ;;  %1776 = vmatpush.msra.mxu0 %v1684_v1 }
 0x22f   : > { %1427 = vmatmul.f32.gmra.mxu0 %v2846_v27  ;;  %v1166_v27 = vadd.f32 %v4683_v28, %v4596_v9  ;;  %v1683_v9 = vld [vmem:[%s5479_s2 + $0x88] sm:$0xff] }
 0x230   : > { %v1284_v3 = vadd.f32 %v1283_v42, %v1219_v31  ;;  %1477 = vmatmul.f32.gmra.mxu1 %v4334_v45  ;;  %2689 = vmatmul.msk.f32.gmra.mxu2 %vm481_vm0, %v4338_v13  ;;  %v640_v45 = vadd.f32 %v3921_v59, %v5602_v11  ;;  %v5603_v13 = vld [vmem:[#allocation11_spill] sm:$0xff] }
 0x231   : > { %v767_v10 = vadd.f32 %v5603_v13, %v702_v49  ;;  %v2847_v42 = vld [vmem:[%s3039_s18 + $0x1a8] sm:$0xff]  ;;  %1777 = vmatpush.msra.mxu0 %v1683_v9  ;;  %v5627_v9 = vld [vmem:[#allocation38_spill] sm:$0xff] }
 0x232   : > { %v1616_v52 = vmul.f32 %v1284_v3, %v1284_v3  ;;  %v705_v61 = vadd.f32 %v5604_v19, %v640_v45  ;;  %v4734_v3 = vpop.f32.mrf.mxu3 }
 0x233   : > { %v1286_v2 = vpop.f32.mrf.mxu2  ;;  %v1586_v59 = vmul.f32 %v767_v10, %v767_v10  ;;  %v2849_v10 = vld [vmem:[%s3039_s18 + $0x1e8] sm:$0xff] }
 0x234   : > { %v1648_v37 = vadd.f32 %v1616_v52, %v1584_v34  ;;  %v770_v58 = vadd.f32 %v5606_v26, %v705_v61  ;;  %v2848_v52 = vld [vmem:[%s3039_s18 + $0x1c8] sm:$0xff]  ;;  %v5612_v61 = vld [vmem:[#allocation32_spill] sm:$0xff] }
 0x235   : > { %v1221_v47 = vpop.f32.mrf.mxu1  ;;  %v5609_v34 = vld [vmem:[#allocation15_spill] sm:$0xff] }
 0x236   : > { %v1222_v55 = vadd.f32 %v1221_v47, %v1157_v43  ;;  %1735 = vmatmul.f32.gmra.mxu3 %v1648_v37  ;;  %v4717_v40 = vpop.f32.mrf.mxu0  ;;  %v1588_v24 = vmul.f32 %v770_v58, %v770_v58 }
 0x237   : > { %1430 = vmatmul.f32.gmra.mxu0 %v2847_v42 }
 0x238   : > { %v1287_v32 = vadd.f32 %v1286_v2, %v1222_v55  ;;  %1480 = vmatmul.f32.gmra.mxu1 %v4362_v60  ;;  %2690 = vmatmul.msk.f32.gmra.mxu2 %vm481_vm0, %v4366_v5  ;;  %v5605_v60 = vld [vmem:[#allocation12_spill] sm:$0xff] }
 0x239   : > { %v643_v25 = vadd.f32 %v3961_v23, %v5605_v60  ;;  %v5613_v60 = vld [vmem:[#allocation18_spill] sm:$0xff] }
 0x23a   : > { %v1618_v41 = vmul.f32 %v1287_v32, %v1287_v32  ;;  %v4754_v32 = vpop.f32.mrf.mxu3 }
 0x23b   : > { %v1289_v4 = vpop.f32.mrf.mxu2  ;;  %v708_v22 = vadd.f32 %v5607_v17, %v643_v25  ;;  %v652_v25 = vadd.f32 %v4076_v62, %v5613_v60  ;;  %v1172_v17 = vadd.f32 %v4717_v40, %v4633_v56 }
 0x23c   : > { %v1650_v54 = vadd.f32 %v1618_v41, %v1586_v59 }
 0x23d   : > { %v1224_v36 = vpop.f32.mrf.mxu1  ;;  %v773_v2 = vadd.f32 %v5609_v34, %v708_v22  ;;  %v5621_v34 = vld [vmem:[#allocation36_spill] sm:$0xff] }
 0x23e   : > { %v1225_v5 = vadd.f32 %v1224_v36, %v1160_v44  ;;  %1738 = vmatmul.f32.gmra.mxu3 %v1650_v54  ;;  %v4732_v12 = vpop.f32.mrf.mxu0  ;;  %v1169_v44 = vadd.f32 %v4700_v30, %v4613_v48  ;;  %v5615_v48 = vld [vmem:[#allocation34_spill] sm:$0xff] }
 0x23f   : > { %1433 = vmatmul.f32.gmra.mxu0 %v2848_v52  ;;  %v1590_v47 = vmul.f32 %v773_v2, %v773_v2  ;;  %v717_v30 = vadd.f32 %v5615_v48, %v652_v25 }
 0x240   : > { %v1290_v8 = vadd.f32 %v1289_v4, %v1225_v5  ;;  %1483 = vmatmul.f32.gmra.mxu1 %v4388_v0  ;;  %2691 = vmatmul.msk.f32.gmra.mxu2 %vm481_vm0, %v4392_v14  ;;  %v5608_v0 = vld [vmem:[#allocation14_spill] sm:$0xff] }
 0x241   : > { %v646_v43 = vadd.f32 %v4001_v6, %v5608_v0 }
 0x242   : > { %v1620_v23 = vmul.f32 %v1290_v8, %v1290_v8  ;;  %v4772_v58 = vpop.f32.mrf.mxu3 }
 0x243   : > { %v1292_v31 = vpop.f32.mrf.mxu2  ;;  %v711_v37 = vadd.f32 %v3807_v39, %v646_v43  ;;  %v5611_v39 = vld [vmem:[#allocation17_spill] sm:$0xff] }
 0x244   : > { %v1652_v20 = vadd.f32 %v1620_v23, %v1588_v24 }
 0x245   : > { %v1227_v49 = vpop.f32.mrf.mxu1  ;;  %v776_v19 = vadd.f32 %v5611_v39, %v711_v37  ;;  %v5625_v39 = vld [vmem:[#allocation92_spill] sm:$0xff] }
 0x246   : > { %v1228_v14 = vadd.f32 %v1227_v49, %v1163_v33  ;;  %1741 = vmatmul.f32.gmra.mxu3 %v1652_v20  ;;  %v4749_v45 = vpop.f32.mrf.mxu0  ;;  %v5617_v20 = vld [vmem:[#allocation2_spill] sm:$0xff] }
 0x247   : > { %1436 = vmatmul.f32.gmra.mxu0 %v2849_v10 }
 0x248   : > { %v1293_v35 = vadd.f32 %v1292_v31, %v1228_v14  ;;  %1486 = vmatmul.f32.gmra.mxu1 %v4428_v38  ;;  %2692 = vmatmul.msk.f32.gmra.mxu2 %vm481_vm0, %v4432_v29  ;;  %v649_v38 = vadd.f32 %v4041_v53, %v5610_v7  ;;  %v1592_v53 = vmul.f32 %v776_v19, %v776_v19  ;;  %v5616_v31 = vld [vmem:[#allocation20_spill] sm:$0xff]  ;;  %v5620_v14 = vld [vmem:[#allocation89_spill] sm:$0xff]  ;;  %v5624_v7 = vld [vmem:[#allocation23_spill] sm:$0xff] }
 0x249   : > { %v655_v49 = vadd.f32 %v5617_v20, %v5616_v31  ;;  %v5626_v19 = vld [vmem:[#allocation93_spill] sm:$0xff]  ;;  %v5634_v31 = vld [vmem:[#allocation28_spill] sm:$0xff] }
 0x24a   : > { %v1622_v6 = vmul.f32 %v1293_v35, %v1293_v35  ;;  %v714_v59 = vadd.f32 %v5612_v61, %v649_v38  ;;  %v4787_v56 = vpop.f32.mrf.mxu3  ;;  %v1175_v35 = vadd.f32 %v4732_v12, %v4652_v21  ;;  %v1178_v61 = vadd.f32 %v4749_v45, %v4670_v18  ;;  %v5635_v20 = vld [vmem:[#allocation44_spill] sm:$0xff] }
 0x24b   : > { %v1295_v11 = vpop.f32.mrf.mxu2  ;;  %v720_v2 = vadd.f32 %v5621_v34, %v655_v49  ;;  %v876_v49 = vadd.f32 %v5635_v20, %v5634_v31 }
 0x24c   : > { %v1654_v55 = vadd.f32 %v1622_v6, %v1590_v47 }
 0x24d   : > { %v1230_v13 = vpop.f32.mrf.mxu1  ;;  %v785_v38 = vadd.f32 %v5624_v7, %v720_v2  ;;  %v5640_v7 = vld [vmem:[#allocation55_spill] sm:$0xff] }
 0x24e   : > { %v1231_v29 = vadd.f32 %v1230_v13, %v1166_v27  ;;  %1744 = vmatmul.f32.gmra.mxu3 %v1654_v55  ;;  %v1392_v54 = vpop.f32.mrf.mxu0  ;;  %v5623_v55 = vld [vmem:[#allocation3_spill] sm:$0xff] }
 0x24f   : > { %v1598_v21 = vmul.f32 %v785_v38, %v785_v38  ;;  %v1393_v45 = vadd.f32 %v1392_v54, %v4692_v46 }
 0x250   : > { %v1296_v28 = vadd.f32 %v1295_v11, %v1231_v29  ;;  %1489 = vmatmul.f32.gmra.mxu1 %v4468_v57  ;;  %2693 = vmatmul.msk.f32.gmra.mxu2 %vm481_vm0, %v4472_v63  ;;  %v5614_v57 = vld [vmem:[#allocation19_spill] sm:$0xff]  ;;  %v1682_v63 = vld [vmem:[%s5479_s2 + $0x80] sm:$0xff] }
 0x251   : > { %v779_v26 = vadd.f32 %v5614_v57, %v714_v59  ;;  %1778 = vmatpush.msra.mxu0 %v1682_v63  ;;  %v5622_v11 = vld [vmem:[#allocation22_spill] sm:$0xff]  ;;  %v5631_v63 = vld [vmem:[#allocation96_spill] sm:$0xff] }
 0x252   : > { %v1624_v41 = vmul.f32 %v1296_v28, %v1296_v28  ;;  %v658_v13 = vadd.f32 %v5623_v55, %v5622_v11 }
 0x253   : > { %v1298_v4 = vpop.f32.mrf.mxu2  ;;  %v1594_v62 = vmul.f32 %v779_v26, %v779_v26 }
 0x254   : > { %v1656_v36 = vadd.f32 %v1624_v41, %v1592_v53  ;;  %v723_v28 = vadd.f32 %v5627_v9, %v658_v13  ;;  %v4800_v41 = vpop.f32.mrf.mxu3  ;;  %v5641_v9 = vld [vmem:[#allocation54_spill] sm:$0xff] }
 0x255   : > { %v1233_v42 = vpop.f32.mrf.mxu1 }
 0x256   : > { %v1234_v5 = vadd.f32 %v1233_v42, %v1169_v44  ;;  %1747 = vmatmul.f32.gmra.mxu3 %v1656_v36  ;;  %v1395_v24 = vpop.f32.mrf.mxu0  ;;  %v5628_v36 = vld [vmem:[#allocation26_spill] sm:$0xff] }
 0x257   : > { %v5629_v42 = vld [vmem:[#allocation42_spill] sm:$0xff]  ;;  %v1396_v46 = vadd.f32 %v1395_v24, %v4713_v15 }
 0x258   : > { %v1299_v50 = vadd.f32 %v1298_v4, %v1234_v5  ;;  %1492 = vmatmul.f32.gmra.mxu1 %v4502_v16  ;;  %2694 = vmatmul.msk.f32.gmra.mxu2 %vm481_vm0, %v4506_v51  ;;  %v5618_v16 = vld [vmem:[#allocation21_spill] sm:$0xff]  ;;  %v5619_v51 = vld [vmem:[#allocation88_spill] sm:$0xff]  ;;  %v873_v60 = vadd.f32 %v5629_v42, %v5628_v36  ;;  %v5644_v42 = vld [vmem:[#allocation59_spill] sm:$0xff] }
 0x259   : > { %v782_v0 = vadd.f32 %v5618_v16, %v717_v30  ;;  %v5630_v5 = vld [vmem:[#allocation24_spill] sm:$0xff] }
 0x25a   : > { %v1626_v8 = vmul.f32 %v1299_v50, %v1299_v50  ;;  %v788_v57 = vadd.f32 %v5630_v5, %v723_v28  ;;  %v5632_v50 = vld [vmem:[#allocation48_spill] sm:$0xff] }
 0x25b   : > { %v1301_v22 = vpop.f32.mrf.mxu2  ;;  %v1596_v40 = vmul.f32 %v782_v0, %v782_v0  ;;  %v938_v48 = vadd.f32 %v5632_v50, %v873_v60 }
 0x25c   : > { %v1658_v23 = vadd.f32 %v1626_v8, %v1594_v62  ;;  %v1600_v30 = vmul.f32 %v788_v57, %v788_v57 }
 0x25d   : > { %v1236_v33 = vpop.f32.mrf.mxu1 }
 0x25e   : > { %v1237_v52 = vadd.f32 %v1236_v33, %v1172_v17  ;;  %1750 = vmatmul.f32.gmra.mxu3 %v1658_v23  ;;  %v1398_v47 = vpop.f32.mrf.mxu0  ;;  %v5633_v23 = vld [vmem:[#allocation47_spill] sm:$0xff] }
 0x25f   : > { %v1003_v33 = vadd.f32 %v5633_v23, %v938_v48  ;;  %v5646_v48 = vld [vmem:[#allocation33_spill] sm:$0xff] }
 0x260   : > { %v1302_v43 = vadd.f32 %v1301_v22, %v1237_v52  ;;  %1495 = vmatmul.f32.gmra.mxu1 %v5619_v51  ;;  %2695 = vmatmul.msk.f32.gmra.mxu2 %vm481_vm0, %v5620_v14  ;;  %v4811_v52 = vpop.f32.mrf.mxu3  ;;  %v5636_v51 = vld [vmem:[#allocation52_spill] sm:$0xff] }
 0x261   : > { %v941_v14 = vadd.f32 %v5636_v51, %v876_v49  ;;  %v5651_v51 = vld [vmem:[#allocation49_spill] sm:$0xff] }
 0x262   : > { %v1628_v1 = vmul.f32 %v1302_v43, %v1302_v43  ;;  %v1571_v43 = vmul.f32 %v1003_v33, %v1003_v33 }
 0x263   : > { %v1304_v37 = vpop.f32.mrf.mxu2 }
 0x264   : > { %v1660_v6 = vadd.f32 %v1628_v1, %v1596_v40  ;;  %v5637_v1 = vld [vmem:[#allocation50_spill] sm:$0xff] }
 0x265   : > { %v1239_v27 = vpop.f32.mrf.mxu1 }
 0x266   : > { %v1240_v10 = vadd.f32 %v1239_v27, %v1175_v35  ;;  %1753 = vmatmul.f32.gmra.mxu3 %v1660_v6  ;;  %v1401_v53 = vpop.f32.mrf.mxu0  ;;  %v1006_v35 = vadd.f32 %v5637_v1, %v941_v14  ;;  %v5639_v6 = vld [vmem:[#allocation5_spill] sm:$0xff] }
 0x267   : > { %v1402_v5 = vadd.f32 %v1401_v53, %v4754_v32 }
 0x268   : > { %v1305_v29 = vadd.f32 %v1304_v37, %v1240_v10  ;;  %1498 = vmatmul.f32.gmra.mxu1 %v5625_v39  ;;  %2696 = vmatmul.msk.f32.gmra.mxu2 %vm481_vm0, %v5626_v19  ;;  %v5638_v37 = vld [vmem:[#allocation30_spill] sm:$0xff]  ;;  %v1573_v10 = vmul.f32 %v1006_v35, %v1006_v35  ;;  %v1399_v39 = vadd.f32 %v1398_v47, %v4734_v3  ;;  %v4825_v47 = vpop.f32.mrf.mxu3 }
 0x269   : > { %v879_v27 = vadd.f32 %v5639_v6, %v5638_v37 }
 0x26a   : > { %v1630_v12 = vmul.f32 %v1305_v29, %v1305_v29 }
 0x26b   : > { %v1307_v59 = vpop.f32.mrf.mxu2  ;;  %v944_v38 = vadd.f32 %v5640_v7, %v879_v27  ;;  %v5655_v7 = vld [vmem:[#allocation53_spill] sm:$0xff] }
 0x26c   : > { %v1662_v44 = vadd.f32 %v1630_v12, %v1598_v21  ;;  %v5642_v21 = vld [vmem:[#allocation31_spill] sm:$0xff]  ;;  %v5643_v12 = vld [vmem:[#allocation6_spill] sm:$0xff] }
 0x26d   : > { %v1242_v4 = vpop.f32.mrf.mxu1  ;;  %v1009_v28 = vadd.f32 %v5641_v9, %v944_v38 }
 0x26e   : > { %v1243_v25 = vadd.f32 %v1242_v4, %v1178_v61  ;;  %1756 = vmatmul.f32.gmra.mxu3 %v1662_v44  ;;  %v1404_v22 = vpop.f32.mrf.mxu0  ;;  %v882_v61 = vadd.f32 %v5643_v12, %v5642_v21 }
 0x26f   : > { %v1575_v36 = vmul.f32 %v1009_v28, %v1009_v28  ;;  %v1405_v31 = vadd.f32 %v1404_v22, %v4772_v58 }
 0x270   : > { %v1308_v26 = vadd.f32 %v1307_v59, %v1243_v25  ;;  %1501 = vmatmul.f32.gmra.mxu1 %v5631_v63  ;;  %v947_v60 = vadd.f32 %v5644_v42, %v882_v61  ;;  %v5645_v63 = vld [vmem:[#allocation58_spill] sm:$0xff]  ;;  %v5657_v61 = vld [vmem:[#allocation67_spill] sm:$0xff] }
 0x272   : > { %v1632_v18 = vmul.f32 %v1308_v26, %v1308_v26  ;;  %v1012_v50 = vadd.f32 %v5645_v63, %v947_v60 }
 0x273   : > { %v1522_v62 = vpop.f32.mrf.mxu2 }
 0x274   : > { %v1664_v8 = vadd.f32 %v1632_v18, %v1600_v30  ;;  %v5647_v30 = vld [vmem:[#allocation46_spill] sm:$0xff] }
 0x275   : > { %v1457_v17 = vpop.f32.mrf.mxu1  ;;  %v885_v18 = vadd.f32 %v5647_v30, %v5646_v48 }
 0x276   : > { %v1458_v16 = vadd.f32 %v1457_v17, %v1393_v45  ;;  %1759 = vmatmul.f32.gmra.mxu3 %v1664_v8  ;;  %v1407_v55 = vpop.f32.mrf.mxu0  ;;  %v1577_v8 = vmul.f32 %v1012_v50, %v1012_v50  ;;  %v5648_v17 = vld [vmem:[#allocation62_spill] sm:$0xff] }
 0x277   : > { %v950_v23 = vadd.f32 %v5648_v17, %v885_v18  ;;  %v1408_v37 = vadd.f32 %v1407_v55, %v4787_v56  ;;  %v5661_v18 = vld [vmem:[#allocation70_spill] sm:$0xff] }
 0x278   : > { %v1523_v0 = vadd.f32 %v1522_v62, %v1458_v16  ;;  %v5649_v16 = vld [vmem:[#allocation61_spill] sm:$0xff] }
 0x27a   : > { %v1603_v34 = vmul.f32 %v1523_v0, %v1523_v0  ;;  %v1015_v0 = vadd.f32 %v5649_v16, %v950_v23 }
 0x27b   : > { %v1525_v54 = vpop.f32.mrf.mxu2 }
 0x27c   : > { %v1635_v2 = vadd.f32 %v1603_v34, %v1571_v43  ;;  %v5650_v43 = vld [vmem:[#allocation35_spill] sm:$0xff] }
 0x27d   : > { %v1460_v40 = vpop.f32.mrf.mxu1  ;;  %v888_v14 = vadd.f32 %v5651_v51, %v5650_v43 }
 0x27e   : > { %v1461_v11 = vadd.f32 %v1460_v40, %v1396_v46  ;;  %1779 = vmatmul.f32.vlgmr.msra.gmra.mxu0 %v1635_v2  ;;  %v1410_v4 = vpop.f32.mrf.mxu0  ;;  %v1354_v46 = vpop.f32.mrf.mxu3  ;;  %v1579_v2 = vmul.f32 %v1015_v0, %v1015_v0  ;;  %v5652_v40 = vld [vmem:[#allocation65_spill] sm:$0xff] }
 0x27f   : > { %v953_v1 = vadd.f32 %v5652_v40, %v888_v14  ;;  %v1411_v21 = vadd.f32 %v1410_v4, %v4800_v41  ;;  %v5665_v14 = vld [vmem:[#allocation73_spill] sm:$0xff] }
 0x280   : > { %v1526_v13 = vadd.f32 %v1525_v54, %v1461_v11  ;;  %v5653_v11 = vld [vmem:[#allocation64_spill] sm:$0xff] }
 0x282   : > { %v1605_v29 = vmul.f32 %v1526_v13, %v1526_v13  ;;  %v1018_v13 = vadd.f32 %v5653_v11, %v953_v1 }
 0x283   : > { %v1528_v19 = vpop.f32.mrf.mxu2 }
 0x284   : > { %v1637_v15 = vadd.f32 %v1605_v29, %v1573_v10  ;;  %v5654_v10 = vld [vmem:[#allocation37_spill] sm:$0xff] }
 0x285   : > { %v1463_v24 = vpop.f32.mrf.mxu1  ;;  %v891_v38 = vadd.f32 %v5655_v7, %v5654_v10  ;;  %v5669_v7 = vld [vmem:[#allocation76_spill] sm:$0xff] }
 0x286   : > { %v1464_v59 = vadd.f32 %v1463_v24, %v1399_v39  ;;  %1782 = vmatmul.f32.gmra.mxu0 %v1637_v15  ;;  %v1413_v53 = vpop.f32.mrf.mxu0  ;;  %v1581_v15 = vmul.f32 %v1018_v13, %v1018_v13  ;;  %v5656_v24 = vld [vmem:[#allocation68_spill] sm:$0xff] }
 0x287   : > { %v956_v9 = vadd.f32 %v5656_v24, %v891_v38  ;;  %v1414_v50 = vadd.f32 %v1413_v53, %v4811_v52 }
 0x288   : > { %v1529_v44 = vadd.f32 %v1528_v19, %v1464_v59  ;;  %v1357_v19 = vpop.f32.mrf.mxu3 }
 0x289   : > { %v1021_v59 = vadd.f32 %v5657_v61, %v956_v9 }
 0x28a   : > { %v1607_v25 = vmul.f32 %v1529_v44, %v1529_v44  ;;  %v5658_v44 = vld [vmem:[#allocation39_spill] sm:$0xff] }
 0x28b   : > { %v1531_v57 = vpop.f32.mrf.mxu2 }
 0x28c   : > { %v1639_v3 = vadd.f32 %v1607_v25, %v1575_v36  ;;  %v5659_v36 = vld [vmem:[#allocation57_spill] sm:$0xff] }
 0x28d   : > { %v1466_v26 = vpop.f32.mrf.mxu1  ;;  %v894_v42 = vadd.f32 %v5659_v36, %v5658_v44  ;;  %v5673_v36 = vld [vmem:[#allocation45_spill] sm:$0xff] }
 0x28e   : > { %v1467_v45 = vadd.f32 %v1466_v26, %v1402_v5  ;;  %1785 = vmatmul.f32.gmra.mxu0 %v1639_v3  ;;  %v1416_v27 = vpop.f32.mrf.mxu0  ;;  %v5660_v3 = vld [vmem:[#allocation71_spill] sm:$0xff] }
 0x28f   : > { %v959_v26 = vadd.f32 %v5660_v3, %v894_v42  ;;  %v1417_v0 = vadd.f32 %v1416_v27, %v4825_v47  ;;  %v5674_v42 = vld [vmem:[#allocation69_spill] sm:$0xff]  ;;  %v5675_v3 = vld [vmem:[#allocation79_spill] sm:$0xff] }
 0x290   : > { %v1532_v62 = vadd.f32 %v1531_v57, %v1467_v45  ;;  %v1583_v57 = vmul.f32 %v1021_v59, %v1021_v59  ;;  %v1360_v48 = vpop.f32.mrf.mxu3  ;;  %v1877_v59 = vlaneseq }
 0x291   : > { %v1024_v45 = vadd.f32 %v5661_v18, %v959_v26  ;;  %v5679_v18 = vld [vmem:[#allocation75_spill] sm:$0xff] }
 0x292   : > { %v1609_v33 = vmul.f32 %v1532_v62, %v1532_v62  ;;  %v5662_v62 = vld [vmem:[#allocation40_spill] sm:$0xff] }
 0x293   : > { %v1534_v32 = vpop.f32.mrf.mxu2 }
 0x294   : > { %v1641_v20 = vadd.f32 %v1609_v33, %v1577_v8  ;;  %v5663_v8 = vld [vmem:[#allocation60_spill] sm:$0xff] }
 0x295   : > { %v1469_v49 = vpop.f32.mrf.mxu1  ;;  %v897_v17 = vadd.f32 %v5663_v8, %v5662_v62 }
 0x296   : > { %v1470_v34 = vadd.f32 %v1469_v49, %v1405_v31  ;;  %1788 = vmatmul.f32.gmra.mxu0 %v1641_v20  ;;  %v1419_v25 = vpop.f32.mrf.mxu0  ;;  %v5664_v20 = vld [vmem:[#allocation74_spill] sm:$0xff] }
 0x297   : > { %v962_v49 = vadd.f32 %v5664_v20, %v897_v17  ;;  %v1420_v11 = vadd.f32 %v1419_v25, %v1354_v46  ;;  %v5680_v17 = vld [vmem:[#allocation83_spill] sm:$0xff] }
 0x298   : > { %v1535_v54 = vadd.f32 %v1534_v32, %v1470_v34  ;;  %v1585_v32 = vmul.f32 %v1024_v45, %v1024_v45  ;;  %v4852_v43 = vpop.f32.mrf.mxu3 }
 0x299   : > { %v1027_v34 = vadd.f32 %v5665_v14, %v962_v49 }
 0x29a   : > { %v1611_v35 = vmul.f32 %v1535_v54, %v1535_v54  ;;  %v5666_v54 = vld [vmem:[#allocation41_spill] sm:$0xff] }
 0x29b   : > { %v1537_v58 = vpop.f32.mrf.mxu2 }
 0x29c   : > { %v1643_v22 = vadd.f32 %v1611_v35, %v1579_v2  ;;  %v5667_v2 = vld [vmem:[#allocation63_spill] sm:$0xff] }
 0x29d   : > { %v1472_v6 = vpop.f32.mrf.mxu1  ;;  %v900_v40 = vadd.f32 %v5667_v2, %v5666_v54  ;;  %v5683_v2 = vld [vmem:[#allocation82_spill] sm:$0xff] }
 0x29e   : > { %v1473_v29 = vadd.f32 %v1472_v6, %v1408_v37  ;;  %1791 = vmatmul.f32.gmra.mxu0 %v1643_v22  ;;  %v1422_v31 = vpop.f32.mrf.mxu0  ;;  %v1587_v37 = vmul.f32 %v1027_v34, %v1027_v34 }
 0x29f   : > { %v1423_v46 = vadd.f32 %v1422_v31, %v1357_v19  ;;  %v5677_v19 = vld [vmem:[#allocation72_spill] sm:$0xff] }
 0x2a0   : > { %v1538_v39 = vadd.f32 %v1537_v58, %v1473_v29  ;;  %v5668_v58 = vld [vmem:[#allocation77_spill] sm:$0xff]  ;;  %v5670_v29 = vld [vmem:[#allocation43_spill] sm:$0xff]  ;;  %v4861_v9 = vpop.f32.mrf.mxu3 }
 0x2a1   : > { %v965_v22 = vadd.f32 %v5668_v58, %v900_v40 }
 0x2a2   : > { %v1613_v28 = vmul.f32 %v1538_v39, %v1538_v39  ;;  %v5671_v39 = vld [vmem:[#allocation66_spill] sm:$0xff] }
 0x2a3   : > { %v1540_v56 = vpop.f32.mrf.mxu2  ;;  %v1030_v38 = vadd.f32 %v5669_v7, %v965_v22  ;;  %v5684_v22 = vld [vmem:[#allocation84_spill] sm:$0xff] }
 0x2a4   : > { %v1645_v55 = vadd.f32 %v1613_v28, %v1581_v15  ;;  %v903_v15 = vadd.f32 %v5671_v39, %v5670_v29 }
 0x2a5   : > { %v1475_v12 = vpop.f32.mrf.mxu1 }
 0x2a6   : > { %v1476_v60 = vadd.f32 %v1475_v12, %v1411_v21  ;;  %1794 = vmatmul.f32.gmra.mxu0 %v1645_v55  ;;  %v1425_v27 = vpop.f32.mrf.mxu0  ;;  %v1589_v21 = vmul.f32 %v1030_v38, %v1030_v38 }
 0x2a7   : > { %v1426_v49 = vadd.f32 %v1425_v27, %v1360_v48  ;;  %v5686_v27 = vld [vmem:[#allocation51_spill] sm:$0xff] }
 0x2a8   : > { %v1541_v5 = vadd.f32 %v1540_v56, %v1476_v60  ;;  %v5672_v56 = vld [vmem:[#allocation80_spill] sm:$0xff]  ;;  %v906_v60 = vadd.f32 %v5674_v42, %v5673_v36 }
 0x2a9   : > { %v968_v55 = vadd.f32 %v5672_v56, %v903_v15  ;;  %v5689_v56 = vld [vmem:[#allocation81_spill] sm:$0xff] }
 0x2aa   : > { %v1615_v63 = vmul.f32 %v1541_v5, %v1541_v5 }
 0x2ab   : > { %v1543_v41 = vpop.f32.mrf.mxu2  ;;  %v1033_v26 = vadd.f32 %v5675_v3, %v968_v55 }
 0x2ac   : > { %v1647_v4 = vadd.f32 %v1615_v63, %v1583_v57  ;;  %v4868_v57 = vshrl.u32 %v1877_v59, 7 }
 0x2ad   : > { %v1478_v30 = vpop.f32.mrf.mxu1 }
 0x2ae   : > { %v1479_v23 = vadd.f32 %v1478_v30, %v1414_v50  ;;  %1797 = vmatmul.f32.gmra.mxu0 %v1647_v4  ;;  %v1428_v5 = vpop.f32.mrf.mxu0  ;;  %v4871_v50 = vstv %s2697_s29  ;;  %v5678_v30 = vld [vmem:[#allocation7_spill] sm:$0xff]  ;;  %v1879_v48 = vadd.s32 8, %v4868_v57 }
 0x2af   : > { %v912_v45 = vadd.f32 %v5679_v18, %v5678_v30  ;;  %v4879_v62 = vadd.s32 %v4871_v50, %v4868_v57  ;;  %v1880_v30 = vadd.s32 16, %v4868_v57 }
 0x2b0   : > { %v1544_v33 = vadd.f32 %v1543_v41, %v1479_v23  ;;  %v5676_v41 = vld [vmem:[#allocation4_spill] sm:$0xff]  ;;  %v971_v23 = vadd.f32 %v5680_v17, %v906_v60  ;;  %v4902_v38 = vadd.s32 %v4871_v50, %v1879_v48 }
 0x2b1   : > { %v909_v4 = vadd.f32 %v5677_v19, %v5676_v41  ;;  %v1912_v31 = vsub.s32 0, %v4879_v62  ;;  %vm1911_vm1 = vcmp.lt.s32.totalorder %v4879_v62, 0 }
 0x2b2   : > { %v1617_v16 = vmul.f32 %v1544_v33, %v1544_v33  ;;  %v4882_v33 = vpop.f32.mrf.mxu3  ;;  %v1036_v40 = vadd.f32 %v5683_v2, %v971_v23  ;;  %vm1940_vm3 = vcmp.lt.s32.totalorder %v4902_v38, 0  ;;  %v5690_v23 = vld [vmem:[#allocation91_spill] sm:$0xff] }
 0x2b3   : > { %v1546_v52 = vpop.f32.mrf.mxu2  ;;  %v4891_v14 = vsel %vm1911_vm1, %v1912_v31, %v4879_v62 }
 0x2b4   : > { %v1649_v53 = vadd.f32 %v1617_v16, %v1585_v32  ;;  %v1591_v32 = vmul.f32 %v1033_v26, %v1033_v26  ;;  %v5681_v16 = vld [vmem:[#allocation85_spill] sm:$0xff]  ;;  %v1914_v54 = vand.u32 65535, %v4891_v14 }
 0x2b5   : > { %v1481_v51 = vpop.f32.mrf.mxu1 }
 0x2b6   : > { %v1482_v1 = vadd.f32 %v1481_v51, %v1417_v0  ;;  %1800 = vmatmul.f32.gmra.mxu0 %v1649_v53  ;;  %v974_v0 = vadd.f32 %v5681_v16, %v909_v4  ;;  %v1918_v58 = vmul.u32 41943, %v1914_v54  ;;  %v1431_v7 = vpop.f32.mrf.mxu0  ;;  %v1917_v39 = vmul.u32 2622, %v1914_v54 }
 0x2b8   : > { %v1547_v35 = vadd.f32 %v1546_v52, %v1482_v1  ;;  %v5682_v52 = vld [vmem:[#allocation87_spill] sm:$0xff] }
 0x2b9   : > { %v977_v53 = vadd.f32 %v5682_v52, %v912_v45  ;;  %v1922_v45 = vshrl.u32 %v1918_v58, 16 }
 0x2ba   : > { %v1619_v6 = vmul.f32 %v1547_v35, %v1547_v35  ;;  %v4910_v42 = vpop.f32.mrf.mxu3 }
 0x2bb   : > { %v1549_v47 = vpop.f32.mrf.mxu2 }
 0x2bc   : > { %v1651_v13 = vadd.f32 %v1619_v6, %v1587_v37  ;;  %v1915_v37 = vshrl.u32 %v4891_v14, 16  ;;  %v1039_v6 = vadd.f32 %v5684_v22, %v974_v0 }
 0x2bd   : > { %v1484_v10 = vpop.f32.mrf.mxu1 }
 0x2be   : > { %v1485_v24 = vadd.f32 %v1484_v10, %v1420_v11  ;;  %1803 = vmatmul.f32.gmra.mxu0 %v1651_v13  ;;  %v5685_v11 = vld [vmem:[#allocation86_spill] sm:$0xff]  ;;  %v1919_v15 = vmul.u32 2622, %v1915_v37  ;;  %v1920_v59 = vmul.u32 41943, %v1915_v37  ;;  %v1595_v36 = vmul.f32 %v1039_v6, %v1039_v6 }
 0x2bf   : > { %v5687_v13 = vld [vmem:[#allocation78_spill] sm:$0xff] }
 0x2c0   : > { %v1550_v28 = vadd.f32 %v1549_v47, %v1485_v24  ;;  %v1042_v47 = vadd.f32 %v5685_v11, %v977_v53  ;;  %v915_v10 = vadd.f32 %v5687_v13, %v5686_v27  ;;  %v1921_v24 = vshll.u32 %v1918_v58, 16 }
 0x2c1   : > { %v1924_v0 = vshrl.u32 %v1919_v15, 16 }
 0x2c2   : > { %v1621_v12 = vmul.f32 %v1550_v28, %v1550_v28  ;;  %v1593_v28 = vmul.f32 %v1036_v40, %v1036_v40  ;;  %vm1925_vm2 = vc.u32 %v1917_v39, %v1921_v24  ;;  %v4913_v3 = vmul.f32 %v1042_v47, %v1042_v47  ;;  %v4940_v13 = vpop.f32.mrf.mxu3 }
 0x2c3   : > { %v1552_v61 = vpop.f32.mrf.mxu2  ;;  %v980_v31 = vadd.f32 %v5690_v23, %v915_v10 }
 0x2c4   : > { %v1653_v44 = vadd.f32 %v1621_v12, %v1589_v21  ;;  %v5688_v21 = vld [vmem:[#allocation56_spill] sm:$0xff]  ;;  %v1429_v12 = vadd.f32 %v1428_v5, %v4852_v43 }
 0x2c5   : > { %v1487_v25 = vpop.f32.mrf.mxu1  ;;  %v4906_v55 = vadd.f32 %v5689_v56, %v5688_v21 }
 0x2c6   : > { %v1488_v63 = vadd.f32 %v1487_v25, %v1423_v46  ;;  %1806 = vmatmul.f32.gmra.mxu0 %v1653_v44  ;;  %v1941_v46 = vsub.s32 0, %v4902_v38  ;;  %v1923_v44 = vshll.u32 %v1919_v15, 16  ;;  %v1927_v25 = vadd.s32 %v1921_v24, %v1917_v39 }
 0x2c7   : > { %v1881_v39 = vadd.s32 24, %v4868_v57 }
 0x2c8   : > { %v1553_v8 = vadd.f32 %v1552_v61, %v1488_v63  ;;  %v2858_v63 = vmov 0   ;;  %v4919_v43 = vsel %vm1940_vm3, %v1941_v46, %v4902_v38  ;;  %vm1929_vm4 = vc.u32 %v1927_v25, %v1923_v44 }
 0x2c9   : > { %v1926_v41 = vsel %vm1925_vm2, 1, %v2858_v63  ;;  %v1943_v4 = vand.u32 65535, %v4919_v43  ;;  %v1944_v17 = vshrl.u32 %v4919_v43, 16  ;;  %v4946_v46 = vadd.s32 %v4871_v50, %v1881_v39 }
 0x2ca   : > { %v1623_v20 = vmul.f32 %v1553_v8, %v1553_v8  ;;  %v1928_v19 = vadd.s32 %v1926_v41, %v1920_v59  ;;  %v1930_v8 = vsel %vm1929_vm4, 1, %v2858_v63 }
 0x2cb   : > { %v1555_v51 = vpop.f32.mrf.mxu2  ;;  %v1946_v52 = vmul.u32 2622, %v1943_v4  ;;  %v1948_v53 = vmul.u32 2622, %v1944_v17  ;;  %v1949_v48 = vmul.u32 41943, %v1944_v17  ;;  %v1999_v41 = vsub.s32 0, %v4946_v46 }
 0x2cc   : > { %v1655_v34 = vadd.f32 %v1623_v20, %v1591_v32  ;;  %v1932_v32 = vadd.s32 %v1930_v8, %v1928_v19  ;;  %v1947_v20 = vmul.u32 41943, %v1943_v4  ;;  %vm1998_vm8 = vcmp.lt.s32.totalorder %v4946_v46, 0  ;;  %v5691_v8 = vld [vmem:[#allocation90_spill] sm:$0xff] }
 0x2cd   : > { %v1490_v1 = vpop.f32.mrf.mxu1  ;;  %v1953_v59 = vshrl.u32 %v1948_v53, 16  ;;  %v1045_v17 = vadd.f32 %v5691_v8, %v980_v31 }
 0x2ce   : > { %v1491_v35 = vadd.f32 %v1490_v1, %v1426_v49  ;;  %1809 = vmatmul.f32.gmra.mxu0 %v1655_v34  ;;  %v4927_v49 = vadd.s32 %v4871_v50, %v1880_v30  ;;  %v1434_v34 = vpop.f32.mrf.mxu0  ;;  %v1933_v54 = vadd.s32 %v1932_v32, %v1922_v45  ;;  %v1950_v2 = vshll.u32 %v1947_v20, 16 }
 0x2cf   : > { %v1435_v11 = vadd.f32 %v1434_v34, %v4882_v33  ;;  %v1951_v24 = vshrl.u32 %v1947_v20, 16  ;;  %v5692_v20 = vld [vmem:[#allocation95_spill] sm:$0xff] }
 0x2d0   : > { %v1556_v29 = vadd.f32 %v1555_v51, %v1491_v35  ;;  %v1432_v51 = vadd.f32 %v1431_v7, %v4861_v9  ;;  %v1970_v40 = vsub.s32 0, %v4927_v49  ;;  %v1952_v35 = vshll.u32 %v1948_v53, 16 }
 0x2d1   : > { %vm1969_vm5 = vcmp.lt.s32.totalorder %v4927_v49, 0  ;;  %v1934_v58 = vadd.s32 %v1933_v54, %v1924_v0  ;;  %vm1954_vm6 = vc.u32 %v1946_v52, %v1950_v2  ;;  %v1956_v22 = vadd.s32 %v1950_v2, %v1946_v52  ;;  %v4961_v54 = vpop.f32.mrf.mxu3 }
 0x2d2   : > { %v1625_v61 = vmul.f32 %v1556_v29, %v1556_v29  ;;  %v4935_v6 = vsel %vm1969_vm5, %v1970_v40, %v4927_v49  ;;  %v1955_v47 = vsel %vm1954_vm6, 1, %v2858_v63 }
 0x2d3   : > { %v1558_v60 = vpop.f32.mrf.mxu2  ;;  %v1972_v27 = vand.u32 65535, %v4935_v6  ;;  %v1935_v7 = vshrl.u32 %v1934_v58, 6  ;;  %v1957_v29 = vadd.s32 %v1955_v47, %v1949_v48  ;;  %vm1958_vm7 = vc.u32 %v1956_v22, %v1952_v35  ;;  %v5693_v58 = vld [vmem:[#allocation94_spill] sm:$0xff] }
 0x2d4   : > { %v1657_v26 = vadd.f32 %v1625_v61, %v1593_v28  ;;  %v1959_v28 = vsel %vm1958_vm7, 1, %v2858_v63  ;;  %v1973_v21 = vshrl.u32 %v4935_v6, 16  ;;  %v1599_v48 = vmul.f32 %v1045_v17, %v1045_v17 }
 0x2d5   : > { %v1493_v5 = vpop.f32.mrf.mxu1  ;;  %v1936_v33 = vmul.u32 100, %v1935_v7  ;;  %v1961_v56 = vadd.s32 %v1959_v28, %v1957_v29  ;;  %v1975_v44 = vmul.u32 2622, %v1972_v27  ;;  %v1882_v29 = vadd.s32 32, %v4868_v57 }
 0x2d6   : > { %v1494_v18 = vadd.f32 %v1493_v5, %v1429_v12  ;;  %1812 = vmatmul.f32.gmra.mxu0 %v1657_v26  ;;  %v1976_v12 = vmul.u32 41943, %v1972_v27  ;;  %v1978_v19 = vmul.u32 41943, %v1973_v21  ;;  %v1437_v34 = vpop.f32.mrf.mxu0 }
 0x2d7   : > { %v1962_v25 = vadd.s32 %v1961_v56, %v1951_v24  ;;  %v4977_v62 = vadd.s32 %v4871_v50, %v1882_v29 }
 0x2d8   : > { %v1559_v16 = vadd.f32 %v1558_v60, %v1494_v18  ;;  %v1937_v60 = vsub.s32 %v4891_v14, %v1936_v33  ;;  %v1979_v26 = vshll.u32 %v1976_v12, 16  ;;  %v4957_v14 = vsel %vm1998_vm8, %v1999_v41, %v4946_v46 }
 0x2d9   : > { %v1963_v18 = vadd.s32 %v1962_v25, %v1953_v59  ;;  %v1980_v2 = vshrl.u32 %v1976_v12, 16  ;;  %v2002_v47 = vshrl.u32 %v4957_v14, 16  ;;  %v1883_v25 = vadd.s32 40, %v4868_v57 }
 0x2da   : > { %v1627_v1 = vmul.f32 %v1559_v16, %v1559_v16  ;;  %vm1983_vm9 = vc.u32 %v1975_v44, %v1979_v26  ;;  %v1985_v45 = vadd.s32 %v1979_v26, %v1975_v44  ;;  %v983_v16 = vadd.f32 %v5692_v20, %v4906_v55 }
 0x2db   : > { %v1561_v37 = vpop.f32.mrf.mxu2  ;;  %v1984_v32 = vsel %vm1983_vm9, 1, %v2858_v63  ;;  %v1964_v52 = vshrl.u32 %v1963_v18, 6  ;;  %v1938_v31 = vsub.s32 0, %v1937_v60  ;;  %v2006_v24 = vmul.u32 2622, %v2002_v47 }
 0x2dc   : > { %v1659_v9 = vadd.f32 %v1627_v1, %v1595_v36  ;;  %v1977_v36 = vmul.u32 2622, %v1973_v21  ;;  %v1986_v53 = vadd.s32 %v1984_v32, %v1978_v19  ;;  %v2001_v1 = vand.u32 65535, %v4957_v14 }
 0x2dd   : > { %v1496_v10 = vpop.f32.mrf.mxu1  ;;  %v1048_v22 = vadd.f32 %v5693_v58, %v983_v16  ;;  %v4972_v39 = vsel %vm1911_vm1, %v1938_v31, %v1937_v60  ;;  %v2010_v59 = vshll.u32 %v2006_v24, 16  ;;  %vm2027_vm15 = vcmp.lt.s32.totalorder %v4977_v62, 0 }
 0x2de   : > { %v1497_v15 = vadd.f32 %v1496_v10, %v1432_v51  ;;  %1815 = vmatmul.f32.gmra.mxu0 %v1659_v9  ;;  %v1981_v4 = vshll.u32 %v1977_v36, 16  ;;  %v1438_v9 = vadd.f32 %v1437_v34, %v4910_v42  ;;  %v2005_v7 = vmul.u32 41943, %v2001_v1 }
 0x2df   : > { %v1601_v42 = vmul.f32 %v1048_v22, %v1048_v22  ;;  %vm2375_vm11 = vcmp.ne.s32.totalorder %v4972_v39, 0  ;;  %vm2391_vm12 = vcmp.lt.s32.totalorder %v4972_v39, 0  ;;  %v4981_v41 = vadd.s32 100, %v4972_v39 }
 0x2e0   : > { %v1562_v61 = vadd.f32 %v1561_v37, %v1497_v15  ;;  %vm1987_vm10 = vc.u32 %v1985_v45, %v1981_v4  ;;  %v1982_v37 = vshrl.u32 %v1977_v36, 16  ;;  %v2004_v15 = vmul.u32 2622, %v2001_v1  ;;  %v4988_v4 = vpop.f32.mrf.mxu3  ;;  %vm4997_vm0 = vmand %vm2391_vm12, %vm2375_vm11 }
 0x2e1   : > { %v1988_v40 = vsel %vm1987_vm10, 1, %v2858_v63  ;;  %v2008_v56 = vshll.u32 %v2005_v7, 16  ;;  %v2009_v18 = vshrl.u32 %v2005_v7, 16  ;;  %v2011_v20 = vshrl.u32 %v2006_v24, 16 }
 0x2e2   : > { %v1629_v5 = vmul.f32 %v1562_v61, %v1562_v61  ;;  %v1990_v55 = vadd.s32 %v1988_v40, %v1986_v53  ;;  %v2007_v61 = vmul.u32 41943, %v2002_v47  ;;  %v1884_v58 = vadd.s32 48, %v4868_v57 }
 0x2e3   : > { %v1564_v30 = vpop.f32.mrf.mxu2  ;;  %vm2012_vm13 = vc.u32 %v2004_v15, %v2008_v56  ;;  %v2014_v60 = vadd.s32 %v2008_v56, %v2004_v15 }
 0x2e4   : > { %v1661_v23 = vadd.f32 %v1629_v5, %v4913_v3  ;;  %v1965_v3 = vmul.u32 100, %v1964_v52  ;;  %v1991_v10 = vadd.s32 %v1990_v55, %v1980_v2  ;;  %v2013_v19 = vsel %vm2012_vm13, 1, %v2858_v63 }
 0x2e5   : > { %v1499_v0 = vpop.f32.mrf.mxu1  ;;  %v2015_v45 = vadd.s32 %v2013_v19, %v2007_v61  ;;  %vm2016_vm14 = vc.u32 %v2014_v60, %v2010_v59 }
 0x2e6   : > { %v1500_v51 = vadd.f32 %v1499_v0, %v1435_v11  ;;  %1818 = vmatmul.f32.gmra.mxu0 %v1661_v23  ;;  %v1966_v11 = vsub.s32 %v4919_v43, %v1965_v3  ;;  %v1992_v33 = vadd.s32 %v1991_v10, %v1982_v37  ;;  %v2017_v17 = vsel %vm2016_vm14, 1, %v2858_v63 }
 0x2e7   : > { %v2028_v23 = vsub.s32 0, %v4977_v62  ;;  %v2019_v16 = vadd.s32 %v2017_v17, %v2015_v45  ;;  %v5003_v0 = vadd.s32 %v4871_v50, %v1883_v25 }
 0x2e8   : > { %v1565_v35 = vadd.f32 %v1564_v30, %v1500_v51  ;;  %v1967_v21 = vsub.s32 0, %v1966_v11  ;;  %v1993_v36 = vshrl.u32 %v1992_v33, 6  ;;  %v5036_v10 = vpop.f32.mrf.mxu3 }
 0x2e9   : > { %v5008_v53 = vsel %vm2027_vm15, %v2028_v23, %v4977_v62  ;;  %v2020_v34 = vadd.s32 %v2019_v16, %v2009_v18  ;;  %vm2056_vm2 = vcmp.lt.s32.totalorder %v5003_v0, 0  ;;  %v2057_v2 = vsub.s32 0, %v5003_v0 }
 0x2ea   : > { %v1631_v27 = vmul.f32 %v1565_v35, %v1565_v35  ;;  %v4985_v5 = vsel %vm1940_vm3, %v1967_v21, %v1966_v11  ;;  %v1994_v30 = vmul.u32 100, %v1993_v36  ;;  %v2030_v31 = vand.u32 65535, %v5008_v53 }
 0x2eb   : > { %v1567_v43 = vpop.f32.mrf.mxu2  ;;  %v2031_v3 = vshrl.u32 %v5008_v53, 16  ;;  %vm2376_vm1 = vcmp.ne.s32.totalorder %v4985_v5, 0  ;;  %v2021_v1 = vadd.s32 %v2020_v34, %v2011_v20  ;;  %vm2392_vm3 = vcmp.lt.s32.totalorder %v4985_v5, 0 }
 0x2ec   : > { %v1663_v28 = vadd.f32 %v1631_v27, %v1599_v48  ;;  %v1995_v32 = vsub.s32 %v4935_v6, %v1994_v30  ;;  %v2439_v6 = vsel %vm4997_vm0, %v4981_v41, %v4972_v39  ;;  %v2033_v48 = vmul.u32 2622, %v2030_v31  ;;  %vm5050_vm9 = vmand %vm2392_vm3, %vm2376_vm1 }
 0x2ed   : > { %v1502_v12 = vpop.f32.mrf.mxu1  ;;  %v2034_v35 = vmul.u32 41943, %v2030_v31  ;;  %v2424_v37 = vadd.s32 100, %v4985_v5  ;;  %v2035_v55 = vmul.u32 2622, %v2031_v3  ;;  %v2022_v22 = vshrl.u32 %v2021_v1, 6 }
 0x2ee   : > { %v1503_v44 = vadd.f32 %v1502_v12, %v1438_v9  ;;  %1821 = vmatmul.f32.gmra.mxu0 %v1663_v28  ;;  %v1996_v51 = vsub.s32 0, %v1995_v32  ;;  %v2036_v9 = vmul.u32 41943, %v2031_v3  ;;  %v5034_v27 = vsel %vm2056_vm2, %v2057_v2, %v5003_v0 }
 0x2ef   : > { %v2037_v11 = vshll.u32 %v2034_v35, 16  ;;  %v2039_v47 = vshll.u32 %v2035_v55, 16  ;;  %v2023_v29 = vmul.u32 100, %v2022_v22  ;;  %v2038_v39 = vshrl.u32 %v2034_v35, 16 }
 0x2f0   : > { %v1568_v26 = vadd.f32 %v1567_v43, %v1503_v44  ;;  %v5021_v40 = vsel %vm1969_vm5, %v1996_v51, %v1995_v32  ;;  %v2059_v21 = vand.u32 65535, %v5034_v27  ;;  %v2060_v33 = vshrl.u32 %v5034_v27, 16  ;;  %v5083_v3 = vpop.f32.mrf.mxu3 }
 0x2f1   : > { %vm2377_vm4 = vcmp.ne.s32.totalorder %v5021_v40, 0  ;;  %vm2393_vm6 = vcmp.lt.s32.totalorder %v5021_v40, 0  ;;  %v5029_v49 = vadd.s32 100, %v5021_v40  ;;  %vm2041_vm5 = vc.u32 %v2033_v48, %v2037_v11 }
 0x2f2   : > { %v1633_v8 = vmul.f32 %v1568_v26, %v1568_v26  ;;  %v2043_v15 = vadd.s32 %v2037_v11, %v2033_v48  ;;  %v2042_v28 = vsel %vm2041_vm5, 1, %v2858_v63  ;;  %v2024_v56 = vsub.s32 %v4957_v14, %v2023_v29  ;;  %vm5059_vm10 = vmand %vm2393_vm6, %vm2377_vm4 }
 0x2f3   : > { %v5044_v12 = vadd.s32 %v4871_v50, %v1884_v58  ;;  %v2062_v59 = vmul.u32 2622, %v2059_v21  ;;  %v2063_v44 = vmul.u32 41943, %v2059_v21  ;;  %v2040_v36 = vshrl.u32 %v2035_v55, 16 }
 0x2f4   : > { %v1665_v52 = vadd.f32 %v1633_v8, %v1601_v42  ;;  %v2044_v42 = vadd.s32 %v2042_v28, %v2036_v9  ;;  %vm2045_vm7 = vc.u32 %v2043_v15, %v2039_v47  ;;  %v2064_v25 = vmul.u32 2622, %v2060_v33 }
 0x2f5   : > { %v2046_v61 = vsel %vm2045_vm7, 1, %v2858_v63  ;;  %v2025_v26 = vsub.s32 0, %v2024_v56  ;;  %v2065_v41 = vmul.u32 41943, %v2060_v33  ;;  %v2066_v19 = vshll.u32 %v2063_v44, 16 }
 0x2f6   : > { %1824 = vmatmul.f32.gmra.mxu0 %v1665_v52  ;;  %v2048_v60 = vadd.s32 %v2046_v61, %v2044_v42  ;;  %vm5063_vm11 = vcmp.lt.s32.totalorder %v2439_v6, 48  ;;  %v2440_v18 = vsel %vm5050_vm9, %v2424_v37, %v4985_v5  ;;  %v2068_v8 = vshll.u32 %v2064_v25, 16 }
 0x2f7   : > { %v2441_v17 = vsel %vm5059_vm10, %v5029_v49, %v5021_v40  ;;  %v2067_v23 = vshrl.u32 %v2063_v44, 16  ;;  %vm2070_vm12 = vc.u32 %v2062_v59, %v2066_v19  ;;  %vm2085_vm13 = vcmp.lt.s32.totalorder %v5044_v12, 0 }
 0x2f8   : > { %v2049_v45 = vadd.s32 %v2048_v60, %v2038_v39  ;;  %v2071_v20 = vsel %vm2070_vm12, 1, %v2858_v63  ;;  %v2072_v16 = vadd.s32 %v2066_v19, %v2062_v59  ;;  %v2086_v52 = vsub.s32 0, %v5044_v12 }
 0x2f9   : > { %v5080_v51 = vsel %vm1998_vm8, %v2025_v26, %v2024_v56  ;;  %v2073_v34 = vadd.s32 %v2071_v20, %v2065_v41  ;;  %v1885_v31 = vadd.s32 56, %v4868_v57  ;;  %v2069_v2 = vshrl.u32 %v2064_v25, 16 }
 0x2fa   : > { %v2050_v32 = vadd.s32 %v2049_v45, %v2040_v36  ;;  %vm2074_vm14 = vc.u32 %v2072_v16, %v2068_v8  ;;  %v5088_v1 = vsel %vm2085_vm13, %v2086_v52, %v5044_v12  ;;  %vm5090_vm0 = vcmp.lt.s32.totalorder %v2440_v18, 48 }
 0x2fb   : > { %v1780_v7 = vpop.f32.mrf.mxu0  ;;  %v2075_v35 = vsel %vm2074_vm14, 1, %v2858_v63  ;;  %v2088_v37 = vand.u32 65535, %v5088_v1  ;;  %v2089_v55 = vshrl.u32 %v5088_v1, 16  ;;  %v5098_v11 = vadd.s32 %v4871_v50, %v1885_v31 }
 0x2fc   : > { %v1781_v24 = vadd.f32 %v1780_v7, %v4940_v13  ;;  %v2051_v6 = vshrl.u32 %v2050_v32, 6  ;;  %v2077_v9 = vadd.s32 %v2075_v35, %v2073_v34  ;;  %vm2378_vm8 = vcmp.ne.s32.totalorder %v5080_v51, 0 }
 0x2fd   : > { %v2091_v47 = vmul.u32 2622, %v2088_v37  ;;  %v2092_v7 = vmul.u32 41943, %v2088_v37  ;;  %v2093_v29 = vmul.u32 2622, %v2089_v55  ;;  %vm2394_vm1 = vcmp.lt.s32.totalorder %v5080_v51, 0 }
 0x2fe   : > { %v1828_v43 = vmax.f32 %v1781_v24, 1.1920929e-07  ;;  %v2052_v22 = vmul.u32 100, %v2051_v6  ;;  %v2078_v24 = vadd.s32 %v2077_v9, %v2067_v23  ;;  %v2094_v21 = vmul.u32 41943, %v2089_v55  ;;  %vm5128_vm5 = vmand %vm2394_vm1, %vm2378_vm8 }
 0x2ff   : > { %v2095_v33 = vshll.u32 %v2092_v7, 16  ;;  %v2097_v13 = vshll.u32 %v2093_v29, 16  ;;  %vm2114_vm3 = vcmp.lt.s32.totalorder %v5098_v11, 0  ;;  %v2115_v25 = vsub.s32 0, %v5098_v11 }
 0x300   : > { %2754 = vlog2.f32 %v1828_v43  ;;  %v2053_v15 = vsub.s32 %v5008_v53, %v2052_v22  ;;  %v2079_v43 = vadd.s32 %v2078_v24, %v2069_v2  ;;  %v2426_v19 = vadd.s32 100, %v5080_v51 }
 0x301   : > { %vm2099_vm4 = vc.u32 %v2091_v47, %v2095_v33  ;;  %v2101_v59 = vadd.s32 %v2095_v33, %v2091_v47  ;;  %v2096_v30 = vshrl.u32 %v2092_v7, 16  ;;  %v2098_v16 = vshrl.u32 %v2093_v29, 16 }
 0x302   : > { %v2054_v42 = vsub.s32 0, %v2053_v15  ;;  %v2080_v36 = vshrl.u32 %v2079_v43, 6  ;;  %v2100_v60 = vsel %vm2099_vm4, 1, %v2858_v63  ;;  %v1887_v0 = vadd.s32 72, %v4868_v57 }
 0x303   : > { %v1783_v38 = vpop.f32.mrf.mxu0  ;;  %v2102_v62 = vadd.s32 %v2100_v60, %v2094_v21 }
 0x304   : > { %v1784_v5 = vadd.f32 %v1783_v38, %v4961_v54  ;;  %v5115_v44 = vsel %vm2027_vm15, %v2054_v42, %v2053_v15  ;;  %v2081_v45 = vmul.u32 100, %v2080_v36  ;;  %vm2103_vm15 = vc.u32 %v2101_v59, %v2097_v13 }
 0x305   : > { %vm2379_vm6 = vcmp.ne.s32.totalorder %v5115_v44, 0  ;;  %vm2395_vm7 = vcmp.lt.s32.totalorder %v5115_v44, 0  ;;  %v2104_v23 = vsel %vm2103_vm15, 1, %v2858_v63  ;;  %v5137_v38 = vsel %vm2114_vm3, %v2115_v25, %v5098_v11 }
 0x306   : > { %v2755_v48 = vpop.eup %2754  ;;  %v1829_v54 = vmax.f32 %v1784_v5, 1.1920929e-07  ;;  %v2082_v20 = vsub.s32 %v5034_v27, %v2081_v45  ;;  %v2106_v52 = vadd.s32 %v2104_v23, %v2102_v62  ;;  %v2427_v34 = vadd.s32 100, %v5115_v44  ;;  %vm5150_vm9 = vmand %vm2395_vm7, %vm2379_vm6 }
 0x307   : > { %v1845_v58 = vmul.f32 0.6931472, %v2755_v48  ;;  %v2117_v31 = vand.u32 65535, %v5137_v38  ;;  %v2118_v6 = vshrl.u32 %v5137_v38, 16  ;;  %v2442_v48 = vsel %vm5128_vm5, %v2426_v19, %v5080_v51 }
 0x308   : > { %2756 = vlog2.f32 %v1829_v54  ;;  %v2083_v27 = vsub.s32 0, %v2082_v20  ;;  %v2107_v46 = vadd.s32 %v2106_v52, %v2096_v30  ;;  %vm5171_vm12 = vcmp.lt.s32.totalorder %v2442_v48, 48 }
 0x309   : > { %v2503_v39 = vsel %vm5063_vm11, %v1845_v58, 0.0  ;;  %vm5159_vm11 = vcmp.lt.s32.totalorder %v2441_v17, 48  ;;  %v2121_v55 = vmul.u32 41943, %v2117_v31  ;;  %v2120_v9 = vmul.u32 2622, %v2117_v31 }
 0x30a   : > { %v2698_v28 = vadd.f32 7.8449516, %v2503_v39  ;;  %v5166_v58 = vsel %vm2056_vm2, %v2083_v27, %v2082_v20  ;;  %v2108_v22 = vadd.s32 %v2107_v46, %v2098_v16  ;;  %v5168_v47 = vmul.u32 2622, %v2118_v6 }
 0x30b   : > { %v1786_v56 = vpop.f32.mrf.mxu0  ;;  %v2443_v49 = vsel %vm5150_vm9, %v2427_v34, %v5115_v44  ;;  %v2123_v39 = vmul.u32 41943, %v2118_v6  ;;  %v2124_v15 = vshll.u32 %v2121_v55, 16  ;;  %vm2380_vm2 = vcmp.ne.s32.totalorder %v5166_v58, 0 }
 0x30c   : > { %v2535_v61 = vmul.f32 0.5978655, %v2698_v28  ;;  %v1787_v53 = vadd.f32 %v1786_v56, %v4988_v4  ;;  %v5122_v4 = vpop.f32.mrf.mxu3  ;;  %v2109_v29 = vshrl.u32 %v2108_v22, 6  ;;  %vm2396_vm10 = vcmp.lt.s32.totalorder %v5166_v58, 0 }
 0x30d   : > { %v2126_v24 = vshll.u32 %v5168_v47, 16  ;;  %v2428_v33 = vadd.s32 100, %v5166_v58  ;;  %vm2128_vm14 = vc.u32 %v2120_v9, %v2124_v15  ;;  %v2130_v13 = vadd.s32 %v2124_v15, %v2120_v9  ;;  %vm5212_vm4 = vmand %vm2396_vm10, %vm2380_vm2 }
 0x30e   : > { %v2757_v26 = vpop.eup %2756  ;;  %2551 = vst [vmem:[%s5109_s21] sm:$0xff] %v2535_v61  ;;  %v1830_v41 = vmax.f32 %v1787_v53, 1.1920929e-07  ;;  %v2110_v56 = vmul.u32 100, %v2109_v29  ;;  %v2129_v43 = vsel %vm2128_vm14, 1, %v2858_v63  ;;  %v2125_v44 = vshrl.u32 %v2121_v55, 16 }
 0x30f   : > { %v1847_v18 = vmul.f32 0.6931472, %v2757_v26  ;;  %v2131_v36 = vadd.s32 %v2129_v43, %v2123_v39  ;;  %v5194_v60 = vadd.s32 %v4871_v50, %v1887_v0  ;;  %v2127_v19 = vshrl.u32 %v5168_v47, 16 }
 0x310   : > { %2758 = vlog2.f32 %v1830_v41  ;;  %v2111_v59 = vsub.s32 %v5088_v1, %v2110_v56  ;;  %vm5202_vm1 = vcmp.lt.s32.totalorder %v2443_v49, 48  ;;  %v1888_v23 = vadd.s32 80, %v4868_v57 }
 0x311   : > { %v2504_v32 = vsel %vm5090_vm0, %v1847_v18, 0.0  ;;  %vm2132_vm0 = vc.u32 %v2130_v13, %v2126_v24  ;;  %vm2172_vm6 = vcmp.lt.s32.totalorder %v5194_v60, 0  ;;  %v2444_v54 = vsel %vm5212_vm4, %v2428_v33, %v5166_v58 }
 0x312   : > { %v2699_v5 = vadd.f32 7.8449516, %v2504_v32  ;;  %v2112_v41 = vsub.s32 0, %v2111_v59  ;;  %v2133_v30 = vsel %vm2132_vm0, 1, %v2858_v63  ;;  %v5248_v46 = vadd.s32 %v4871_v50, %v1888_v23 }
 0x313   : > { %v1789_v2 = vpop.f32.mrf.mxu0  ;;  %v2135_v8 = vadd.s32 %v2133_v30, %v2131_v36  ;;  %v5253_v9 = vadd.s32 88, %v4868_v57  ;;  %vm5262_vm7 = vcmp.lt.s32.totalorder %v2444_v54, 48 }
 0x314   : > { %v2536_v35 = vmul.f32 0.5978655, %v2699_v5  ;;  %v1790_v51 = vadd.f32 %v1789_v2, %v5036_v10  ;;  %v1886_v10 = vadd.s32 64, %v4868_v57  ;;  %v5183_v28 = vpop.f32.mrf.mxu3  ;;  %v5218_v16 = vsel %vm2085_vm13, %v2112_v41, %v2111_v59 }
 0x315   : > { %vm2381_vm15 = vcmp.ne.s32.totalorder %v5218_v16, 0  ;;  %vm2397_vm5 = vcmp.lt.s32.totalorder %v5218_v16, 0  ;;  %v5229_v5 = vadd.s32 100, %v5218_v16  ;;  %v2136_v31 = vadd.s32 %v2135_v8, %v2125_v44 }
 0x316   : > { %v2759_v7 = vpop.eup %2758  ;;  %2552 = vst [vmem:[%s5109_s21 + $0x8] sm:$0xff] %v2536_v35  ;;  %v1831_v14 = vmax.f32 %v1790_v51, 1.1920929e-07  ;;  %v5190_v61 = vadd.s32 %v4871_v50, %v1886_v10  ;;  %vm5233_vm13 = vmand %vm2397_vm5, %vm2381_vm15 }
 0x317   : > { %v1849_v17 = vmul.f32 0.6931472, %v2759_v7  ;;  %v2137_v51 = vadd.s32 %v2136_v31, %v2127_v19  ;;  %v2445_v7 = vsel %vm5233_vm13, %v5229_v5, %v5218_v16 }
 0x318   : > { %2760 = vlog2.f32 %v1831_v14  ;;  %vm2143_vm8 = vcmp.lt.s32.totalorder %v5190_v61, 0  ;;  %v2144_v18 = vsub.s32 0, %v5190_v61 }
 0x319   : > { %v2505_v21 = vsel %vm5159_vm11, %v1849_v17, 0.0  ;;  %v2138_v40 = vshrl.u32 %v2137_v51, 6 }
 0x31a   : > { %v2700_v42 = vadd.f32 7.8449516, %v2505_v21  ;;  %v5223_v52 = vsel %vm2143_vm8, %v2144_v18, %v5190_v61 }
 0x31b   : > { %v1792_v53 = vpop.f32.mrf.mxu0  ;;  %v2146_v6 = vand.u32 65535, %v5223_v52  ;;  %v2147_v2 = vshrl.u32 %v5223_v52, 16  ;;  %v2139_v33 = vmul.u32 100, %v2138_v40 }
 0x31c   : > { %v2537_v25 = vmul.f32 0.5978655, %v2700_v42  ;;  %v1793_v26 = vadd.f32 %v1792_v53, %v5083_v3  ;;  %v2173_v3 = vsub.s32 0, %v5194_v60  ;;  %v5250_v35 = vpop.f32.mrf.mxu3 }
 0x31d   : > { %v2149_v55 = vmul.u32 2622, %v2146_v6  ;;  %v2150_v22 = vmul.u32 41943, %v2146_v6  ;;  %v2151_v14 = vmul.u32 2622, %v2147_v2  ;;  %v2152_v49 = vmul.u32 41943, %v2147_v2 }
 0x31e   : > { %v2761_v45 = vpop.eup %2760  ;;  %2553 = vst [vmem:[%s5109_s21 + $0x10] sm:$0xff] %v2537_v25  ;;  %v1832_v1 = vmax.f32 %v1793_v26, 1.1920929e-07  ;;  %v5245_v27 = vsel %vm2172_vm6, %v2173_v3, %v5194_v60  ;;  %v2140_v59 = vsub.s32 %v5137_v38, %v2139_v33 }
 0x31f   : > { %v1851_v32 = vmul.f32 0.6931472, %v2761_v45  ;;  %v2153_v10 = vshll.u32 %v2150_v22, 16  ;;  %v2175_v0 = vand.u32 65535, %v5245_v27  ;;  %v2154_v15 = vshrl.u32 %v2150_v22, 16 }
 0x320   : > { %2762 = vlog2.f32 %v1832_v1  ;;  %v2176_v24 = vshrl.u32 %v5245_v27, 16  ;;  %v2141_v19 = vsub.s32 0, %v2140_v59  ;;  %v2156_v30 = vshrl.u32 %v2151_v14, 16 }
 0x321   : > { %v2506_v12 = vsel %vm5171_vm12, %v1851_v32, 0.0  ;;  %vm2157_vm9 = vc.u32 %v2149_v55, %v2153_v10  ;;  %v2159_v56 = vadd.s32 %v2153_v10, %v2149_v55  ;;  %v2178_v43 = vmul.u32 2622, %v2175_v0 }
 0x322   : > { %v2701_v48 = vadd.f32 7.8449516, %v2506_v12  ;;  %v2158_v42 = vsel %vm2157_vm9, 1, %v2858_v63  ;;  %v2179_v13 = vmul.u32 41943, %v2175_v0  ;;  %v2180_v26 = vmul.u32 2622, %v2176_v24 }
 0x323   : > { %v1795_v37 = vpop.f32.mrf.mxu0  ;;  %v2160_v44 = vadd.s32 %v2158_v42, %v2152_v49  ;;  %vm2201_vm12 = vcmp.lt.s32.totalorder %v5248_v46, 0  ;;  %v2181_v8 = vmul.u32 41943, %v2176_v24  ;;  %v2142_v23 = vsel %vm2114_vm3, %v2141_v19, %v2140_v59 }
 0x324   : > { %v2538_v47 = vmul.f32 0.5978655, %v2701_v48  ;;  %v1796_v58 = vadd.f32 %v1795_v37, %v5122_v4  ;;  %v2155_v4 = vshll.u32 %v2151_v14, 16  ;;  %v2182_v45 = vshll.u32 %v2179_v13, 16  ;;  %v5274_v38 = vpop.f32.mrf.mxu3 }
 0x325   : > { %v2184_v3 = vshll.u32 %v2180_v26, 16  ;;  %vm2382_vm10 = vcmp.ne.s32.totalorder %v2142_v23, 0  ;;  %vm2398_vm14 = vcmp.lt.s32.totalorder %v2142_v23, 0  ;;  %v2430_v12 = vadd.s32 100, %v2142_v23 }
 0x326   : > { %v2763_v17 = vpop.eup %2762  ;;  %2554 = vst [vmem:[%s5109_s21 + $0x18] sm:$0xff] %v2538_v47  ;;  %v1833_v29 = vmax.f32 %v1796_v58, 1.1920929e-07  ;;  %vm2161_vm11 = vc.u32 %v2159_v56, %v2155_v4  ;;  %vm2186_vm2 = vc.u32 %v2178_v43, %v2182_v45  ;;  %v2188_v20 = vadd.s32 %v2182_v45, %v2178_v43 }
 0x327   : > { %v1853_v21 = vmul.f32 0.6931472, %v2763_v17  ;;  %v2162_v25 = vsel %vm2161_vm11, 1, %v2858_v63  ;;  %v2183_v11 = vshrl.u32 %v2179_v13, 16  ;;  %vm5287_vm3 = vcmp.lt.s32.totalorder %v2445_v7, 48 }
 0x328   : > { %2764 = vlog2.f32 %v1833_v29  ;;  %v2164_v18 = vadd.s32 %v2162_v25, %v2160_v44  ;;  %vm2190_vm0 = vc.u32 %v2188_v20, %v2184_v3  ;;  %v2202_v55 = vsub.s32 0, %v5248_v46 }
 0x329   : > { %v2507_v53 = vsel %vm5202_vm1, %v1853_v21, 0.0  ;;  %vm5280_vm1 = vmand %vm2398_vm14, %vm2382_vm10  ;;  %v2191_v48 = vsel %vm2190_vm0, 1, %v2858_v63  ;;  %v2185_v47 = vshrl.u32 %v2180_v26, 16  ;;  %v5294_v14 = vadd.s32 %v4871_v50, %v5253_v9 }
 0x32a   : > { %v2702_v36 = vadd.f32 7.8449516, %v2507_v53  ;;  %v2165_v32 = vadd.s32 %v2164_v18, %v2154_v15  ;;  %v2446_v49 = vsel %vm5280_vm1, %v2430_v12, %v2142_v23  ;;  %v5301_v7 = vsel %vm2201_vm12, %v2202_v55, %v5248_v46 }
 0x32b   : > { %v1798_v41 = vpop.f32.mrf.mxu0  ;;  %v1890_v0 = vadd.s32 96, %v4868_v57  ;;  %v2204_v15 = vand.u32 65535, %v5301_v7  ;;  %v2205_v4 = vshrl.u32 %v5301_v7, 16  ;;  %vm2230_vm4 = vcmp.lt.s32.totalorder %v5294_v14, 0 }
 0x32c   : > { %v2539_v1 = vmul.f32 0.5978655, %v2702_v36  ;;  %v1799_v62 = vadd.f32 %v1798_v41, %v5183_v28  ;;  %v2166_v31 = vadd.s32 %v2165_v32, %v2156_v30  ;;  %v2187_v28 = vsel %vm2186_vm2, 1, %v2858_v63  ;;  %v1742_v13 = vpop.f32.mrf.mxu3 }
 0x32d   : > { %v2189_v2 = vadd.s32 %v2187_v28, %v2181_v8  ;;  %v5310_v24 = vadd.s32 104, %v4868_v57  ;;  %vm5313_vm15 = vcmp.lt.s32.totalorder %v2446_v49, 48  ;;  %v2208_v42 = vmul.u32 41943, %v2204_v15 }
 0x32e   : > { %v2765_v16 = vpop.eup %2764  ;;  %2555 = vst [vmem:[%s5109_s21 + $0x20] sm:$0xff] %v2539_v1  ;;  %v1834_v5 = vmax.f32 %v1799_v62, 1.1920929e-07  ;;  %v2167_v51 = vshrl.u32 %v2166_v31, 6  ;;  %v2231_v43 = vsub.s32 0, %v5294_v14  ;;  %v2207_v59 = vmul.u32 2622, %v2204_v15 }
 0x32f   : > { %v1855_v34 = vmul.f32 0.6931472, %v2765_v16  ;;  %v2193_v58 = vadd.s32 %v2191_v48, %v2189_v2  ;;  %v2209_v44 = vmul.u32 2622, %v2205_v4  ;;  %v2210_v25 = vmul.u32 41943, %v2205_v4 }
 0x330   : > { %2766 = vlog2.f32 %v1834_v5  ;;  %v2168_v10 = vmul.u32 100, %v2167_v51  ;;  %v2211_v26 = vshll.u32 %v2208_v42, 16  ;;  %v2212_v30 = vshrl.u32 %v2208_v42, 16 }
 0x331   : > { %v2508_v54 = vsel %vm5262_vm7, %v1855_v34, 0.0  ;;  %v2194_v39 = vadd.s32 %v2193_v58, %v2183_v11  ;;  %v2213_v18 = vshll.u32 %v2209_v44, 16  ;;  %v5329_v61 = vsel %vm2230_vm4, %v2231_v43, %v5294_v14 }
 0x332   : > { %v2703_v22 = vadd.f32 7.8449516, %v2508_v54  ;;  %v2169_v9 = vsub.s32 %v5223_v52, %v2168_v10  ;;  %vm2215_vm9 = vc.u32 %v2207_v59, %v2211_v26  ;;  %v2217_v23 = vadd.s32 %v2211_v26, %v2207_v59 }
 0x333   : > { %v1801_v40 = vpop.f32.mrf.mxu0  ;;  %v2216_v5 = vsel %vm2215_vm9, 1, %v2858_v63  ;;  %v2214_v34 = vshrl.u32 %v2209_v44, 16  ;;  %v2233_v2 = vand.u32 65535, %v5329_v61  ;;  %v2234_v48 = vshrl.u32 %v5329_v61, 16 }
 0x334   : > { %v2540_v17 = vmul.f32 0.5978655, %v2703_v22  ;;  %v1802_v29 = vadd.f32 %v1801_v40, %v5250_v35  ;;  %v2195_v35 = vadd.s32 %v2194_v39, %v2185_v47  ;;  %v2170_v53 = vsub.s32 0, %v2169_v9  ;;  %v1745_v47 = vpop.f32.mrf.mxu3 }
 0x335   : > { %v2218_v31 = vadd.s32 %v2216_v5, %v2210_v25  ;;  %v2238_v55 = vmul.u32 2622, %v2234_v48  ;;  %v5345_v22 = vadd.s32 %v4871_v50, %v1890_v0  ;;  %v2236_v10 = vmul.u32 2622, %v2233_v2 }
 0x336   : > { %v2767_v21 = vpop.eup %2766  ;;  %2556 = vst [vmem:[%s5109_s21 + $0x28] sm:$0xff] %v2540_v17  ;;  %v1835_v33 = vmax.f32 %v1802_v29, 1.1920929e-07  ;;  %v2196_v36 = vshrl.u32 %v2195_v35, 6  ;;  %v2171_v19 = vsel %vm2143_vm8, %v2170_v53, %v2169_v9  ;;  %vm2219_vm8 = vc.u32 %v2217_v23, %v2213_v18 }
 0x337   : > { %v1857_v52 = vmul.f32 0.6931472, %v2767_v21  ;;  %vm2383_vm5 = vcmp.ne.s32.totalorder %v2171_v19, 0  ;;  %vm2399_vm13 = vcmp.lt.s32.totalorder %v2171_v19, 0  ;;  %v2431_v1 = vadd.s32 100, %v2171_v19 }
 0x338   : > { %2768 = vlog2.f32 %v1835_v33  ;;  %vm5322_vm7 = vmand %vm2399_vm13, %vm2383_vm5  ;;  %v2197_v3 = vmul.u32 100, %v2196_v36  ;;  %v2220_v11 = vsel %vm2219_vm8, 1, %v2858_v63  ;;  %v2239_v9 = vmul.u32 41943, %v2234_v48 }
 0x339   : > { %v2509_v41 = vsel %vm5287_vm3, %v1857_v52, 0.0  ;;  %v2447_v16 = vsel %vm5322_vm7, %v2431_v1, %v2171_v19  ;;  %v2222_v51 = vadd.s32 %v2220_v11, %v2218_v31  ;;  %v2242_v21 = vshll.u32 %v2238_v55, 16 }
 0x33a   : > { %v2704_v45 = vadd.f32 7.8449516, %v2509_v41  ;;  %v2198_v12 = vsub.s32 %v5245_v27, %v2197_v3  ;;  %vm5340_vm11 = vcmp.lt.s32.totalorder %v2447_v16, 48  ;;  %v2237_v27 = vmul.u32 41943, %v2233_v2 }
 0x33b   : > { %v1804_v62 = vpop.f32.mrf.mxu0  ;;  %v2223_v49 = vadd.s32 %v2222_v51, %v2212_v30  ;;  %v2243_v43 = vshrl.u32 %v2238_v55, 16  ;;  %vm2259_vm0 = vcmp.lt.s32.totalorder %v5345_v22, 0  ;;  %v2260_v36 = vsub.s32 0, %v5345_v22 }
 0x33c   : > { %v2541_v32 = vmul.f32 0.5978655, %v2704_v45  ;;  %v1805_v20 = vadd.f32 %v1804_v62, %v5274_v38  ;;  %v2199_v37 = vsub.s32 0, %v2198_v12  ;;  %v2240_v4 = vshll.u32 %v2237_v27, 16 }
 0x33d   : > { %v2224_v0 = vadd.s32 %v2223_v49, %v2214_v34  ;;  %v2241_v35 = vshrl.u32 %v2237_v27, 16  ;;  %v5365_v19 = vsel %vm2259_vm0, %v2260_v36, %v5345_v22  ;;  %v5369_v30 = vadd.s32 %v4871_v50, %v5310_v24  ;;  %v1748_v24 = vpop.f32.mrf.mxu3 }
 0x33e   : > { %v2769_v28 = vpop.eup %2768  ;;  %2557 = vst [vmem:[%s5109_s21 + $0x30] sm:$0xff] %v2541_v32  ;;  %v1836_v6 = vmax.f32 %v1805_v20, 1.1920929e-07  ;;  %v2200_v40 = vsel %vm2172_vm6, %v2199_v37, %v2198_v12  ;;  %vm2244_vm6 = vc.u32 %v2236_v10, %v2240_v4  ;;  %v2246_v52 = vadd.s32 %v2240_v4, %v2236_v10 }
 0x33f   : > { %v1859_v38 = vmul.f32 0.6931472, %v2769_v28  ;;  %vm2384_vm2 = vcmp.ne.s32.totalorder %v2200_v40, 0  ;;  %vm2400_vm10 = vcmp.lt.s32.totalorder %v2200_v40, 0  ;;  %v2432_v29 = vadd.s32 100, %v2200_v40 }
 0x340   : > { %2770 = vlog2.f32 %v1836_v6  ;;  %vm5351_vm14 = vmand %vm2400_vm10, %vm2384_vm2  ;;  %v2225_v42 = vshrl.u32 %v2224_v0, 6  ;;  %v2245_v44 = vsel %vm2244_vm6, 1, %v2858_v63  ;;  %vm2248_vm1 = vc.u32 %v2246_v52, %v2242_v21 }
 0x341   : > { %v2510_v58 = vsel %vm5313_vm15, %v1859_v38, 0.0  ;;  %v2448_v60 = vsel %vm5351_vm14, %v2432_v29, %v2200_v40  ;;  %v2249_v41 = vsel %vm2248_vm1, 1, %v2858_v63  ;;  %v2262_v62 = vand.u32 65535, %v5365_v19 }
 0x342   : > { %v2705_v17 = vadd.f32 7.8449516, %v2510_v58  ;;  %v2226_v26 = vmul.u32 100, %v2225_v42  ;;  %vm5375_vm3 = vcmp.lt.s32.totalorder %v2448_v60, 48  ;;  %v2263_v23 = vshrl.u32 %v5365_v19, 16 }
 0x343   : > { %v1807_v39 = vpop.f32.mrf.mxu0  ;;  %vm2288_vm15 = vcmp.lt.s32.totalorder %v5369_v30, 0  ;;  %v2266_v5 = vmul.u32 41943, %v2262_v62  ;;  %v2265_v31 = vmul.u32 2622, %v2262_v62 }
 0x344   : > { %v2542_v33 = vmul.f32 0.5978655, %v2705_v17  ;;  %v1808_v56 = vadd.f32 %v1807_v39, %v1742_v13  ;;  %v2247_v13 = vadd.s32 %v2245_v44, %v2239_v9  ;;  %v2227_v45 = vsub.s32 %v5301_v7, %v2226_v26 }
 0x345   : > { %v2289_v7 = vsub.s32 0, %v5369_v30  ;;  %v2267_v28 = vmul.u32 2622, %v2263_v23  ;;  %v2268_v2 = vmul.u32 41943, %v2263_v23  ;;  %v2269_v48 = vshll.u32 %v2266_v5, 16  ;;  %v1751_v52 = vpop.f32.mrf.mxu3 }
 0x346   : > { %v2771_v53 = vpop.eup %2770  ;;  %2558 = vst [vmem:[%s5109_s21 + $0x38] sm:$0xff] %v2542_v33  ;;  %v1837_v59 = vmax.f32 %v1808_v56, 1.1920929e-07  ;;  %v2251_v1 = vadd.s32 %v2249_v41, %v2247_v13  ;;  %v2228_v20 = vsub.s32 0, %v2227_v45 }
 0x347   : > { %v1861_v25 = vmul.f32 0.6931472, %v2771_v53  ;;  %v2271_v58 = vshll.u32 %v2267_v28, 16  ;;  %v2272_v46 = vshrl.u32 %v2267_v28, 16  ;;  %v2275_v40 = vadd.s32 %v2269_v48, %v2265_v31 }
 0x348   : > { %2772 = vlog2.f32 %v1837_v59  ;;  %v2252_v16 = vadd.s32 %v2251_v1, %v2241_v35  ;;  %v2229_v6 = vsel %vm2201_vm12, %v2228_v20, %v2227_v45  ;;  %vm2273_vm12 = vc.u32 %v2265_v31, %v2269_v48 }
 0x349   : > { %v2511_v18 = vsel %vm5340_vm11, %v1861_v25, 0.0  ;;  %vm2385_vm5 = vcmp.ne.s32.totalorder %v2229_v6, 0  ;;  %vm2401_vm13 = vcmp.lt.s32.totalorder %v2229_v6, 0  ;;  %v2433_v37 = vadd.s32 100, %v2229_v6 }
 0x34a   : > { %v2706_v8 = vadd.f32 7.8449516, %v2511_v18  ;;  %v2253_v11 = vadd.s32 %v2252_v16, %v2243_v43  ;;  %vm5385_vm7 = vmand %vm2401_vm13, %vm2385_vm5  ;;  %v2274_v29 = vsel %vm2273_vm12, 1, %v2858_v63  ;;  %vm2277_vm9 = vc.u32 %v2275_v40, %v2271_v58 }
 0x34b   : > { %v1810_v32 = vpop.f32.mrf.mxu0  ;;  %v2449_v10 = vsel %vm5385_vm7, %v2433_v37, %v2229_v6  ;;  %v2276_v15 = vadd.s32 %v2274_v29, %v2268_v2  ;;  %v5397_v0 = vsel %vm2288_vm15, %v2289_v7, %v5369_v30  ;;  %v2278_v21 = vsel %vm2277_vm9, 1, %v2858_v63 }
 0x34c   : > { %v2543_v12 = vmul.f32 0.5978655, %v2706_v8  ;;  %v1811_v34 = vadd.f32 %v1810_v32, %v1745_v47  ;;  %v2254_v55 = vshrl.u32 %v2253_v11, 6  ;;  %v2270_v47 = vshrl.u32 %v2266_v5, 16 }
 0x34d   : > { %v2291_v33 = vand.u32 65535, %v5397_v0  ;;  %v2292_v56 = vshrl.u32 %v5397_v0, 16  ;;  %v2280_v42 = vadd.s32 %v2278_v21, %v2276_v15  ;;  %v1892_v43 = vadd.s32 112, %v4868_v57 }
 0x34e   : > { %v2773_v38 = vpop.eup %2772  ;;  %2559 = vst [vmem:[%s5109_s21 + $0x40] sm:$0xff] %v2543_v12  ;;  %v1838_v54 = vmax.f32 %v1811_v34, 1.1920929e-07  ;;  %v2255_v17 = vmul.u32 100, %v2254_v55  ;;  %vm5404_vm8 = vcmp.lt.s32.totalorder %v2449_v10, 48 }
 0x34f   : > { %v1863_v51 = vmul.f32 0.6931472, %v2773_v38  ;;  %v2295_v44 = vmul.u32 41943, %v2291_v33  ;;  %v2296_v36 = vmul.u32 2622, %v2292_v56  ;;  %v2281_v26 = vadd.s32 %v2280_v42, %v2270_v47  ;;  %v1754_v47 = vpop.f32.mrf.mxu3 }
 0x350   : > { %2774 = vlog2.f32 %v1838_v54  ;;  %v2256_v4 = vsub.s32 %v5329_v61, %v2255_v17  ;;  %v2294_v13 = vmul.u32 2622, %v2291_v33  ;;  %v2297_v41 = vmul.u32 41943, %v2292_v56 }
 0x351   : > { %v2512_v49 = vsel %vm5375_vm3, %v1863_v51, 0.0  ;;  %v2298_v1 = vshll.u32 %v2295_v44, 16  ;;  %v5412_v62 = vadd.s32 %v4871_v50, %v1892_v43  ;;  %v2300_v32 = vshll.u32 %v2296_v36, 16 }
 0x352   : > { %v2707_v39 = vadd.f32 7.8449516, %v2512_v49  ;;  %v2257_v59 = vsub.s32 0, %v2256_v4  ;;  %v2299_v14 = vshrl.u32 %v2295_v44, 16  ;;  %v1893_v38 = vadd.s32 120, %v4868_v57 }
 0x353   : > { %v1813_v9 = vpop.f32.mrf.mxu0  ;;  %v2304_v16 = vadd.s32 %v2298_v1, %v2294_v13  ;;  %vm2317_vm14 = vcmp.lt.s32.totalorder %v5412_v62, 0  ;;  %v2318_v48 = vsub.s32 0, %v5412_v62  ;;  %v2301_v27 = vshrl.u32 %v2296_v36, 16 }
 0x354   : > { %v2544_v60 = vmul.f32 0.5978655, %v2707_v39  ;;  %v1814_v35 = vadd.f32 %v1813_v9, %v1748_v24  ;;  %v2258_v45 = vsel %vm2230_vm4, %v2257_v59, %v2256_v4  ;;  %v2282_v24 = vadd.s32 %v2281_v26, %v2272_v46 }
 0x355   : > { %vm2386_vm11 = vcmp.ne.s32.totalorder %v2258_v45, 0  ;;  %vm2402_vm2 = vcmp.lt.s32.totalorder %v2258_v45, 0  ;;  %v2434_v8 = vadd.s32 100, %v2258_v45  ;;  %vm2302_vm4 = vc.u32 %v2294_v13, %v2298_v1 }
 0x356   : > { %v2775_v61 = vpop.eup %2774  ;;  %2560 = vst [vmem:[%s5109_s21 + $0x48] sm:$0xff] %v2544_v60  ;;  %v1839_v25 = vmax.f32 %v1814_v35, 1.1920929e-07  ;;  %vm5416_vm10 = vmand %vm2402_vm2, %vm2386_vm11  ;;  %v2283_v12 = vshrl.u32 %v2282_v24, 6  ;;  %v2303_v34 = vsel %vm2302_vm4, 1, %v2858_v63  ;;  %vm2306_vm6 = vc.u32 %v2304_v16, %v2300_v32 }
 0x357   : > { %v1865_v18 = vmul.f32 0.6931472, %v2775_v61  ;;  %v2450_v5 = vsel %vm5416_vm10, %v2434_v8, %v2258_v45  ;;  %v2305_v6 = vadd.s32 %v2303_v34, %v2297_v41  ;;  %v2307_v2 = vsel %vm2306_vm6, 1, %v2858_v63  ;;  %v1757_v1 = vpop.f32.mrf.mxu3 }
 0x358   : > { %2776 = vlog2.f32 %v1839_v25  ;;  %v2284_v11 = vmul.u32 100, %v2283_v12  ;;  %vm5428_vm1 = vcmp.lt.s32.totalorder %v2450_v5, 48  ;;  %v5436_v40 = vsel %vm2317_vm14, %v2318_v48, %v5412_v62 }
 0x359   : > { %v2513_v3 = vsel %vm5404_vm8, %v1865_v18, 0.0  ;;  %v2309_v55 = vadd.s32 %v2307_v2, %v2305_v6  ;;  %v5439_v57 = vadd.s32 %v4871_v50, %v1893_v38  ;;  %v2320_v10 = vand.u32 65535, %v5436_v40 }
 0x35a   : > { %v2708_v20 = vadd.f32 7.8449516, %v2513_v3  ;;  %v2285_v46 = vsub.s32 %v5365_v19, %v2284_v11  ;;  %v2321_v17 = vshrl.u32 %v5436_v40, 16 }
 0x35b   : > { %v1816_v7 = vpop.f32.mrf.mxu0  ;;  %v2310_v49 = vadd.s32 %v2309_v55, %v2299_v14  ;;  %vm2346_vm3 = vcmp.lt.s32.totalorder %v5439_v57, 0  ;;  %v2347_v19 = vsub.s32 0, %v5439_v57  ;;  %v2324_v4 = vmul.u32 41943, %v2320_v10 }
 0x35c   : > { %v2545_v31 = vmul.f32 0.5978655, %v2708_v20  ;;  %v1817_v28 = vadd.f32 %v1816_v7, %v1751_v52  ;;  %v2286_v39 = vsub.s32 0, %v2285_v46  ;;  %v2323_v33 = vmul.u32 2622, %v2320_v10 }
 0x35d   : > { %v2311_v9 = vadd.s32 %v2310_v49, %v2301_v27  ;;  %v2325_v56 = vmul.u32 2622, %v2321_v17  ;;  %v5452_v60 = vsel %vm2346_vm3, %v2347_v19, %v5439_v57  ;;  %v2327_v53 = vshll.u32 %v2324_v4, 16 }
 0x35e   : > { %v2777_v54 = vpop.eup %2776  ;;  %2561 = vst [vmem:[%s5109_s21 + $0x50] sm:$0xff] %v2545_v31  ;;  %v1840_v51 = vmax.f32 %v1817_v28, 1.1920929e-07  ;;  %v2287_v50 = vsel %vm2259_vm0, %v2286_v39, %v2285_v46  ;;  %v2326_v44 = vmul.u32 41943, %v2321_v17  ;;  %v2349_v61 = vand.u32 65535, %v5452_v60 }
 0x35f   : > { %v1867_v58 = vmul.f32 0.6931472, %v2777_v54  ;;  %vm2387_vm5 = vcmp.ne.s32.totalorder %v2287_v50, 0  ;;  %vm2403_vm13 = vcmp.lt.s32.totalorder %v2287_v50, 0  ;;  %v2435_v42 = vadd.s32 100, %v2287_v50  ;;  %v1760_v39 = vpop.f32.mrf.mxu3 }
 0x360   : > { %2778 = vlog2.f32 %v1840_v51  ;;  %vm2419_vm7 = vmand %vm2403_vm13, %vm2387_vm5  ;;  %v2312_v52 = vshrl.u32 %v2311_v9, 6  ;;  %v2329_v36 = vshll.u32 %v2325_v56, 16  ;;  %v2328_v41 = vshrl.u32 %v2324_v4, 16 }
 0x361   : > { %v2514_v29 = vsel %vm5428_vm1, %v1867_v58, 0.0  ;;  %v2451_v22 = vsel %vm2419_vm7, %v2435_v42, %v2287_v50  ;;  %vm2331_vm12 = vc.u32 %v2323_v33, %v2327_v53  ;;  %v2333_v18 = vadd.s32 %v2327_v53, %v2323_v33 }
 0x362   : > { %v2709_v15 = vadd.f32 7.8449516, %v2514_v29  ;;  %vm2467_vm0 = vcmp.lt.s32.totalorder %v2451_v22, 48  ;;  %v2313_v13 = vmul.u32 100, %v2312_v52  ;;  %v2350_v45 = vshrl.u32 %v5452_v60, 16 }
 0x363   : > { %v1819_v21 = vpop.f32.mrf.mxu0  ;;  %v2332_v23 = vsel %vm2331_vm12, 1, %v2858_v63  ;;  %vm2335_vm9 = vc.u32 %v2333_v18, %v2329_v36  ;;  %v2353_v20 = vmul.u32 41943, %v2349_v61  ;;  %v2352_v7 = vmul.u32 2622, %v2349_v61 }
 0x364   : > { %v2546_v35 = vmul.f32 0.5978655, %v2709_v15  ;;  %v1820_v43 = vadd.f32 %v1819_v21, %v1754_v47  ;;  %v2314_v3 = vsub.s32 %v5397_v0, %v2313_v13  ;;  %v2334_v32 = vadd.s32 %v2332_v23, %v2326_v44 }
 0x365   : > { %v2336_v5 = vsel %vm2335_vm9, 1, %v2858_v63  ;;  %v2354_v12 = vmul.u32 2622, %v2350_v45  ;;  %v2356_v6 = vshll.u32 %v2353_v20, 16  ;;  %v2330_v11 = vshrl.u32 %v2325_v56, 16 }
 0x366   : > { %v2779_v59 = vpop.eup %2778  ;;  %2562 = vst [vmem:[%s5109_s21 + $0x58] sm:$0xff] %v2546_v35  ;;  %v1841_v26 = vmax.f32 %v1820_v43, 1.1920929e-07  ;;  %v2315_v14 = vsub.s32 0, %v2314_v3  ;;  %v2338_v28 = vadd.s32 %v2336_v5, %v2334_v32  ;;  %v2355_v2 = vmul.u32 41943, %v2350_v45 }
 0x367   : > { %v1869_v25 = vmul.f32 0.6931472, %v2779_v59  ;;  %v2358_v48 = vshll.u32 %v2354_v12, 16  ;;  %vm2360_vm10 = vc.u32 %v2352_v7, %v2356_v6  ;;  %v2362_v27 = vadd.s32 %v2356_v6, %v2352_v7 }
 0x368   : > { %2780 = vlog2.f32 %v1841_v26  ;;  %v2316_v0 = vsel %vm2288_vm15, %v2315_v14, %v2314_v3  ;;  %v2339_v51 = vadd.s32 %v2338_v28, %v2328_v41  ;;  %v2357_v58 = vshrl.u32 %v2353_v20, 16 }
 0x369   : > { %v2515_v8 = vsel %vm2467_vm0, %v1869_v25, 0.0  ;;  %vm2388_vm8 = vcmp.ne.s32.totalorder %v2316_v0, 0  ;;  %vm2404_vm11 = vcmp.lt.s32.totalorder %v2316_v0, 0  ;;  %v2436_v38 = vadd.s32 100, %v2316_v0 }
 0x36a   : > { %v2710_v24 = vadd.f32 7.8449516, %v2515_v8  ;;  %vm2420_vm2 = vmand %vm2404_vm11, %vm2388_vm8  ;;  %v2361_v46 = vsel %vm2360_vm10, 1, %v2858_v63  ;;  %v2340_v30 = vadd.s32 %v2339_v51, %v2330_v11  ;;  %vm2364_vm15 = vc.u32 %v2362_v27, %v2358_v48 }
 0x36b   : > { %v1822_v16 = vpop.f32.mrf.mxu0  ;;  %v2452_v47 = vsel %vm2420_vm2, %v2436_v38, %v2316_v0  ;;  %v2363_v49 = vadd.s32 %v2361_v46, %v2355_v2  ;;  %v2359_v17 = vshrl.u32 %v2354_v12, 16  ;;  %v2365_v29 = vsel %vm2364_vm15, 1, %v2858_v63 }
 0x36c   : > { %v2547_v34 = vmul.f32 0.5978655, %v2710_v24  ;;  %v1823_v31 = vadd.f32 %v1822_v16, %v1757_v1  ;;  %vm2468_vm4 = vcmp.lt.s32.totalorder %v2452_v47, 48  ;;  %v2341_v15 = vshrl.u32 %v2340_v30, 6 }
 0x36d   : > { %v2367_v4 = vadd.s32 %v2365_v29, %v2363_v49 }
 0x36e   : > { %2563 = vst [vmem:[%s5109_s21 + $0x60] sm:$0xff] %v2547_v34  ;;  %v2781_v54 = vpop.eup %2780  ;;  %v1842_v37 = vmax.f32 %v1823_v31, 1.1920929e-07  ;;  %v2342_v33 = vmul.u32 100, %v2341_v15 }
 0x36f   : > { %v1871_v55 = vmul.f32 0.6931472, %v2781_v54  ;;  %v2368_v56 = vadd.s32 %v2367_v4, %v2357_v58 }
 0x370   : > { %2782 = vlog2.f32 %v1842_v37  ;;  %v2343_v42 = vsub.s32 %v5436_v40, %v2342_v33 }
 0x371   : > { %v2516_v10 = vsel %vm2468_vm4, %v1871_v55, 0.0  ;;  %v2369_v43 = vadd.s32 %v2368_v56, %v2359_v17 }
 0x372   : > { %v2711_v19 = vadd.f32 7.8449516, %v2516_v10  ;;  %v2344_v53 = vsub.s32 0, %v2343_v42 }
 0x373   : > { %v1825_v9 = vpop.f32.mrf.mxu0  ;;  %v2370_v59 = vshrl.u32 %v2369_v43, 6 }
 0x374   : > { %v1826_v50 = vadd.f32 %v1825_v9, %v1760_v39  ;;  %v2548_v21 = vmul.f32 0.5978655, %v2711_v19  ;;  %v2345_v63 = vsel %vm2317_vm14, %v2344_v53, %v2343_v42 }
 0x375   : > { %v2371_v22 = vmul.u32 100, %v2370_v59  ;;  %vm2389_vm6 = vcmp.ne.s32.totalorder %v2345_v63, 0  ;;  %vm2405_vm1 = vcmp.lt.s32.totalorder %v2345_v63, 0  ;;  %v2437_v36 = vadd.s32 100, %v2345_v63 }
 0x376   : > { %v1843_v35 = vmax.f32 %v1826_v50, 1.1920929e-07  ;;  %2564 = vst [vmem:[%s5109_s21 + $0x68] sm:$0xff] %v2548_v21  ;;  %v2783_v52 = vpop.eup %2782  ;;  %vm2421_vm5 = vmand %vm2405_vm1, %vm2389_vm6 }
 0x377   : > { %v1873_v44 = vmul.f32 0.6931472, %v2783_v52  ;;  %v2372_v61 = vsub.s32 %v5452_v60, %v2371_v22  ;;  %v2453_v25 = vsel %vm2421_vm5, %v2437_v36, %v2345_v63 }
 0x378   : > { %2784 = vlog2.f32 %v1843_v35  ;;  %vm2469_vm13 = vcmp.lt.s32.totalorder %v2453_v25, 48 }
 0x379   : > { %v2373_v40 = vsub.s32 0, %v2372_v61  ;;  %v2517_v13 = vsel %vm2469_vm13, %v1873_v44, 0.0 }
 0x37a   : > { %v2712_v41 = vadd.f32 7.8449516, %v2517_v13 }
 0x37b   : > { %v2374_v62 = vsel %vm2346_vm3, %v2373_v40, %v2372_v61 }
 0x37c   : > { %vm2390_vm14 = vcmp.ne.s32.totalorder %v2374_v62, 0  ;;  %vm2406_vm7 = vcmp.lt.s32.totalorder %v2374_v62, 0  ;;  %v2438_v45 = vadd.s32 100, %v2374_v62  ;;  %v2549_v1 = vmul.f32 0.5978655, %v2712_v41 }
 0x37d   : > { %vm2422_vm0 = vmand %vm2406_vm7, %vm2390_vm14 }
 0x37e   : > { %v2785_v26 = vpop.eup %2784  ;;  %v2454_v8 = vsel %vm2422_vm0, %v2438_v45, %v2374_v62  ;;  %2565 = vst [vmem:[%s5109_s21 + $0x70] sm:$0xff] %v2549_v1 }
 0x37f   : > { %v1875_v18 = vmul.f32 0.6931472, %v2785_v26  ;;  %vm2470_vm12 = vcmp.lt.s32.totalorder %v2454_v8, 48 }
 0x381   : > { %v2518_v60 = vsel %vm2470_vm12, %v1875_v18, 0.0 }
 0x382   : > { %v2713_v3 = vadd.f32 7.8449516, %v2518_v60 }
 0x384   : > { %v2550_v23 = vmul.f32 0.5978655, %v2713_v3 }
 0x386   : > { %2566 = vst [vmem:[%s5109_s21 + $0x78] sm:$0xff] %v2550_v23 }
 0x387 PF: > { %s13_s12 = sadd.s32 1, %s2856_s12  }
 0x388   : > { %p10_p4 = scmp.ge.s32.totalorder %s13_s12, 4  }
 0x38a   :  { %12 = sbr.rel (!%p10_p4) target bundleno = 1 (0x1), region = 62 }

</bundles_post_ra>
